<compile_context>
chip_gen: v7x
topology: tpu7x:2x2x1
jax: 0.10.0
libtpu: 0.0.40
codegen_flags: <defaults>
</compile_context>

<pallas_src>
import functools

import numpy as np

import jax
import jax.numpy as jnp
from jax.experimental import pallas as pl
from jax.experimental.pallas import tpu as pltpu


# ============================================================================
# Pallas kernels
# ============================================================================
def _conv0_kernel(x_ref, w_ref, b_ref, o_ref):
    """conv0 as one dense GEMM: rows = (image, row), lanes = (out-col, Cout)."""
    acc = jnp.dot(x_ref[...], w_ref[...], preferred_element_type=jnp.float32)
    acc = jnp.maximum(acc + b_ref[...], 0.0)
    o_ref[...] = acc.astype(o_ref.dtype)


def _conv1_kernel(x_ref, w_ref, b_ref, o_ref, *, ng, m, wo):
    """conv1: s2d im2col GEMM, vertical taps as row-shifted slices.

    x_ref: (ng, (Ho+1)*Wo, K) bf16   w_ref: (2, K, Co) bf16   b_ref: (1, Co) f32
    o_ref: (ng, Ho*Wo, Co) bf16
    """
    for g in range(ng):
        acc = jnp.dot(x_ref[g, pl.ds(0, m), :], w_ref[0],
                      preferred_element_type=jnp.float32)
        acc = acc + jnp.dot(x_ref[g, pl.ds(wo, m), :], w_ref[1],
                            preferred_element_type=jnp.float32)
        acc = jnp.maximum(acc + b_ref[...], 0.0)
        o_ref[g, :, :] = acc.astype(o_ref.dtype)


def _tail_kernel(act_ref, w2_ref, b2_ref, w3_ref, b3_ref,
                 wf0_ref, bf0_ref, wf1_ref, bf1_ref,
                 wfa_ref, bfa_ref, wfm_ref, bfm_ref, wfl_ref, bfl_ref,
                 eps_ref, h2_ref, dz_ref, s3_ref, *, ng):
    """conv2 + conv3 + fc0/fc1/fc2 + reparameterise + (z2 - z1), fully fused.

    act_ref rows are ordered (conv2-output-row in [1,3,5,7,0,2,4,6], image),
    so conv2's output can be dumped contiguously into the zero-padded,
    even/odd-reordered conv3 input scratch `s3_ref` (10*ng rows x 256 lanes).
    conv3's 4 vertical taps and fc0's flatten then become contiguous-row GEMMs.
    """
    # ---- conv2: one GEMM over all ng images --------------------------------
    o2 = jnp.dot(act_ref[...], w2_ref[...], preferred_element_type=jnp.float32)
    o2 = jnp.maximum(o2 + b2_ref[...], 0.0)                      # (8*ng, 256)

    # ---- build conv3's padded, row-reordered input in VMEM -----------------
    zrow = jnp.zeros((ng, s3_ref.shape[1]), s3_ref.dtype)
    s3_ref[pl.ds(0, ng), :] = zrow                               # top pad row
    s3_ref[pl.ds(9 * ng, ng), :] = zrow                          # bottom pad row
    s3_ref[pl.ds(ng, 8 * ng), :] = o2.astype(s3_ref.dtype)       # real rows

    # ---- conv3: 4 vertical-tap GEMMs on contiguous row slices --------------
    starts = (0, 5, 1, 6)                    # row-block start per kh (x ng)
    acc3 = jnp.dot(s3_ref[pl.ds(starts[0] * ng, 4 * ng), :], w3_ref[0],
                   preferred_element_type=jnp.float32)
    for kh in range(1, 4):
        acc3 = acc3 + jnp.dot(s3_ref[pl.ds(starts[kh] * ng, 4 * ng), :],
                              w3_ref[kh], preferred_element_type=jnp.float32)
    o3 = jnp.maximum(acc3 + b3_ref[...], 0.0).astype(jnp.bfloat16)  # (4*ng, 128)

    # ---- fc0: fold the 4 spatial-row blocks, rows collapse to images -------
    acc0 = jnp.dot(o3[0:ng], wf0_ref[0], preferred_element_type=jnp.float32)
    for p3 in range(1, 4):
        acc0 = acc0 + jnp.dot(o3[p3 * ng:(p3 + 1) * ng], wf0_ref[p3],
                              preferred_element_type=jnp.float32)
    h = jnp.maximum(acc0 + bf0_ref[...], 0.0).astype(jnp.bfloat16)  # (ng, 256)

    # ---- fc1 + ReLU ---------------------------------------------------------
    h = jnp.dot(h, wf1_ref[...], preferred_element_type=jnp.float32)
    h = jnp.maximum(h + bf1_ref[...], 0.0).astype(jnp.bfloat16)

    # ---- fc2 (lane-padded to 128) + reparameterisation ----------------------
    a_full = jnp.dot(h, wfa_ref[...], preferred_element_type=jnp.float32) + bfa_ref[...]
    mu0 = jnp.dot(h, wfm_ref[...], preferred_element_type=jnp.float32) + bfm_ref[...]
    lv0 = jnp.dot(h, wfl_ref[...], preferred_element_type=jnp.float32) + bfl_ref[...]
    z = mu0 + eps_ref[...] * jnp.exp(0.5 * lv0)                  # (ng, 128)

    h2_ref[...] = a_full                                         # [mu | logvar | 0]
    for p in range(ng // 2):                                     # z2 - z1 per pair
        dz_ref[pl.ds(p, 1), :] = z[2 * p + 1:2 * p + 2, :] - z[2 * p:2 * p + 1, :]


# ============================================================================
# pallas_call wrappers
# ============================================================================
def _conv0_call(act0, w0, b0):
    n_blk, rows, k = act0.shape
    n = w0.shape[1]
    return pl.pallas_call(
        _conv0_kernel,
        out_shape=jax.ShapeDtypeStruct((n_blk, rows, n), jnp.bfloat16),
        grid_spec=pltpu.PrefetchScalarGridSpec(
            num_scalar_prefetch=0,
            grid=(n_blk,),
            in_specs=[
                pl.BlockSpec((None, rows, k), lambda i: (i, 0, 0)),
                pl.BlockSpec((k, n), lambda i: (0, 0)),
                pl.BlockSpec((1, n), lambda i: (0, 0)),
            ],
            out_specs=pl.BlockSpec((None, rows, n), lambda i: (i, 0, 0)),
        ),
        compiler_params=pltpu.CompilerParams(dimension_semantics=("parallel",)),
    )(act0, w0, b0)


def _conv1_call(act1, w1, b1, *, ng, ho, wo):
    n2, rows, k = act1.shape
    nb = n2 // ng
    co = w1.shape[2]
    m = ho * wo
    kernel = functools.partial(_conv1_kernel, ng=ng, m=m, wo=wo)
    return pl.pallas_call(
        kernel,
        out_shape=jax.ShapeDtypeStruct((n2, m, co), jnp.bfloat16),
        grid_spec=pltpu.PrefetchScalarGridSpec(
            num_scalar_prefetch=0,
            grid=(nb,),
            in_specs=[
                pl.BlockSpec((ng, rows, k), lambda i: (i, 0, 0)),
                pl.BlockSpec((2, k, co), lambda i: (0, 0, 0)),
                pl.BlockSpec((1, co), lambda i: (0, 0)),
            ],
            out_specs=pl.BlockSpec((ng, m, co), lambda i: (i, 0, 0)),
        ),
        compiler_params=pltpu.CompilerParams(dimension_semantics=("parallel",)),
    )(act1, w1, b1)


def _tail_call(act2, p, eps, *, ng):
    nb, rows, k = act2.shape
    kernel = functools.partial(_tail_kernel, ng=ng)
    out_shape = (
        jax.ShapeDtypeStruct((nb, ng, 128), jnp.float32),        # [mu | logvar | 0]
        jax.ShapeDtypeStruct((nb, ng // 2, 128), jnp.float32),   # z2 - z1 (padded)
    )
    in_specs = [
        pl.BlockSpec((None, rows, k), lambda i: (i, 0, 0)),      # act2
        pl.BlockSpec((k, 256), lambda i: (0, 0)),                # conv2 weight
        pl.BlockSpec((1, 256), lambda i: (0, 0)),                # conv2 bias
        pl.BlockSpec((4, 256, 128), lambda i: (0, 0, 0)),        # conv3 taps
        pl.BlockSpec((1, 128), lambda i: (0, 0)),                # conv3 bias
        pl.BlockSpec((4, 128, 256), lambda i: (0, 0, 0)),        # fc0 (by spatial row)
        pl.BlockSpec((1, 256), lambda i: (0, 0)),                # fc0 bias
        pl.BlockSpec((256, 256), lambda i: (0, 0)),              # fc1
        pl.BlockSpec((1, 256), lambda i: (0, 0)),                # fc1 bias
        pl.BlockSpec((256, 128), lambda i: (0, 0)),              # fc2  [mu|logvar|0]
        pl.BlockSpec((1, 128), lambda i: (0, 0)),
        pl.BlockSpec((256, 128), lambda i: (0, 0)),              # fc2  mu only
        pl.BlockSpec((1, 128), lambda i: (0, 0)),
        pl.BlockSpec((256, 128), lambda i: (0, 0)),              # fc2  logvar only
        pl.BlockSpec((1, 128), lambda i: (0, 0)),
        pl.BlockSpec((None, ng, 128), lambda i: (i, 0, 0)),      # eps
    ]
    out_specs = (
        pl.BlockSpec((None, ng, 128), lambda i: (i, 0, 0)),
        pl.BlockSpec((None, ng // 2, 128), lambda i: (i, 0, 0)),
    )
    return pl.pallas_call(
        kernel,
        out_shape=out_shape,
        grid_spec=pltpu.PrefetchScalarGridSpec(
            num_scalar_prefetch=0,
            grid=(nb,),
            in_specs=in_specs,
            out_specs=out_specs,
            scratch_shapes=[pltpu.VMEM((10 * ng, 256), jnp.bfloat16)],
        ),
        compiler_params=pltpu.CompilerParams(dimension_semantics=("parallel",)),
    )(act2, p["w2c"], p["b2c"], p["w3c"], p["b3c"],
      p["wf0"], p["bf0"], p["wf1"], p["bf1"],
      p["wfa"], p["bfa"], p["wfm"], p["bfm"], p["wfl"], p["bfl"], eps)


# ============================================================================
# XLA glue (tiny, fuses under jit)
# ============================================================================
def _rowconv_act(x_nhwc, n_blk):
    """Row-formulation activation: rows=(image, out-row), lanes=(kh, w, cin)."""
    n2, h, w, c = x_nhwc.shape
    ho = h // 2
    xr = x_nhwc.reshape(n2, h, w * c)
    xrp = jnp.pad(xr, ((0, 0), (1, 1), (0, 0)))                  # zero pad rows
    taps = [xrp[:, kh:kh + h:2, :] for kh in range(4)]           # rows 2p+kh
    act = jnp.concatenate(taps, axis=-1)                         # (n2, ho, 4*w*c)
    return act.reshape(n_blk, (n2 // n_blk) * ho, 4 * w * c)


def _s2d_fold(x_nhwc):
    """pad-1 + 2x2 space-to-depth + horizontal-tap fold (for conv1's im2col)."""
    n, h, w, c = x_nhwc.shape
    ho, wo = h // 2, w // 2
    hs, ws = ho + 1, wo + 1
    xp = jnp.pad(x_nhwc, ((0, 0), (1, 1), (1, 1), (0, 0)))
    y = xp.reshape(n, hs, 2, ws, 2, c)
    y = jnp.transpose(y, (0, 1, 3, 2, 4, 5)).reshape(n, hs, ws, 4 * c)
    z = jnp.concatenate([y[:, :, :wo, :], y[:, :, 1:, :]], axis=-1)
    return z.reshape(n, hs * wo, 8 * c)


def _tail_act(x_nhwc, n_blk):
    """conv2 row-formulation activation with rows reordered
    (out-row in [1,3,5,7,0,2,4,6], image-minor) for the fused tail kernel."""
    n2, h, w, c = x_nhwc.shape                                   # (2B, 16, 16, 32)
    ho = h // 2                                                  # 8
    xr = x_nhwc.reshape(n2, h, w * c)
    xrp = jnp.pad(xr, ((0, 0), (1, 1), (0, 0)))                  # (2B, 18, 512)
    taps = [xrp[:, kh:kh + h:2, :] for kh in range(4)]
    a = jnp.concatenate(taps, axis=-1)                           # (2B, 8, 2048)
    a = jnp.concatenate([a[:, 1::2, :], a[:, 0::2, :]], axis=1)  # odd rows first
    ng = n2 // n_blk
    a = a.reshape(n_blk, ng, ho, 4 * w * c)
    a = jnp.transpose(a, (0, 2, 1, 3))                           # image-minor
    return a.reshape(n_blk, ho * ng, 4 * w * c)


# ============================================================================
# Parameters: synthetic init in PyTorch layout + one-time kernel-layout prep
# ============================================================================
def init_params(key, latent_dim=10, input_channels=1):
    """Synthetic parameters in PyTorch layout (conv: OIHW; fc: (in, out))."""
    keys = jax.random.split(key, 14)
    p = {}
    chans = [input_channels, 32, 32, 32, 32]
    for i in range(4):
        fan_in = chans[i] * 16
        p[f"conv{i}_w"] = jax.random.normal(
            keys[i], (chans[i + 1], chans[i], 4, 4), jnp.float32) / np.sqrt(fan_in)
        p[f"conv{i}_b"] = 0.05 * jax.random.normal(keys[4 + i], (chans[i + 1],),
                                                   jnp.float32)
    dims = [32 * 4 * 4, 256, 256, 2 * latent_dim]
    for i in range(3):
        p[f"fc{i}_w"] = jax.random.normal(
            keys[8 + i], (dims[i], dims[i + 1]), jnp.float32) / np.sqrt(dims[i])
        p[f"fc{i}_b"] = 0.05 * jax.random.normal(keys[11 + i], (dims[i + 1],),
                                                 jnp.float32)
    return p


def _fold_rowconv_taps(w_oihw, in_w, out_w):
    """Fold a k=4/s=2/p=1 conv into per-vertical-tap dense matrices for the
    'rows = image row, lanes = (width, channel)' GEMM formulation.
    Returns (4, in_w*Cin, out_w*Cout): K order (j, cin), N order (q, cout)."""
    w = np.asarray(w_oihw, np.float32)
    co, ci, _, _ = w.shape
    big = np.zeros((4, in_w, ci, out_w, co), np.float32)
    for kh in range(4):
        for kw in range(4):
            for q in range(out_w):
                j = 2 * q + kw - 1                   # input column (pad dropped)
                if 0 <= j < in_w:
                    big[kh, j, :, q, :] += w[:, :, kh, kw].T
    return big.reshape(4, in_w * ci, out_w * co)


def _fold_s2d_weight(w_oihw):
    """(Cout,Cin,4,4) -> (dh, (dw,a,c,cin), Cout) for the s2d im2col GEMM."""
    w = np.asarray(w_oihw, np.float32)
    co, ci, _, _ = w.shape
    w = w.reshape(co, ci, 2, 2, 2, 2)                # (co, ci, dh, a, dw, c)
    w = np.transpose(w, (2, 4, 3, 5, 1, 0))          # (dh, dw, a, c, ci, co)
    return w.reshape(2, 8 * ci, co)


def prepare_params(raw, latent_dim=10):
    L = latent_dim
    p = {}
    # conv0: row formulation, all 4 vertical taps folded into one matrix.
    t0 = _fold_rowconv_taps(raw["conv0_w"], in_w=64, out_w=32)
    p["w0c"] = jnp.asarray(t0.reshape(-1, t0.shape[-1]), jnp.bfloat16)
    p["b0c"] = jnp.asarray(np.tile(np.asarray(raw["conv0_b"]), 32)[None, :],
                           jnp.float32)
    # conv1: s2d formulation with real 32 channels (K = 256).
    p["w1c"] = jnp.asarray(_fold_s2d_weight(raw["conv1_w"]), jnp.bfloat16)
    p["b1c"] = jnp.asarray(np.asarray(raw["conv1_b"])[None, :], jnp.float32)
    # conv2: row formulation, one dense matrix (inside the fused tail kernel).
    t2 = _fold_rowconv_taps(raw["conv2_w"], in_w=16, out_w=8)
    p["w2c"] = jnp.asarray(t2.reshape(-1, t2.shape[-1]), jnp.bfloat16)
    p["b2c"] = jnp.asarray(np.tile(np.asarray(raw["conv2_b"]), 8)[None, :],
                           jnp.float32)
    # conv3: row formulation kept per vertical tap (reads the VMEM scratch).
    p["w3c"] = jnp.asarray(_fold_rowconv_taps(raw["conv3_w"], in_w=8, out_w=4),
                           jnp.bfloat16)
    p["b3c"] = jnp.asarray(np.tile(np.asarray(raw["conv3_b"]), 4)[None, :],
                           jnp.float32)
    # fc0: split by conv3 output row p3; row order inside a block = (q3, cout),
    # matching torch's NCHW .view(B, -1) flatten of the conv3 output.
    wf0 = np.asarray(raw["fc0_w"], np.float32).reshape(32, 4, 4, 256)
    wf0 = np.transpose(wf0, (1, 2, 0, 3)).reshape(4, 128, 256)
    p["wf0"] = jnp.asarray(wf0, jnp.bfloat16)
    p["bf0"] = jnp.asarray(np.asarray(raw["fc0_b"])[None, :], jnp.float32)
    p["wf1"] = jnp.asarray(raw["fc1_w"], jnp.bfloat16)
    p["bf1"] = jnp.asarray(np.asarray(raw["fc1_b"])[None, :], jnp.float32)
    # fc2: padded to 128 output lanes ([mu | logvar | 0]) plus mu-only /
    # logvar-only copies aligned at lane 0 so the reparameterisation stays
    # lane-dense with no in-kernel lane slicing.
    wf2 = np.asarray(raw["fc2_w"], np.float32)
    bf2 = np.asarray(raw["fc2_b"], np.float32)
    wa = np.zeros((256, 128), np.float32); wa[:, :2 * L] = wf2
    ba = np.zeros((1, 128), np.float32);   ba[0, :2 * L] = bf2
    wm = np.zeros((256, 128), np.float32); wm[:, :L] = wf2[:, :L]
    bm = np.zeros((1, 128), np.float32);   bm[0, :L] = bf2[:L]
    wl = np.zeros((256, 128), np.float32); wl[:, :L] = wf2[:, L:]
    bl = np.zeros((1, 128), np.float32);   bl[0, :L] = bf2[L:]
    p["wfa"], p["bfa"] = jnp.asarray(wa, jnp.bfloat16), jnp.asarray(ba)
    p["wfm"], p["bfm"] = jnp.asarray(wm, jnp.bfloat16), jnp.asarray(bm)
    p["wfl"], p["bfl"] = jnp.asarray(wl, jnp.bfloat16), jnp.asarray(bl)
    return p


# ============================================================================
# Encoder forward (both images, one pass, 3 pallas_calls)
# ============================================================================
@functools.partial(jax.jit, static_argnames=("latent_dim",))
def encoder_forward(params, x1, x2, key, latent_dim=10):
    assert x1.shape[2] == 64 and x1.shape[3] == 64, "module implies 64x64 input"
    b1 = x1.shape[0]
    n2 = 2 * b1
    n_blk = 2 if b1 % 2 == 0 else 1       # exactly 2 parallel grid steps (v7x)
    ng = n2 // n_blk                      # images per grid step (always even)

    # Interleave the pair: [x1_0, x2_0, x1_1, x2_1, ...]  (NHWC, bf16 operands)
    x = jnp.stack([x1, x2], axis=1).reshape((n2,) + x1.shape[1:])
    x = jnp.transpose(x, (0, 2, 3, 1)).astype(jnp.bfloat16)

    # conv0
    act0 = _rowconv_act(x, n_blk)                                # (nb, ng*32, 4*64*C)
    h = _conv0_call(act0, params["w0c"], params["b0c"])          # (nb, ng*32, 1024)
    h = h.reshape(n2, 32, 32, 32)

    # conv1
    act1 = _s2d_fold(h)                                          # (2B, 272, 256)
    h = _conv1_call(act1, params["w1c"], params["b1c"], ng=ng, ho=16, wo=16)
    h = h.reshape(n2, 16, 16, 32)

    # conv2 + conv3 + fc stack + reparameterisation + (z2 - z1), one kernel
    act2 = _tail_act(h, n_blk)                                   # (nb, 8*ng, 2048)
    eps = jax.random.normal(key, (n2, latent_dim), jnp.float32)
    eps = jnp.pad(eps, ((0, 0), (0, 128 - latent_dim))).reshape(n_blk, ng, 128)
    h2, dz = _tail_call(act2, params, eps, ng=ng)

    h2 = h2.reshape(n2, 128)
    dz = dz.reshape(b1, 128)[:, :latent_dim]
    mu1, logvar1 = h2[0::2, :latent_dim], h2[0::2, latent_dim:2 * latent_dim]
    mu2, logvar2 = h2[1::2, :latent_dim], h2[1::2, latent_dim:2 * latent_dim]
    return dz, mu1, logvar1, mu2, logvar2


# ============================================================================
if __name__ == "__main__":
    root = jax.random.PRNGKey(0)
    kp, kx1, kx2, ke = jax.random.split(root, 4)

    latent_dim = 10
    raw = init_params(kp, latent_dim=latent_dim, input_channels=1)
    params = prepare_params(raw, latent_dim=latent_dim)

    # 64x64 spatial input is implied by the module (32*4*4 flatten after 4 stride-2 convs)
    B = 2
    x1 = jax.random.normal(kx1, (B, 1, 64, 64), jnp.float32)
    x2 = jax.random.normal(kx2, (B, 1, 64, 64), jnp.float32)

    outs = jax.block_until_ready(
        encoder_forward(params, x1, x2, ke, latent_dim=latent_dim))
    dz, mu1, logvar1, mu2, logvar2 = outs

    assert dz.shape == (B, latent_dim)
    assert mu1.shape == (B, latent_dim) and logvar1.shape == (B, latent_dim)
    assert mu2.shape == (B, latent_dim) and logvar2.shape == (B, latent_dim)
    assert all(bool(jnp.all(jnp.isfinite(o))) for o in outs)

    print("KERNEL_OK")
</pallas_src>

<mosaic_0001>
module attributes {stable_mosaic.version = 11 : i64} {
  func.func @_conv0_kernel(%arg0: i32, %arg1: memref<1x64x256xbf16, #tpu.memory_space<vmem>>, %arg2: memref<256x1024xbf16, #tpu.memory_space<vmem>>, %arg3: memref<1x1024xf32, #tpu.memory_space<vmem>>, %arg4: memref<1x64x1024xbf16, #tpu.memory_space<vmem>>) attributes {dimension_semantics = [#tpu.dimension_semantics<parallel>], iteration_bounds = array<i64: 2>, scalar_prefetch = 0 : i64, scratch_operands = 0 : i64, tpu.core_type = #tpu.core_type<tc>, window_params = [{transform_indices = @transform_0, window_bounds = array<i64: 1, 64, 256>}, {pipeline_mode = #tpu.pipeline_mode<synchronous>, transform_indices = @transform_1, window_bounds = array<i64: 256, 1024>}, {pipeline_mode = #tpu.pipeline_mode<synchronous>, transform_indices = @transform_2, window_bounds = array<i64: 1, 1024>}, {transform_indices = @transform_3, window_bounds = array<i64: 1, 64, 1024>}]} {
    %c0 = arith.constant 0 : index
    %c0_0 = arith.constant 0 : index
    %c0_1 = arith.constant 0 : index
    %0 = vector.load %arg1[%c0, %c0_0, %c0_1] : memref<1x64x256xbf16, #tpu.memory_space<vmem>>, vector<1x64x256xbf16>
    %1 = vector.shape_cast %0 : vector<1x64x256xbf16> to vector<64x256xbf16>
    %c0_2 = arith.constant 0 : index
    %c0_3 = arith.constant 0 : index
    %2 = vector.load %arg2[%c0_2, %c0_3] : memref<256x1024xbf16, #tpu.memory_space<vmem>>, vector<256x1024xbf16>
    %cst = arith.constant dense<0.000000e+00> : vector<64x1024xf32>
    %3 = tpu.matmul %1, %2, %cst {dimension_numbers = #tpu.dot_dimension_numbers<[1], [0], [0], [1], [0, 0, 1, 1], [], []>} : vector<64x256xbf16>, vector<256x1024xbf16>, vector<64x1024xf32> -> vector<64x1024xf32>
    %c0_4 = arith.constant 0 : index
    %c0_5 = arith.constant 0 : index
    %4 = vector.load %arg3[%c0_4, %c0_5] : memref<1x1024xf32, #tpu.memory_space<vmem>>, vector<1x1024xf32>
    %5 = vector.broadcast %4 : vector<1x1024xf32> to vector<64x1024xf32>
    %6 = arith.addf %3, %5 : vector<64x1024xf32>
    %cst_6 = arith.constant 0.000000e+00 : f32
    %7 = vector.broadcast %cst_6 : f32 to vector<64x1024xf32>
    %8 = arith.maximumf %6, %7 : vector<64x1024xf32>
    %9 = arith.truncf %8 : vector<64x1024xf32> to vector<64x1024xbf16>
    %c0_7 = arith.constant 0 : index
    %c0_8 = arith.constant 0 : index
    %c0_9 = arith.constant 0 : index
    %10 = vector.load %arg4[%c0_7, %c0_8, %c0_9] : memref<1x64x1024xbf16, #tpu.memory_space<vmem>>, vector<1x64x1024xbf16>
    %11 = vector.shape_cast %10 : vector<1x64x1024xbf16> to vector<64x1024xbf16>
    %12 = vector.shape_cast %9 : vector<64x1024xbf16> to vector<1x64x1024xbf16>
    tpu.vector_store %arg4[%c0_7, %c0_8, %c0_9], %12 {strides = array<i32>} : memref<1x64x1024xbf16, #tpu.memory_space<vmem>>, vector<1x64x1024xbf16>,
    return
  }
  func.func @transform_0(%arg0: i32) -> (i32, i32, i32) {
    %c0_i32 = arith.constant 0 : i32
    %c0_i32_0 = arith.constant 0 : i32
    %c0_i32_1 = arith.constant 0 : i32
    return %arg0, %c0_i32, %c0_i32_0 : i32, i32, i32
  }
  func.func @transform_1(%arg0: i32) -> (i32, i32) {
    %c0_i32 = arith.constant 0 : i32
    %c0_i32_0 = arith.constant 0 : i32
    %c0_i32_1 = arith.constant 0 : i32
    return %c0_i32, %c0_i32_0 : i32, i32
  }
  func.func @transform_2(%arg0: i32) -> (i32, i32) {
    %c0_i32 = arith.constant 0 : i32
    %c0_i32_0 = arith.constant 0 : i32
    %c0_i32_1 = arith.constant 0 : i32
    return %c0_i32, %c0_i32_0 : i32, i32
  }
  func.func @transform_3(%arg0: i32) -> (i32, i32, i32) {
    %c0_i32 = arith.constant 0 : i32
    %c0_i32_0 = arith.constant 0 : i32
    %c0_i32_1 = arith.constant 0 : i32
    return %arg0, %c0_i32, %c0_i32_0 : i32, i32, i32
  }
}

module attributes {stable_mosaic.version = 11 : i64} {
  func.func @_conv1_kernel(%arg0: i32, %arg1: memref<2x272x256xbf16, #tpu.memory_space<vmem>>, %arg2: memref<2x256x32xbf16, #tpu.memory_space<vmem>>, %arg3: memref<1x32xf32, #tpu.memory_space<vmem>>, %arg4: memref<2x256x32xbf16, #tpu.memory_space<vmem>>) attributes {dimension_semantics = [#tpu.dimension_semantics<parallel>], iteration_bounds = array<i64: 2>, scalar_prefetch = 0 : i64, scratch_operands = 0 : i64, tpu.core_type = #tpu.core_type<tc>, window_params = [{transform_indices = @transform_0, window_bounds = array<i64: 2, 272, 256>}, {pipeline_mode = #tpu.pipeline_mode<synchronous>, transform_indices = @transform_1, window_bounds = array<i64: 2, 256, 32>}, {pipeline_mode = #tpu.pipeline_mode<synchronous>, transform_indices = @transform_2, window_bounds = array<i64: 1, 32>}, {transform_indices = @transform_3, window_bounds = array<i64: 2, 256, 32>}]} {
    %c0 = arith.constant 0 : index
    %c0_0 = arith.constant 0 : index
    %c0_1 = arith.constant 0 : index
    %0 = vector.load %arg1[%c0, %c0_0, %c0_1] : memref<2x272x256xbf16, #tpu.memory_space<vmem>>, vector<1x256x256xbf16>
    %1 = vector.shape_cast %0 : vector<1x256x256xbf16> to vector<256x256xbf16>
    %c0_2 = arith.constant 0 : index
    %c0_3 = arith.constant 0 : index
    %c0_4 = arith.constant 0 : index
    %2 = vector.load %arg2[%c0_2, %c0_3, %c0_4] : memref<2x256x32xbf16, #tpu.memory_space<vmem>>, vector<1x256x32xbf16>
    %3 = vector.shape_cast %2 : vector<1x256x32xbf16> to vector<256x32xbf16>
    %cst = arith.constant dense<0.000000e+00> : vector<256x32xf32>
    %4 = tpu.matmul %1, %3, %cst {dimension_numbers = #tpu.dot_dimension_numbers<[1], [0], [0], [1], [0, 0, 1, 1], [], []>} : vector<256x256xbf16>, vector<256x32xbf16>, vector<256x32xf32> -> vector<256x32xf32>
    %c0_5 = arith.constant 0 : index
    %c16 = arith.constant 16 : index
    %c0_6 = arith.constant 0 : index
    %5 = vector.load %arg1[%c0_5, %c16, %c0_6] : memref<2x272x256xbf16, #tpu.memory_space<vmem>>, vector<1x256x256xbf16>
    %6 = vector.shape_cast %5 : vector<1x256x256xbf16> to vector<256x256xbf16>
    %c1 = arith.constant 1 : index
    %c0_7 = arith.constant 0 : index
    %c0_8 = arith.constant 0 : index
    %7 = vector.load %arg2[%c1, %c0_7, %c0_8] : memref<2x256x32xbf16, #tpu.memory_space<vmem>>, vector<1x256x32xbf16>
    %8 = vector.shape_cast %7 : vector<1x256x32xbf16> to vector<256x32xbf16>
    %cst_9 = arith.constant dense<0.000000e+00> : vector<256x32xf32>
    %9 = tpu.matmul %6, %8, %cst_9 {dimension_numbers = #tpu.dot_dimension_numbers<[1], [0], [0], [1], [0, 0, 1, 1], [], []>} : vector<256x256xbf16>, vector<256x32xbf16>, vector<256x32xf32> -> vector<256x32xf32>
    %10 = arith.addf %4, %9 : vector<256x32xf32>
    %c0_10 = arith.constant 0 : index
    %c0_11 = arith.constant 0 : index
    %11 = vector.load %arg3[%c0_10, %c0_11] : memref<1x32xf32, #tpu.memory_space<vmem>>, vector<1x32xf32>
    %12 = vector.broadcast %11 : vector<1x32xf32> to vector<256x32xf32>
    %13 = arith.addf %10, %12 : vector<256x32xf32>
    %cst_12 = arith.constant 0.000000e+00 : f32
    %14 = vector.broadcast %cst_12 : f32 to vector<256x32xf32>
    %15 = arith.maximumf %13, %14 : vector<256x32xf32>
    %16 = arith.truncf %15 : vector<256x32xf32> to vector<256x32xbf16>
    %c0_13 = arith.constant 0 : index
    %c0_14 = arith.constant 0 : index
    %c0_15 = arith.constant 0 : index
    %17 = vector.load %arg4[%c0_13, %c0_14, %c0_15] : memref<2x256x32xbf16, #tpu.memory_space<vmem>>, vector<1x256x32xbf16>
    %18 = vector.shape_cast %17 : vector<1x256x32xbf16> to vector<256x32xbf16>
    %19 = vector.shape_cast %16 : vector<256x32xbf16> to vector<1x256x32xbf16>
    tpu.vector_store %arg4[%c0_13, %c0_14, %c0_15], %19 {strides = array<i32>} : memref<2x256x32xbf16, #tpu.memory_space<vmem>>, vector<1x256x32xbf16>,
    %c1_16 = arith.constant 1 : index
    %c0_17 = arith.constant 0 : index
    %c0_18 = arith.constant 0 : index
    %20 = vector.load %arg1[%c1_16, %c0_17, %c0_18] : memref<2x272x256xbf16, #tpu.memory_space<vmem>>, vector<1x256x256xbf16>
    %21 = vector.shape_cast %20 : vector<1x256x256xbf16> to vector<256x256xbf16>
    %c0_19 = arith.constant 0 : index
    %c0_20 = arith.constant 0 : index
    %c0_21 = arith.constant 0 : index
    %22 = vector.load %arg2[%c0_19, %c0_20, %c0_21] : memref<2x256x32xbf16, #tpu.memory_space<vmem>>, vector<1x256x32xbf16>
    %23 = vector.shape_cast %22 : vector<1x256x32xbf16> to vector<256x32xbf16>
    %cst_22 = arith.constant dense<0.000000e+00> : vector<256x32xf32>
    %24 = tpu.matmul %21, %23, %cst_22 {dimension_numbers = #tpu.dot_dimension_numbers<[1], [0], [0], [1], [0, 0, 1, 1], [], []>} : vector<256x256xbf16>, vector<256x32xbf16>, vector<256x32xf32> -> vector<256x32xf32>
    %c1_23 = arith.constant 1 : index
    %c16_24 = arith.constant 16 : index
    %c0_25 = arith.constant 0 : index
    %25 = vector.load %arg1[%c1_23, %c16_24, %c0_25] : memref<2x272x256xbf16, #tpu.memory_space<vmem>>, vector<1x256x256xbf16>
    %26 = vector.shape_cast %25 : vector<1x256x256xbf16> to vector<256x256xbf16>
    %c1_26 = arith.constant 1 : index
    %c0_27 = arith.constant 0 : index
    %c0_28 = arith.constant 0 : index
    %27 = vector.load %arg2[%c1_26, %c0_27, %c0_28] : memref<2x256x32xbf16, #tpu.memory_space<vmem>>, vector<1x256x32xbf16>
    %28 = vector.shape_cast %27 : vector<1x256x32xbf16> to vector<256x32xbf16>
    %cst_29 = arith.constant dense<0.000000e+00> : vector<256x32xf32>
    %29 = tpu.matmul %26, %28, %cst_29 {dimension_numbers = #tpu.dot_dimension_numbers<[1], [0], [0], [1], [0, 0, 1, 1], [], []>} : vector<256x256xbf16>, vector<256x32xbf16>, vector<256x32xf32> -> vector<256x32xf32>
    %30 = arith.addf %24, %29 : vector<256x32xf32>
    %c0_30 = arith.constant 0 : index
    %c0_31 = arith.constant 0 : index
    %31 = vector.load %arg3[%c0_30, %c0_31] : memref<1x32xf32, #tpu.memory_space<vmem>>, vector<1x32xf32>
    %32 = vector.broadcast %31 : vector<1x32xf32> to vector<256x32xf32>
    %33 = arith.addf %30, %32 : vector<256x32xf32>
    %cst_32 = arith.constant 0.000000e+00 : f32
    %34 = vector.broadcast %cst_32 : f32 to vector<256x32xf32>
    %35 = arith.maximumf %33, %34 : vector<256x32xf32>
    %36 = arith.truncf %35 : vector<256x32xf32> to vector<256x32xbf16>
    %c1_33 = arith.constant 1 : index
    %c0_34 = arith.constant 0 : index
    %c0_35 = arith.constant 0 : index
    %37 = vector.load %arg4[%c1_33, %c0_34, %c0_35] : memref<2x256x32xbf16, #tpu.memory_space<vmem>>, vector<1x256x32xbf16>
    %38 = vector.shape_cast %37 : vector<1x256x32xbf16> to vector<256x32xbf16>
    %39 = vector.shape_cast %36 : vector<256x32xbf16> to vector<1x256x32xbf16>
    tpu.vector_store %arg4[%c1_33, %c0_34, %c0_35], %39 {strides = array<i32>} : memref<2x256x32xbf16, #tpu.memory_space<vmem>>, vector<1x256x32xbf16>,
    return
  }
  func.func @transform_0(%arg0: i32) -> (i32, i32, i32) {
    %c0_i32 = arith.constant 0 : i32
    %c0_i32_0 = arith.constant 0 : i32
    %c0_i32_1 = arith.constant 0 : i32
    return %arg0, %c0_i32, %c0_i32_0 : i32, i32, i32
  }
  func.func @transform_1(%arg0: i32) -> (i32, i32, i32) {
    %c0_i32 = arith.constant 0 : i32
    %c0_i32_0 = arith.constant 0 : i32
    %c0_i32_1 = arith.constant 0 : i32
    %c0_i32_2 = arith.constant 0 : i32
    return %c0_i32, %c0_i32_0, %c0_i32_1 : i32, i32, i32
  }
  func.func @transform_2(%arg0: i32) -> (i32, i32) {
    %c0_i32 = arith.constant 0 : i32
    %c0_i32_0 = arith.constant 0 : i32
    %c0_i32_1 = arith.constant 0 : i32
    return %c0_i32, %c0_i32_0 : i32, i32
  }
  func.func @transform_3(%arg0: i32) -> (i32, i32, i32) {
    %c0_i32 = arith.constant 0 : i32
    %c0_i32_0 = arith.constant 0 : i32
    %c0_i32_1 = arith.constant 0 : i32
    return %arg0, %c0_i32, %c0_i32_0 : i32, i32, i32
  }
}

module attributes {stable_mosaic.version = 11 : i64} {
  func.func @_tail_kernel(%arg0: i32, %arg1: memref<1x16x2048xbf16, #tpu.memory_space<vmem>>, %arg2: memref<2048x256xbf16, #tpu.memory_space<vmem>>, %arg3: memref<1x256xf32, #tpu.memory_space<vmem>>, %arg4: memref<4x256x128xbf16, #tpu.memory_space<vmem>>, %arg5: memref<1x128xf32, #tpu.memory_space<vmem>>, %arg6: memref<4x128x256xbf16, #tpu.memory_space<vmem>>, %arg7: memref<1x256xf32, #tpu.memory_space<vmem>>, %arg8: memref<256x256xbf16, #tpu.memory_space<vmem>>, %arg9: memref<1x256xf32, #tpu.memory_space<vmem>>, %arg10: memref<256x128xbf16, #tpu.memory_space<vmem>>, %arg11: memref<1x128xf32, #tpu.memory_space<vmem>>, %arg12: memref<256x128xbf16, #tpu.memory_space<vmem>>, %arg13: memref<1x128xf32, #tpu.memory_space<vmem>>, %arg14: memref<256x128xbf16, #tpu.memory_space<vmem>>, %arg15: memref<1x128xf32, #tpu.memory_space<vmem>>, %arg16: memref<1x2x128xf32, #tpu.memory_space<vmem>>, %arg17: memref<1x2x128xf32, #tpu.memory_space<vmem>>, %arg18: memref<1x1x128xf32, #tpu.memory_space<vmem>>, %arg19: memref<20x256xbf16, #tpu.memory_space<vmem>>) attributes {dimension_semantics = [#tpu.dimension_semantics<parallel>], iteration_bounds = array<i64: 2>, scalar_prefetch = 0 : i64, scratch_operands = 1 : i64, tpu.core_type = #tpu.core_type<tc>, window_params = [{transform_indices = @transform_0, window_bounds = array<i64: 1, 16, 2048>}, {pipeline_mode = #tpu.pipeline_mode<synchronous>, transform_indices = @transform_1, window_bounds = array<i64: 2048, 256>}, {pipeline_mode = #tpu.pipeline_mode<synchronous>, transform_indices = @transform_2, window_bounds = array<i64: 1, 256>}, {pipeline_mode = #tpu.pipeline_mode<synchronous>, transform_indices = @transform_3, window_bounds = array<i64: 4, 256, 128>}, {pipeline_mode = #tpu.pipeline_mode<synchronous>, transform_indices = @transform_4, window_bounds = array<i64: 1, 128>}, {pipeline_mode = #tpu.pipeline_mode<synchronous>, transform_indices = @transform_5, window_bounds = array<i64: 4, 128, 256>}, {pipeline_mode = #tpu.pipeline_mode<synchronous>, transform_indices = @transform_6, window_bounds = array<i64: 1, 256>}, {pipeline_mode = #tpu.pipeline_mode<synchronous>, transform_indices = @transform_7, window_bounds = array<i64: 256, 256>}, {pipeline_mode = #tpu.pipeline_mode<synchronous>, transform_indices = @transform_8, window_bounds = array<i64: 1, 256>}, {pipeline_mode = #tpu.pipeline_mode<synchronous>, transform_indices = @transform_9, window_bounds = array<i64: 256, 128>}, {pipeline_mode = #tpu.pipeline_mode<synchronous>, transform_indices = @transform_10, window_bounds = array<i64: 1, 128>}, {pipeline_mode = #tpu.pipeline_mode<synchronous>, transform_indices = @transform_11, window_bounds = array<i64: 256, 128>}, {pipeline_mode = #tpu.pipeline_mode<synchronous>, transform_indices = @transform_12, window_bounds = array<i64: 1, 128>}, {pipeline_mode = #tpu.pipeline_mode<synchronous>, transform_indices = @transform_13, window_bounds = array<i64: 256, 128>}, {pipeline_mode = #tpu.pipeline_mode<synchronous>, transform_indices = @transform_14, window_bounds = array<i64: 1, 128>}, {transform_indices = @transform_15, window_bounds = array<i64: 1, 2, 128>}, {transform_indices = @transform_16, window_bounds = array<i64: 1, 2, 128>}, {transform_indices = @transform_17, window_bounds = array<i64: 1, 1, 128>}]} {
    %c0 = arith.constant 0 : index
    %c0_0 = arith.constant 0 : index
    %c0_1 = arith.constant 0 : index
    %0 = vector.load %arg1[%c0, %c0_0, %c0_1] : memref<1x16x2048xbf16, #tpu.memory_space<vmem>>, vector<1x16x2048xbf16>
    %1 = vector.shape_cast %0 : vector<1x16x2048xbf16> to vector<16x2048xbf16>
    %c0_2 = arith.constant 0 : index
    %c0_3 = arith.constant 0 : index
    %2 = vector.load %arg2[%c0_2, %c0_3] : memref<2048x256xbf16, #tpu.memory_space<vmem>>, vector<2048x256xbf16>
    %cst = arith.constant dense<0.000000e+00> : vector<16x256xf32>
    %3 = tpu.matmul %1, %2, %cst {dimension_numbers = #tpu.dot_dimension_numbers<[1], [0], [0], [1], [0, 0, 1, 1], [], []>} : vector<16x2048xbf16>, vector<2048x256xbf16>, vector<16x256xf32> -> vector<16x256xf32>
    %c0_4 = arith.constant 0 : index
    %c0_5 = arith.constant 0 : index
    %4 = vector.load %arg3[%c0_4, %c0_5] : memref<1x256xf32, #tpu.memory_space<vmem>>, vector<1x256xf32>
    %5 = vector.broadcast %4 : vector<1x256xf32> to vector<16x256xf32>
    %6 = arith.addf %3, %5 : vector<16x256xf32>
    %cst_6 = arith.constant 0.000000e+00 : f32
    %7 = vector.broadcast %cst_6 : f32 to vector<16x256xf32>
    %8 = arith.maximumf %6, %7 : vector<16x256xf32>
    %cst_7 = arith.constant 0.000000e+00 : bf16
    %9 = vector.broadcast %cst_7 : bf16 to vector<2x256xbf16>
    %c0_8 = arith.constant 0 : index
    %c0_9 = arith.constant 0 : index
    %10 = vector.load %arg19[%c0_8, %c0_9] : memref<20x256xbf16, #tpu.memory_space<vmem>>, vector<2x256xbf16>
    tpu.vector_store %arg19[%c0_8, %c0_9], %9 {strides = array<i32>} : memref<20x256xbf16, #tpu.memory_space<vmem>>, vector<2x256xbf16>,
    %c18 = arith.constant 18 : index
    %c0_10 = arith.constant 0 : index
    %11 = vector.load %arg19[%c18, %c0_10] : memref<20x256xbf16, #tpu.memory_space<vmem>>, vector<2x256xbf16>
    tpu.vector_store %arg19[%c18, %c0_10], %9 {strides = array<i32>} : memref<20x256xbf16, #tpu.memory_space<vmem>>, vector<2x256xbf16>,
    %12 = arith.truncf %8 : vector<16x256xf32> to vector<16x256xbf16>
    %c2 = arith.constant 2 : index
    %c0_11 = arith.constant 0 : index
    %13 = vector.load %arg19[%c2, %c0_11] : memref<20x256xbf16, #tpu.memory_space<vmem>>, vector<16x256xbf16>
    tpu.vector_store %arg19[%c2, %c0_11], %12 {strides = array<i32>} : memref<20x256xbf16, #tpu.memory_space<vmem>>, vector<16x256xbf16>,
    %c0_12 = arith.constant 0 : index
    %c0_13 = arith.constant 0 : index
    %14 = vector.load %arg19[%c0_12, %c0_13] : memref<20x256xbf16, #tpu.memory_space<vmem>>, vector<8x256xbf16>
    %c0_14 = arith.constant 0 : index
    %c0_15 = arith.constant 0 : index
    %c0_16 = arith.constant 0 : index
    %15 = vector.load %arg4[%c0_14, %c0_15, %c0_16] : memref<4x256x128xbf16, #tpu.memory_space<vmem>>, vector<1x256x128xbf16>
    %16 = vector.shape_cast %15 : vector<1x256x128xbf16> to vector<256x128xbf16>
    %cst_17 = arith.constant dense<0.000000e+00> : vector<8x128xf32>
    %17 = tpu.matmul %14, %16, %cst_17 {dimension_numbers = #tpu.dot_dimension_numbers<[1], [0], [0], [1], [0, 0, 1, 1], [], []>} : vector<8x256xbf16>, vector<256x128xbf16>, vector<8x128xf32> -> vector<8x128xf32>
    %c10 = arith.constant 10 : index
    %c0_18 = arith.constant 0 : index
    %18 = vector.load %arg19[%c10, %c0_18] : memref<20x256xbf16, #tpu.memory_space<vmem>>, vector<8x256xbf16>
    %c1 = arith.constant 1 : index
    %c0_19 = arith.constant 0 : index
    %c0_20 = arith.constant 0 : index
    %19 = vector.load %arg4[%c1, %c0_19, %c0_20] : memref<4x256x128xbf16, #tpu.memory_space<vmem>>, vector<1x256x128xbf16>
    %20 = vector.shape_cast %19 : vector<1x256x128xbf16> to vector<256x128xbf16>
    %cst_21 = arith.constant dense<0.000000e+00> : vector<8x128xf32>
    %21 = tpu.matmul %18, %20, %cst_21 {dimension_numbers = #tpu.dot_dimension_numbers<[1], [0], [0], [1], [0, 0, 1, 1], [], []>} : vector<8x256xbf16>, vector<256x128xbf16>, vector<8x128xf32> -> vector<8x128xf32>
    %22 = arith.addf %17, %21 : vector<8x128xf32>
    %c2_22 = arith.constant 2 : index
    %c0_23 = arith.constant 0 : index
    %23 = vector.load %arg19[%c2_22, %c0_23] : memref<20x256xbf16, #tpu.memory_space<vmem>>, vector<8x256xbf16>
    %c2_24 = arith.constant 2 : index
    %c0_25 = arith.constant 0 : index
    %c0_26 = arith.constant 0 : index
    %24 = vector.load %arg4[%c2_24, %c0_25, %c0_26] : memref<4x256x128xbf16, #tpu.memory_space<vmem>>, vector<1x256x128xbf16>
    %25 = vector.shape_cast %24 : vector<1x256x128xbf16> to vector<256x128xbf16>
    %cst_27 = arith.constant dense<0.000000e+00> : vector<8x128xf32>
    %26 = tpu.matmul %23, %25, %cst_27 {dimension_numbers = #tpu.dot_dimension_numbers<[1], [0], [0], [1], [0, 0, 1, 1], [], []>} : vector<8x256xbf16>, vector<256x128xbf16>, vector<8x128xf32> -> vector<8x128xf32>
    %27 = arith.addf %22, %26 : vector<8x128xf32>
    %c12 = arith.constant 12 : index
    %c0_28 = arith.constant 0 : index
    %28 = vector.load %arg19[%c12, %c0_28] : memref<20x256xbf16, #tpu.memory_space<vmem>>, vector<8x256xbf16>
    %c3 = arith.constant 3 : index
    %c0_29 = arith.constant 0 : index
    %c0_30 = arith.constant 0 : index
    %29 = vector.load %arg4[%c3, %c0_29, %c0_30] : memref<4x256x128xbf16, #tpu.memory_space<vmem>>, vector<1x256x128xbf16>
    %30 = vector.shape_cast %29 : vector<1x256x128xbf16> to vector<256x128xbf16>
    %cst_31 = arith.constant dense<0.000000e+00> : vector<8x128xf32>
    %31 = tpu.matmul %28, %30, %cst_31 {dimension_numbers = #tpu.dot_dimension_numbers<[1], [0], [0], [1], [0, 0, 1, 1], [], []>} : vector<8x256xbf16>, vector<256x128xbf16>, vector<8x128xf32> -> vector<8x128xf32>
    %32 = arith.addf %27, %31 : vector<8x128xf32>
    %c0_32 = arith.constant 0 : index
    %c0_33 = arith.constant 0 : index
    %33 = vector.load %arg5[%c0_32, %c0_33] : memref<1x128xf32, #tpu.memory_space<vmem>>, vector<1x128xf32>
    %34 = vector.broadcast %33 : vector<1x128xf32> to vector<8x128xf32>
    %35 = arith.addf %32, %34 : vector<8x128xf32>
    %cst_34 = arith.constant 0.000000e+00 : f32
    %36 = vector.broadcast %cst_34 : f32 to vector<8x128xf32>
    %37 = arith.maximumf %35, %36 : vector<8x128xf32>
    %38 = arith.truncf %37 : vector<8x128xf32> to vector<8x128xbf16>
    %39 = vector.extract_strided_slice %38 {offsets = [0, 0], sizes = [2, 128], strides = [1, 1]} : vector<8x128xbf16> to vector<2x128xbf16>
    %c0_35 = arith.constant 0 : index
    %c0_36 = arith.constant 0 : index
    %c0_37 = arith.constant 0 : index
    %40 = vector.load %arg6[%c0_35, %c0_36, %c0_37] : memref<4x128x256xbf16, #tpu.memory_space<vmem>>, vector<1x128x256xbf16>
    %41 = vector.shape_cast %40 : vector<1x128x256xbf16> to vector<128x256xbf16>
    %cst_38 = arith.constant dense<0.000000e+00> : vector<2x256xf32>
    %42 = tpu.matmul %39, %41, %cst_38 {dimension_numbers = #tpu.dot_dimension_numbers<[1], [0], [0], [1], [0, 0, 1, 1], [], []>} : vector<2x128xbf16>, vector<128x256xbf16>, vector<2x256xf32> -> vector<2x256xf32>
    %43 = vector.extract_strided_slice %38 {offsets = [2, 0], sizes = [2, 128], strides = [1, 1]} : vector<8x128xbf16> to vector<2x128xbf16>
    %c1_39 = arith.constant 1 : index
    %c0_40 = arith.constant 0 : index
    %c0_41 = arith.constant 0 : index
    %44 = vector.load %arg6[%c1_39, %c0_40, %c0_41] : memref<4x128x256xbf16, #tpu.memory_space<vmem>>, vector<1x128x256xbf16>
    %45 = vector.shape_cast %44 : vector<1x128x256xbf16> to vector<128x256xbf16>
    %cst_42 = arith.constant dense<0.000000e+00> : vector<2x256xf32>
    %46 = tpu.matmul %43, %45, %cst_42 {dimension_numbers = #tpu.dot_dimension_numbers<[1], [0], [0], [1], [0, 0, 1, 1], [], []>} : vector<2x128xbf16>, vector<128x256xbf16>, vector<2x256xf32> -> vector<2x256xf32>
    %47 = arith.addf %42, %46 : vector<2x256xf32>
    %48 = vector.extract_strided_slice %38 {offsets = [4, 0], sizes = [2, 128], strides = [1, 1]} : vector<8x128xbf16> to vector<2x128xbf16>
    %c2_43 = arith.constant 2 : index
    %c0_44 = arith.constant 0 : index
    %c0_45 = arith.constant 0 : index
    %49 = vector.load %arg6[%c2_43, %c0_44, %c0_45] : memref<4x128x256xbf16, #tpu.memory_space<vmem>>, vector<1x128x256xbf16>
    %50 = vector.shape_cast %49 : vector<1x128x256xbf16> to vector<128x256xbf16>
    %cst_46 = arith.constant dense<0.000000e+00> : vector<2x256xf32>
    %51 = tpu.matmul %48, %50, %cst_46 {dimension_numbers = #tpu.dot_dimension_numbers<[1], [0], [0], [1], [0, 0, 1, 1], [], []>} : vector<2x128xbf16>, vector<128x256xbf16>, vector<2x256xf32> -> vector<2x256xf32>
    %52 = arith.addf %47, %51 : vector<2x256xf32>
    %53 = vector.extract_strided_slice %38 {offsets = [6, 0], sizes = [2, 128], strides = [1, 1]} : vector<8x128xbf16> to vector<2x128xbf16>
    %c3_47 = arith.constant 3 : index
    %c0_48 = arith.constant 0 : index
    %c0_49 = arith.constant 0 : index
    %54 = vector.load %arg6[%c3_47, %c0_48, %c0_49] : memref<4x128x256xbf16, #tpu.memory_space<vmem>>, vector<1x128x256xbf16>
    %55 = vector.shape_cast %54 : vector<1x128x256xbf16> to vector<128x256xbf16>
    %cst_50 = arith.constant dense<0.000000e+00> : vector<2x256xf32>
    %56 = tpu.matmul %53, %55, %cst_50 {dimension_numbers = #tpu.dot_dimension_numbers<[1], [0], [0], [1], [0, 0, 1, 1], [], []>} : vector<2x128xbf16>, vector<128x256xbf16>, vector<2x256xf32> -> vector<2x256xf32>
    %57 = arith.addf %52, %56 : vector<2x256xf32>
    %c0_51 = arith.constant 0 : index
    %c0_52 = arith.constant 0 : index
    %58 = vector.load %arg7[%c0_51, %c0_52] : memref<1x256xf32, #tpu.memory_space<vmem>>, vector<1x256xf32>
    %59 = vector.broadcast %58 : vector<1x256xf32> to vector<2x256xf32>
    %60 = arith.addf %57, %59 : vector<2x256xf32>
    %cst_53 = arith.constant 0.000000e+00 : f32
    %61 = vector.broadcast %cst_53 : f32 to vector<2x256xf32>
    %62 = arith.maximumf %60, %61 : vector<2x256xf32>
    %63 = arith.truncf %62 : vector<2x256xf32> to vector<2x256xbf16>
    %c0_54 = arith.constant 0 : index
    %c0_55 = arith.constant 0 : index
    %64 = vector.load %arg8[%c0_54, %c0_55] : memref<256x256xbf16, #tpu.memory_space<vmem>>, vector<256x256xbf16>
    %cst_56 = arith.constant dense<0.000000e+00> : vector<2x256xf32>
    %65 = tpu.matmul %63, %64, %cst_56 {dimension_numbers = #tpu.dot_dimension_numbers<[1], [0], [0], [1], [0, 0, 1, 1], [], []>} : vector<2x256xbf16>, vector<256x256xbf16>, vector<2x256xf32> -> vector<2x256xf32>
    %c0_57 = arith.constant 0 : index
    %c0_58 = arith.constant 0 : index
    %66 = vector.load %arg9[%c0_57, %c0_58] : memref<1x256xf32, #tpu.memory_space<vmem>>, vector<1x256xf32>
    %67 = vector.broadcast %66 : vector<1x256xf32> to vector<2x256xf32>
    %68 = arith.addf %65, %67 : vector<2x256xf32>
    %cst_59 = arith.constant 0.000000e+00 : f32
    %69 = vector.broadcast %cst_59 : f32 to vector<2x256xf32>
    %70 = arith.maximumf %68, %69 : vector<2x256xf32>
    %71 = arith.truncf %70 : vector<2x256xf32> to vector<2x256xbf16>
    %c0_60 = arith.constant 0 : index
    %c0_61 = arith.constant 0 : index
    %72 = vector.load %arg10[%c0_60, %c0_61] : memref<256x128xbf16, #tpu.memory_space<vmem>>, vector<256x128xbf16>
    %cst_62 = arith.constant dense<0.000000e+00> : vector<2x128xf32>
    %73 = tpu.matmul %71, %72, %cst_62 {dimension_numbers = #tpu.dot_dimension_numbers<[1], [0], [0], [1], [0, 0, 1, 1], [], []>} : vector<2x256xbf16>, vector<256x128xbf16>, vector<2x128xf32> -> vector<2x128xf32>
    %c0_63 = arith.constant 0 : index
    %c0_64 = arith.constant 0 : index
    %74 = vector.load %arg11[%c0_63, %c0_64] : memref<1x128xf32, #tpu.memory_space<vmem>>, vector<1x128xf32>
    %75 = vector.broadcast %74 : vector<1x128xf32> to vector<2x128xf32>
    %76 = arith.addf %73, %75 : vector<2x128xf32>
    %c0_65 = arith.constant 0 : index
    %c0_66 = arith.constant 0 : index
    %77 = vector.load %arg12[%c0_65, %c0_66] : memref<256x128xbf16, #tpu.memory_space<vmem>>, vector<256x128xbf16>
    %cst_67 = arith.constant dense<0.000000e+00> : vector<2x128xf32>
    %78 = tpu.matmul %71, %77, %cst_67 {dimension_numbers = #tpu.dot_dimension_numbers<[1], [0], [0], [1], [0, 0, 1, 1], [], []>} : vector<2x256xbf16>, vector<256x128xbf16>, vector<2x128xf32> -> vector<2x128xf32>
    %c0_68 = arith.constant 0 : index
    %c0_69 = arith.constant 0 : index
    %79 = vector.load %arg13[%c0_68, %c0_69] : memref<1x128xf32, #tpu.memory_space<vmem>>, vector<1x128xf32>
    %80 = vector.broadcast %79 : vector<1x128xf32> to vector<2x128xf32>
    %81 = arith.addf %78, %80 : vector<2x128xf32>
    %c0_70 = arith.constant 0 : index
    %c0_71 = arith.constant 0 : index
    %82 = vector.load %arg14[%c0_70, %c0_71] : memref<256x128xbf16, #tpu.memory_space<vmem>>, vector<256x128xbf16>
    %cst_72 = arith.constant dense<0.000000e+00> : vector<2x128xf32>
    %83 = tpu.matmul %71, %82, %cst_72 {dimension_numbers = #tpu.dot_dimension_numbers<[1], [0], [0], [1], [0, 0, 1, 1], [], []>} : vector<2x256xbf16>, vector<256x128xbf16>, vector<2x128xf32> -> vector<2x128xf32>
    %c0_73 = arith.constant 0 : index
    %c0_74 = arith.constant 0 : index
    %84 = vector.load %arg15[%c0_73, %c0_74] : memref<1x128xf32, #tpu.memory_space<vmem>>, vector<1x128xf32>
    %85 = vector.broadcast %84 : vector<1x128xf32> to vector<2x128xf32>
    %86 = arith.addf %83, %85 : vector<2x128xf32>
    %c0_75 = arith.constant 0 : index
    %c0_76 = arith.constant 0 : index
    %c0_77 = arith.constant 0 : index
    %87 = vector.load %arg16[%c0_75, %c0_76, %c0_77] : memref<1x2x128xf32, #tpu.memory_space<vmem>>, vector<1x2x128xf32>
    %88 = vector.shape_cast %87 : vector<1x2x128xf32> to vector<2x128xf32>
    %cst_78 = arith.constant 5.000000e-01 : f32
    %89 = vector.broadcast %cst_78 : f32 to vector<2x128xf32>
    %90 = arith.mulf %89, %86 : vector<2x128xf32>
    %91 = math.exp %90 : vector<2x128xf32>
    %92 = arith.mulf %88, %91 : vector<2x128xf32>
    %93 = arith.addf %81, %92 : vector<2x128xf32>
    %c0_79 = arith.constant 0 : index
    %c0_80 = arith.constant 0 : index
    %c0_81 = arith.constant 0 : index
    %94 = vector.load %arg17[%c0_79, %c0_80, %c0_81] : memref<1x2x128xf32, #tpu.memory_space<vmem>>, vector<1x2x128xf32>
    %95 = vector.shape_cast %94 : vector<1x2x128xf32> to vector<2x128xf32>
    %96 = vector.shape_cast %76 : vector<2x128xf32> to vector<1x2x128xf32>
    tpu.vector_store %arg17[%c0_79, %c0_80, %c0_81], %96 {strides = array<i32>} : memref<1x2x128xf32, #tpu.memory_space<vmem>>, vector<1x2x128xf32>,
    %97 = vector.extract_strided_slice %93 {offsets = [1, 0], sizes = [1, 128], strides = [1, 1]} : vector<2x128xf32> to vector<1x128xf32>
    %98 = vector.extract_strided_slice %93 {offsets = [0, 0], sizes = [1, 128], strides = [1, 1]} : vector<2x128xf32> to vector<1x128xf32>
    %99 = arith.subf %97, %98 : vector<1x128xf32>
    %c0_82 = arith.constant 0 : index
    %c0_83 = arith.constant 0 : index
    %c0_84 = arith.constant 0 : index
    %100 = vector.load %arg18[%c0_82, %c0_83, %c0_84] : memref<1x1x128xf32, #tpu.memory_space<vmem>>, vector<1x1x128xf32>
    %101 = vector.shape_cast %100 : vector<1x1x128xf32> to vector<1x128xf32>
    %102 = vector.shape_cast %99 : vector<1x128xf32> to vector<1x1x128xf32>
    tpu.vector_store %arg18[%c0_82, %c0_83, %c0_84], %102 {strides = array<i32>} : memref<1x1x128xf32, #tpu.memory_space<vmem>>, vector<1x1x128xf32>,
    return
  }
  func.func @transform_0(%arg0: i32) -> (i32, i32, i32) {
    %c0_i32 = arith.constant 0 : i32
    %c0_i32_0 = arith.constant 0 : i32
    %c0_i32_1 = arith.constant 0 : i32
    return %arg0, %c0_i32, %c0_i32_0 : i32, i32, i32
  }
  func.func @transform_1(%arg0: i32) -> (i32, i32) {
    %c0_i32 = arith.constant 0 : i32
    %c0_i32_0 = arith.constant 0 : i32
    %c0_i32_1 = arith.constant 0 : i32
    return %c0_i32, %c0_i32_0 : i32, i32
  }
  func.func @transform_2(%arg0: i32) -> (i32, i32) {
    %c0_i32 = arith.constant 0 : i32
    %c0_i32_0 = arith.constant 0 : i32
    %c0_i32_1 = arith.constant 0 : i32
    return %c0_i32, %c0_i32_0 : i32, i32
  }
  func.func @transform_3(%arg0: i32) -> (i32, i32, i32) {
    %c0_i32 = arith.constant 0 : i32
    %c0_i32_0 = arith.constant 0 : i32
    %c0_i32_1 = arith.constant 0 : i32
    %c0_i32_2 = arith.constant 0 : i32
    return %c0_i32, %c0_i32_0, %c0_i32_1 : i32, i32, i32
  }
  func.func @transform_4(%arg0: i32) -> (i32, i32) {
    %c0_i32 = arith.constant 0 : i32
    %c0_i32_0 = arith.constant 0 : i32
    %c0_i32_1 = arith.constant 0 : i32
    return %c0_i32, %c0_i32_0 : i32, i32
  }
  func.func @transform_5(%arg0: i32) -> (i32, i32, i32) {
    %c0_i32 = arith.constant 0 : i32
    %c0_i32_0 = arith.constant 0 : i32
    %c0_i32_1 = arith.constant 0 : i32
    %c0_i32_2 = arith.constant 0 : i32
    return %c0_i32, %c0_i32_0, %c0_i32_1 : i32, i32, i32
  }
  func.func @transform_6(%arg0: i32) -> (i32, i32) {
    %c0_i32 = arith.constant 0 : i32
    %c0_i32_0 = arith.constant 0 : i32
    %c0_i32_1 = arith.constant 0 : i32
    return %c0_i32, %c0_i32_0 : i32, i32
  }
  func.func @transform_7(%arg0: i32) -> (i32, i32) {
    %c0_i32 = arith.constant 0 : i32
    %c0_i32_0 = arith.constant 0 : i32
    %c0_i32_1 = arith.constant 0 : i32
    return %c0_i32, %c0_i32_0 : i32, i32
  }
  func.func @transform_8(%arg0: i32) -> (i32, i32) {
    %c0_i32 = arith.constant 0 : i32
    %c0_i32_0 = arith.constant 0 : i32
    %c0_i32_1 = arith.constant 0 : i32
    return %c0_i32, %c0_i32_0 : i32, i32
  }
  func.func @transform_9(%arg0: i32) -> (i32, i32) {
    %c0_i32 = arith.constant 0 : i32
    %c0_i32_0 = arith.constant 0 : i32
    %c0_i32_1 = arith.constant 0 : i32
    return %c0_i32, %c0_i32_0 : i32, i32
  }
  func.func @transform_10(%arg0: i32) -> (i32, i32) {
    %c0_i32 = arith.constant 0 : i32
    %c0_i32_0 = arith.constant 0 : i32
    %c0_i32_1 = arith.constant 0 : i32
    return %c0_i32, %c0_i32_0 : i32, i32
  }
  func.func @transform_11(%arg0: i32) -> (i32, i32) {
    %c0_i32 = arith.constant 0 : i32
    %c0_i32_0 = arith.constant 0 : i32
    %c0_i32_1 = arith.constant 0 : i32
    return %c0_i32, %c0_i32_0 : i32, i32
  }
  func.func @transform_12(%arg0: i32) -> (i32, i32) {
    %c0_i32 = arith.constant 0 : i32
    %c0_i32_0 = arith.constant 0 : i32
    %c0_i32_1 = arith.constant 0 : i32
    return %c0_i32, %c0_i32_0 : i32, i32
  }
  func.func @transform_13(%arg0: i32) -> (i32, i32) {
    %c0_i32 = arith.constant 0 : i32
    %c0_i32_0 = arith.constant 0 : i32
    %c0_i32_1 = arith.constant 0 : i32
    return %c0_i32, %c0_i32_0 : i32, i32
  }
  func.func @transform_14(%arg0: i32) -> (i32, i32) {
    %c0_i32 = arith.constant 0 : i32
    %c0_i32_0 = arith.constant 0 : i32
    %c0_i32_1 = arith.constant 0 : i32
    return %c0_i32, %c0_i32_0 : i32, i32
  }
  func.func @transform_15(%arg0: i32) -> (i32, i32, i32) {
    %c0_i32 = arith.constant 0 : i32
    %c0_i32_0 = arith.constant 0 : i32
    %c0_i32_1 = arith.constant 0 : i32
    return %arg0, %c0_i32, %c0_i32_0 : i32, i32, i32
  }
  func.func @transform_16(%arg0: i32) -> (i32, i32, i32) {
    %c0_i32 = arith.constant 0 : i32
    %c0_i32_0 = arith.constant 0 : i32
    %c0_i32_1 = arith.constant 0 : i32
    return %arg0, %c0_i32, %c0_i32_0 : i32, i32, i32
  }
  func.func @transform_17(%arg0: i32) -> (i32, i32, i32) {
    %c0_i32 = arith.constant 0 : i32
    %c0_i32_0 = arith.constant 0 : i32
    %c0_i32_1 = arith.constant 0 : i32
    return %arg0, %c0_i32, %c0_i32_0 : i32, i32, i32
  }
}

</mosaic_0001>

<bundles_post_ra>
// kernel: encoder_forward.3
= control target key start
LH: loop header
LB: loop body
LE: loop exit
PB: predicated region body
PF: predicated region fallthrough
CT: control target
= control target key end

     0   :  { %8 = vsyncpa [#allocation3], 0  ;;  %s1996_s12 = smov 0   ;;  %s2632_s0 = inlined_call_operand.vmem [shape: bf16[2,64,256], index: 0, kind: input, shape index: {}]   ;;  %s2633_s1 = inlined_call_operand.vmem [shape: bf16[256,1024], index: 1, kind: input, shape index: {}]   ;;  %s2634_s2 = inlined_call_operand.hbm [shape: f32[1,1024], index: 2, kind: input, shape index: {}]   ;;  %s2635_s3 = inlined_call_operand.vmem [shape: bf16[2,64,1024], index: 3, kind: output, shape index: {}]  }
   0x1 LB: > { %s2002_s13 = sadd.s32 4294967295, %s1973_s12   ;;  %p1691_p0 = scmp.ge.s32.totalorder %s1973_s12, 1  ;;  %s1973_s12 = sphi %s1996_s12, %s14_s12  }
   0x2   : > { %p113_p1 = scmp.lt.s32.totalorder %s1973_s12, 3  ;;  %p2636_p3 = scmp.eq.s32.totalorder %s2002_s13, 0 }
   0x3   : > { %s1975_s15 = smov [#allocation2]   ;;  %s1935_s20 = scalar_lea.hbm %s2634_s2, 128 }
   0x4   : > { %p2006_p2 = pnand %p1691_p0, %p113_p1  ;;  %s129_s16 = sshll.u32 %s1975_s15, 4  ;;  %s130_s16 = int_to_ptr.vmem [resolvable:$true] %s129_s16 }
   0x5   : > { %p1936_p6 = scmp.ne.s32.totalorder %s2634_s2, %s1935_s20  ;;  %p1942_p10 = scmp.lt.u32.totalorder %s1935_s20, %s2634_s2 }
   0x6   : > { %s2638_s14 = scalar_select %p2006_p2, 1, 0 }
   0x7   : > { %p1908_p4 = pneg %p2006_p2 }
   0x9   : > { %p2015_p5 = pnand %p2636_p3, %p1908_p4 }
   0xb   : > { %p1937_p7 = pneg %p2015_p5 }
   0xd   : > { %p1938_p8 = pnand %p1937_p7, %p1936_p6 }
   0xf   : > { %p1939_p9 = pneg %p1938_p8 }
  0x11   : > { %p1944_p11 = pnand %p1942_p10, %p1939_p9 }
  0x13   : > { %1947 = shalt.err (!%p1944_p11)
}
  0x14   : > { %s1948_s25 = scalar_lea.vmem %s130_s16, 128  ;;  %p1956_p1 = scmp.lt.s32.totalorder %s130_s16, %s130_s16 }
  0x15   : > { %p1949_p12 = scmp.ne.s32.totalorder %s130_s16, %s1948_s25  ;;  %p1957_p4 = scmp.lt.s32.totalorder %s1948_s25, %s1948_s25 }
  0x17   : > { %p1951_p13 = pnand %p1949_p12, %p1937_p7  ;;  %p1958_p3 = por %p1957_p4, %p1956_p1 }
  0x19   : > { %p1952_p0 = pneg %p1951_p13 }
  0x1b   : > { %p1959_p2 = pnand %p1958_p3, %p1952_p0 }
  0x1d   : > { %1962 = shalt.err (!%p1959_p2)
}
  0x1e   : > { %1911 = dma.hbm_to_vmem [thread:$0]  (!%p2015_p5), %s2634_s2, 128, %s130_s16, [#allocation3]  }
  0x1f   : > { %p2640_p6 = scmp.ne.s32.totalorder %s2638_s14, 0 }
  0x20   : > { %p2641_p8 = scmp.eq.s32.totalorder (!%p2640_p6), %s2002_s13, 0 }
  0x21   : > { %150 = sbr.rel (%p2640_p6) target bundleno = 419 (0x1a3), region = 32 }
  0x28   : > { %1968 = dma.done.wait (%p2641_p8), [#allocation3], 128   ;;  %p2642_p7 = pmov %p2641_p8 }
  0x29   : > { %v192_v0 = vld [vmem:[%s2633_s1] sm:$0xff]  ;;  %v193_v2 = vld [vmem:[%s2633_s1 + $0x8] sm:$0xff]  ;;  %p174_p2 = scmp.lt.s32.totalorder %s2002_s13, 1 }
  0x2a   : > { %1970 = vsyncadd (%p2642_p7), [#allocation3], 4294967168  ;;  %v196_v1 = vld [vmem:[%s2633_s1 + $0x20] sm:$0xff]  ;;  %v197_v4 = vld [vmem:[%s2633_s1 + $0x28] sm:$0xff] }
  0x2b   : > { %v1709_v3 = vcombine.high %v192_v0, %v196_v1  ;;  %v1708_v5 = vcombine.low %v192_v0, %v196_v1  ;;  %v200_v6 = vld [vmem:[%s2633_s1 + $0x40] sm:$0xff]  ;;  %v1711_v8 = vcombine.high %v193_v2, %v197_v4  ;;  %v1710_v9 = vcombine.low %v193_v2, %v197_v4  ;;  %v201_v11 = vld [vmem:[%s2633_s1 + $0x48] sm:$0xff]  ;;  %s2644_s13 = smov (!%p174_p2, %s2002_s13), 1 }
  0x2c   : > { %v204_v7 = vld [vmem:[%s2633_s1 + $0x60] sm:$0xff]  ;;  %v205_v12 = vld [vmem:[%s2633_s1 + $0x68] sm:$0xff]  ;;  %s1870_s26 = sshll.u32 %s2644_s13, 6  ;;  %s1871_s18 = sshll.u32 %s2644_s13, 8 }
  0x2d   : > { %v1717_v10 = vcombine.high %v200_v6, %v204_v7  ;;  %v208_v13 = vld [vmem:[%s2633_s1 + $0x80] sm:$0xff]  ;;  %1042 = vmatprep.subr.bf16.mxu0 %v1709_v3  ;;  %v1719_v14 = vcombine.high %v201_v11, %v205_v12  ;;  %v209_v16 = vld [vmem:[%s2633_s1 + $0x88] sm:$0xff]  ;;  %1115 = vmatprep.subr.bf16.mxu1 %v1711_v8  ;;  %v1716_v18 = vcombine.low %v200_v6, %v204_v7  ;;  %s2133_s10 = scalar_lea.vmem %s2632_s0, %s1870_s26  ;;  %s2522_s20 = scalar_lea.vmem %s2635_s3, %s1871_s18 }
  0x2e   : > { %v212_v15 = vld [vmem:[%s2633_s1 + $0xa0] sm:$0xff]  ;;  %v213_v17 = vld [vmem:[%s2633_s1 + $0xa8] sm:$0xff]  ;;  %1043 = vmatpush1.bf16.msra.mxu0 %v1708_v5  ;;  %1116 = vmatpush1.bf16.msra.mxu1 %v1710_v9  ;;  %v1718_v19 = vcombine.low %v201_v11, %v205_v12 }
  0x2f   : > { %1044 = vmatprep.subr.bf16.mxu0 %v1717_v10  ;;  %v1725_v20 = vcombine.high %v208_v13, %v212_v15  ;;  %1117 = vmatprep.subr.bf16.mxu1 %v1719_v14  ;;  %v1727_v21 = vcombine.high %v209_v16, %v213_v17  ;;  %v216_v22 = vld [vmem:[%s2633_s1 + $0xc0] sm:$0xff]  ;;  %v217_v24 = vld [vmem:[%s2633_s1 + $0xc8] sm:$0xff]  ;;  %v1724_v26 = vcombine.low %v208_v13, %v212_v15 }
  0x30   : > { %v220_v23 = vld [vmem:[%s2633_s1 + $0xe0] sm:$0xff]  ;;  %v221_v25 = vld [vmem:[%s2633_s1 + $0xe8] sm:$0xff]  ;;  %v1726_v27 = vcombine.low %v209_v16, %v213_v17 }
  0x31   : > { %v1733_v28 = vcombine.high %v216_v22, %v220_v23  ;;  %v1735_v29 = vcombine.high %v217_v24, %v221_v25  ;;  %v224_v30 = vld [vmem:[%s2633_s1 + $0x100] sm:$0xff]  ;;  %v225_v32 = vld [vmem:[%s2633_s1 + $0x108] sm:$0xff]  ;;  %v1732_v34 = vcombine.low %v216_v22, %v220_v23  ;;  %v1734_v35 = vcombine.low %v217_v24, %v221_v25 }
  0x32   : > { %1045 = vmatpush1.bf16.msra.mxu0 %v1716_v18  ;;  %1118 = vmatpush1.bf16.msra.mxu1 %v1718_v19  ;;  %v228_v31 = vld [vmem:[%s2633_s1 + $0x120] sm:$0xff]  ;;  %v229_v33 = vld [vmem:[%s2633_s1 + $0x128] sm:$0xff] }
  0x33   : > { %1046 = vmatprep.subr.bf16.mxu0 %v1725_v20  ;;  %1119 = vmatprep.subr.bf16.mxu1 %v1727_v21  ;;  %v1741_v36 = vcombine.high %v224_v30, %v228_v31  ;;  %v1743_v37 = vcombine.high %v225_v32, %v229_v33  ;;  %v232_v38 = vld [vmem:[%s2633_s1 + $0x140] sm:$0xff]  ;;  %v233_v40 = vld [vmem:[%s2633_s1 + $0x148] sm:$0xff]  ;;  %v1740_v42 = vcombine.low %v224_v30, %v228_v31 }
  0x34   : > { %v236_v39 = vld [vmem:[%s2633_s1 + $0x160] sm:$0xff]  ;;  %v237_v41 = vld [vmem:[%s2633_s1 + $0x168] sm:$0xff]  ;;  %v1742_v43 = vcombine.low %v225_v32, %v229_v33 }
  0x35   : > { %v1749_v44 = vcombine.high %v232_v38, %v236_v39  ;;  %v1751_v45 = vcombine.high %v233_v40, %v237_v41  ;;  %v240_v46 = vld [vmem:[%s2633_s1 + $0x180] sm:$0xff]  ;;  %v241_v48 = vld [vmem:[%s2633_s1 + $0x188] sm:$0xff]  ;;  %v1748_v50 = vcombine.low %v232_v38, %v236_v39  ;;  %v1750_v51 = vcombine.low %v233_v40, %v237_v41 }
  0x36   : > { %1047 = vmatpush1.bf16.msra.mxu0 %v1724_v26  ;;  %1120 = vmatpush1.bf16.msra.mxu1 %v1726_v27  ;;  %v244_v47 = vld [vmem:[%s2633_s1 + $0x1a0] sm:$0xff]  ;;  %v245_v49 = vld [vmem:[%s2633_s1 + $0x1a8] sm:$0xff] }
  0x37   : > { %1048 = vmatprep.subr.bf16.mxu0 %v1733_v28  ;;  %1121 = vmatprep.subr.bf16.mxu1 %v1735_v29  ;;  %v1757_v52 = vcombine.high %v240_v46, %v244_v47  ;;  %v1759_v53 = vcombine.high %v241_v48, %v245_v49  ;;  %v248_v54 = vld [vmem:[%s2633_s1 + $0x1c0] sm:$0xff]  ;;  %v249_v57 = vld [vmem:[%s2633_s1 + $0x1c8] sm:$0xff]  ;;  %v1756_v59 = vcombine.low %v240_v46, %v244_v47 }
  0x38   : > { %v252_v55 = vld [vmem:[%s2633_s1 + $0x1e0] sm:$0xff]  ;;  %v253_v58 = vld [vmem:[%s2633_s1 + $0x1e8] sm:$0xff]  ;;  %v1758_v60 = vcombine.low %v241_v48, %v245_v49 }
  0x39   : > { %v2142_v56 = vld [vmem:[%s2133_s10 + $0x4] ss:$8 sps:$4 sm:$0xff]   ;;  %v1765_v61 = vcombine.high %v248_v54, %v252_v55  ;;  %v1767_v62 = vcombine.high %v249_v57, %v253_v58  ;;  %v1764_v3 = vcombine.low %v248_v54, %v252_v55  ;;  %v1766_v4 = vcombine.low %v249_v57, %v253_v58 }
  0x3a   : > { %1049 = vmatpush1.bf16.msra.mxu0 %v1732_v34  ;;  %1122 = vmatpush1.bf16.msra.mxu1 %v1734_v35  ;;  %v256_v63 = vld [vmem:[%s2633_s1 + $0x200] sm:$0xff]  ;;  %v257_v1 = vld [vmem:[%s2633_s1 + $0x208] sm:$0xff] }
  0x3b   : > { %1050 = vmatprep.subr.bf16.mxu0 %v1741_v36  ;;  %1123 = vmatprep.subr.bf16.mxu1 %v1743_v37  ;;  %v260_v0 = vld [vmem:[%s2633_s1 + $0x220] sm:$0xff]  ;;  %v261_v2 = vld [vmem:[%s2633_s1 + $0x228] sm:$0xff] }
  0x3c   : > { %1074 = vmatprep.mubr.bf16.mxu0 %v2142_v56  ;;  %1147 = vmatprep.mubr.bf16.mxu1 %v2142_v56  ;;  %v1773_v5 = vcombine.high %v256_v63, %v260_v0  ;;  %v1775_v6 = vcombine.high %v257_v1, %v261_v2  ;;  %v264_v7 = vld [vmem:[%s2633_s1 + $0x240] sm:$0xff]  ;;  %v265_v9 = vld [vmem:[%s2633_s1 + $0x248] sm:$0xff]  ;;  %v1772_v11 = vcombine.low %v256_v63, %v260_v0  ;;  %v194_v0 = vld [vmem:[%s2633_s1 + $0x10] sm:$0xff] }
  0x3d   : > { %v268_v8 = vld [vmem:[%s2633_s1 + $0x260] sm:$0xff]  ;;  %v269_v10 = vld [vmem:[%s2633_s1 + $0x268] sm:$0xff]  ;;  %v1774_v12 = vcombine.low %v257_v1, %v261_v2  ;;  %v198_v1 = vld [vmem:[%s2633_s1 + $0x30] sm:$0xff] }
  0x3e   : > { %1051 = vmatpush1.bf16.msra.mxu0 %v1740_v42  ;;  %1124 = vmatpush1.bf16.msra.mxu1 %v1742_v43  ;;  %v1781_v13 = vcombine.high %v264_v7, %v268_v8  ;;  %v1783_v14 = vcombine.high %v265_v9, %v269_v10  ;;  %v272_v15 = vld [vmem:[%s2633_s1 + $0x280] sm:$0xff]  ;;  %v273_v17 = vld [vmem:[%s2633_s1 + $0x288] sm:$0xff]  ;;  %v1780_v19 = vcombine.low %v264_v7, %v268_v8  ;;  %v195_v2 = vld [vmem:[%s2633_s1 + $0x18] sm:$0xff] }
  0x3f   : > { %1052 = vmatprep.subr.bf16.mxu0 %v1749_v44  ;;  %1125 = vmatprep.subr.bf16.mxu1 %v1751_v45  ;;  %v276_v16 = vld [vmem:[%s2633_s1 + $0x2a0] sm:$0xff]  ;;  %v277_v18 = vld [vmem:[%s2633_s1 + $0x2a8] sm:$0xff]  ;;  %v1782_v20 = vcombine.low %v265_v9, %v269_v10  ;;  %v202_v8 = vld [vmem:[%s2633_s1 + $0x50] sm:$0xff] }
  0x40   : > { %v1789_v21 = vcombine.high %v272_v15, %v276_v16  ;;  %v1791_v22 = vcombine.high %v273_v17, %v277_v18  ;;  %v280_v23 = vld [vmem:[%s2633_s1 + $0x2c0] sm:$0xff]  ;;  %v281_v25 = vld [vmem:[%s2633_s1 + $0x2c8] sm:$0xff]  ;;  %v1788_v27 = vcombine.low %v272_v15, %v276_v16  ;;  %v1790_v28 = vcombine.low %v273_v17, %v277_v18  ;;  %v206_v9 = vld [vmem:[%s2633_s1 + $0x70] sm:$0xff] }
  0x41   : > { %v284_v24 = vld [vmem:[%s2633_s1 + $0x2e0] sm:$0xff]  ;;  %v285_v26 = vld [vmem:[%s2633_s1 + $0x2e8] sm:$0xff]  ;;  %v1721_v15 = vcombine.high %v202_v8, %v206_v9  ;;  %v210_v17 = vld [vmem:[%s2633_s1 + $0x90] sm:$0xff] }
  0x42   : > { %1053 = vmatpush1.bf16.msra.mxu0 %v1748_v50  ;;  %1126 = vmatpush1.bf16.msra.mxu1 %v1750_v51  ;;  %v1797_v29 = vcombine.high %v280_v23, %v284_v24  ;;  %v1799_v30 = vcombine.high %v281_v25, %v285_v26  ;;  %v288_v31 = vld [vmem:[%s2633_s1 + $0x300] sm:$0xff]  ;;  %v289_v33 = vld [vmem:[%s2633_s1 + $0x308] sm:$0xff]  ;;  %v1796_v35 = vcombine.low %v280_v23, %v284_v24  ;;  %v214_v18 = vld [vmem:[%s2633_s1 + $0xb0] sm:$0xff] }
  0x43   : > { %1054 = vmatprep.subr.bf16.mxu0 %v1757_v52  ;;  %1127 = vmatprep.subr.bf16.mxu1 %v1759_v53  ;;  %v292_v32 = vld [vmem:[%s2633_s1 + $0x320] sm:$0xff]  ;;  %v293_v34 = vld [vmem:[%s2633_s1 + $0x328] sm:$0xff]  ;;  %v1798_v36 = vcombine.low %v281_v25, %v285_v26  ;;  %v1729_v24 = vcombine.high %v210_v17, %v214_v18  ;;  %v218_v26 = vld [vmem:[%s2633_s1 + $0xd0] sm:$0xff] }
  0x44   : > { %v1805_v37 = vcombine.high %v288_v31, %v292_v32  ;;  %v1807_v38 = vcombine.high %v289_v33, %v293_v34  ;;  %v296_v39 = vld [vmem:[%s2633_s1 + $0x340] sm:$0xff]  ;;  %v297_v41 = vld [vmem:[%s2633_s1 + $0x348] sm:$0xff]  ;;  %v1804_v43 = vcombine.low %v288_v31, %v292_v32  ;;  %v1806_v44 = vcombine.low %v289_v33, %v293_v34 }
  0x45   : > { %v300_v40 = vld [vmem:[%s2633_s1 + $0x360] sm:$0xff]  ;;  %v301_v42 = vld [vmem:[%s2633_s1 + $0x368] sm:$0xff]  ;;  %v1728_v31 = vcombine.low %v210_v17, %v214_v18  ;;  %v266_v17 = vld [vmem:[%s2633_s1 + $0x250] sm:$0xff] }
  0x46   : > { %1055 = vmatpush1.bf16.msra.mxu0 %v1756_v59  ;;  %1128 = vmatpush1.bf16.msra.mxu1 %v1758_v60  ;;  %v1813_v45 = vcombine.high %v296_v39, %v300_v40  ;;  %v1815_v46 = vcombine.high %v297_v41, %v301_v42  ;;  %v304_v47 = vld [vmem:[%s2633_s1 + $0x380] sm:$0xff]  ;;  %v305_v49 = vld [vmem:[%s2633_s1 + $0x388] sm:$0xff]  ;;  %v1812_v51 = vcombine.low %v296_v39, %v300_v40  ;;  %v231_v39 = vld [vmem:[%s2633_s1 + $0x138] sm:$0xff] }
  0x47   : > { %1056 = vmatprep.subr.bf16.mxu0 %v1765_v61  ;;  %1129 = vmatprep.subr.bf16.mxu1 %v1767_v62  ;;  %v308_v48 = vld [vmem:[%s2633_s1 + $0x3a0] sm:$0xff]  ;;  %v309_v50 = vld [vmem:[%s2633_s1 + $0x3a8] sm:$0xff]  ;;  %v1814_v52 = vcombine.low %v297_v41, %v301_v42  ;;  %v270_v18 = vld [vmem:[%s2633_s1 + $0x270] sm:$0xff] }
  0x48   : > { %v1821_v53 = vcombine.high %v304_v47, %v308_v48  ;;  %v1823_v54 = vcombine.high %v305_v49, %v309_v50  ;;  %v312_v55 = vld [vmem:[%s2633_s1 + $0x3c0] sm:$0xff]  ;;  %v313_v58 = vld [vmem:[%s2633_s1 + $0x3c8] sm:$0xff]  ;;  %v1820_v60 = vcombine.low %v304_v47, %v308_v48  ;;  %v1822_v61 = vcombine.low %v305_v49, %v309_v50  ;;  %v239_v47 = vld [vmem:[%s2633_s1 + $0x178] sm:$0xff] }
  0x49   : > { %v316_v57 = vld [vmem:[%s2633_s1 + $0x3e0] sm:$0xff]  ;;  %v317_v59 = vld [vmem:[%s2633_s1 + $0x3e8] sm:$0xff] }
  0x4a   : > { %1057 = vmatpush1.bf16.msra.mxu0 %v1764_v3  ;;  %1130 = vmatpush1.bf16.msra.mxu1 %v1766_v4  ;;  %v1829_v62 = vcombine.high %v312_v55, %v316_v57  ;;  %v1831_v63 = vcombine.high %v313_v58, %v317_v59  ;;  %v199_v3 = vld [vmem:[%s2633_s1 + $0x38] sm:$0xff]  ;;  %v1828_v4 = vcombine.low %v312_v55, %v316_v57  ;;  %v2267_v10 = vld [vmem:[%s2133_s10] ss:$8 sps:$4 sm:$0xff]  }
  0x4b   : > { %1058 = vmatprep.subr.bf16.mxu0 %v1773_v5  ;;  %1131 = vmatprep.subr.bf16.mxu1 %v1775_v6  ;;  %v1830_v5 = vcombine.low %v313_v58, %v317_v59  ;;  %v1713_v6 = vcombine.high %v194_v0, %v198_v1  ;;  %v1715_v7 = vcombine.high %v195_v2, %v199_v3  ;;  %v2341_v48 = vld [vmem:[%s2133_s10 + $0x20] ss:$8 sps:$4 sm:$0xff]   ;;  %v2350_v55 = vld [vmem:[%s2133_s10 + $0x34] ss:$8 sps:$4 sm:$0xff]  }
  0x4c   : > { %v243_v57 = vld [vmem:[%s2633_s1 + $0x198] sm:$0xff] }
  0x4d   : > { %v247_v58 = vld [vmem:[%s2633_s1 + $0x1b8] sm:$0xff] }
  0x4e   : > { %1059 = vmatpush1.bf16.msra.mxu0 %v1772_v11  ;;  %1132 = vmatpush1.bf16.msra.mxu1 %v1774_v12  ;;  %v203_v11 = vld [vmem:[%s2633_s1 + $0x58] sm:$0xff] }
  0x4f   : > { %1060 = vmatprep.subr.bf16.mxu0 %v1781_v13  ;;  %1133 = vmatprep.subr.bf16.mxu1 %v1783_v14  ;;  %v207_v12 = vld [vmem:[%s2633_s1 + $0x78] sm:$0xff]  ;;  %v1712_v13 = vcombine.low %v194_v0, %v198_v1  ;;  %v1714_v14 = vcombine.low %v195_v2, %v199_v3  ;;  %v254_v0 = vld [vmem:[%s2633_s1 + $0x1f0] sm:$0xff] }
  0x50   : > { %v1723_v16 = vcombine.high %v203_v11, %v207_v12  ;;  %v1722_v23 = vcombine.low %v203_v11, %v207_v12  ;;  %v251_v1 = vld [vmem:[%s2633_s1 + $0x1d8] sm:$0xff] }
  0x51   : > { %v255_v2 = vld [vmem:[%s2633_s1 + $0x1f8] sm:$0xff] }
  0x52   : > { %1061 = vmatpush1.bf16.msra.mxu0 %v1780_v19  ;;  %1134 = vmatpush1.bf16.msra.mxu1 %v1782_v20  ;;  %v2282_v19 = vld [vmem:[%s2133_s10 + $0x14] ss:$8 sps:$4 sm:$0xff]   ;;  %v2375_v3 = vld [vmem:[%s2133_s10 + $0x30] ss:$8 sps:$4 sm:$0xff]  }
  0x53   : > { %1062 = vmatprep.subr.bf16.mxu0 %v1789_v21  ;;  %1135 = vmatprep.subr.bf16.mxu1 %v1791_v22  ;;  %v211_v20 = vld [vmem:[%s2633_s1 + $0x98] sm:$0xff]  ;;  %v1720_v22 = vcombine.low %v202_v8, %v206_v9  ;;  %v258_v8 = vld [vmem:[%s2633_s1 + $0x210] sm:$0xff] }
  0x54   : > { %v215_v21 = vld [vmem:[%s2633_s1 + $0xb8] sm:$0xff]  ;;  %v262_v9 = vld [vmem:[%s2633_s1 + $0x230] sm:$0xff] }
  0x55   : > { %v1731_v25 = vcombine.high %v211_v20, %v215_v21  ;;  %v1730_v32 = vcombine.low %v211_v20, %v215_v21  ;;  %v259_v11 = vld [vmem:[%s2633_s1 + $0x218] sm:$0xff] }
  0x56   : > { %1063 = vmatpush1.bf16.msra.mxu0 %v1788_v27  ;;  %1136 = vmatpush1.bf16.msra.mxu1 %v1790_v28  ;;  %v222_v27 = vld [vmem:[%s2633_s1 + $0xf0] sm:$0xff]  ;;  %v219_v28 = vld [vmem:[%s2633_s1 + $0xd8] sm:$0xff] }
  0x57   : > { %1064 = vmatprep.subr.bf16.mxu0 %v1797_v29  ;;  %1137 = vmatprep.subr.bf16.mxu1 %v1799_v30  ;;  %v223_v29 = vld [vmem:[%s2633_s1 + $0xf8] sm:$0xff]  ;;  %v1737_v33 = vcombine.high %v218_v26, %v222_v27  ;;  %v1736_v40 = vcombine.low %v218_v26, %v222_v27  ;;  %v274_v26 = vld [vmem:[%s2633_s1 + $0x290] sm:$0xff] }
  0x58   : > { %v2307_v30 = vld [vmem:[%s2133_s10 + $0x10] ss:$8 sps:$4 sm:$0xff]   ;;  %v1739_v34 = vcombine.high %v219_v28, %v223_v29  ;;  %v1738_v41 = vcombine.low %v219_v28, %v223_v29  ;;  %v1784_v29 = vcombine.low %v266_v17, %v270_v18 }
  0x59   : > { %v263_v12 = vld [vmem:[%s2633_s1 + $0x238] sm:$0xff]  ;;  %v278_v27 = vld [vmem:[%s2633_s1 + $0x2b0] sm:$0xff] }
  0x5a   : > { %1065 = vmatpush1.bf16.msra.mxu0 %v1796_v35  ;;  %1138 = vmatpush1.bf16.msra.mxu1 %v1798_v36  ;;  %v226_v35 = vld [vmem:[%s2633_s1 + $0x110] sm:$0xff]  ;;  %v267_v20 = vld [vmem:[%s2633_s1 + $0x258] sm:$0xff] }
  0x5b   : > { %1066 = vmatprep.subr.bf16.mxu0 %v1805_v37  ;;  %1139 = vmatprep.subr.bf16.mxu1 %v1807_v38  ;;  %v230_v36 = vld [vmem:[%s2633_s1 + $0x130] sm:$0xff]  ;;  %v2316_v37 = vld [vmem:[%s2133_s10 + $0x24] ss:$8 sps:$4 sm:$0xff]   ;;  %v227_v38 = vld [vmem:[%s2633_s1 + $0x118] sm:$0xff] }
  0x5c   : > { %v1745_v42 = vcombine.high %v226_v35, %v230_v36  ;;  %v1744_v49 = vcombine.low %v226_v35, %v230_v36  ;;  %v1746_v50 = vcombine.low %v227_v38, %v231_v39  ;;  %v271_v21 = vld [vmem:[%s2633_s1 + $0x278] sm:$0xff]  ;;  %v286_v35 = vld [vmem:[%s2633_s1 + $0x2f0] sm:$0xff] }
  0x5d   : > { %v279_v28 = vld [vmem:[%s2633_s1 + $0x2b8] sm:$0xff] }
  0x5e   : > { %1067 = vmatpush1.bf16.msra.mxu0 %v1804_v43  ;;  %1140 = vmatpush1.bf16.msra.mxu1 %v1806_v44  ;;  %v1747_v43 = vcombine.high %v227_v38, %v231_v39  ;;  %v234_v44 = vld [vmem:[%s2633_s1 + $0x150] sm:$0xff]  ;;  %v283_v36 = vld [vmem:[%s2633_s1 + $0x2d8] sm:$0xff]  ;;  %v1792_v39 = vcombine.low %v274_v26, %v278_v27 }
  0x5f   : > { %1068 = vmatprep.subr.bf16.mxu0 %v1813_v45  ;;  %1141 = vmatprep.subr.bf16.mxu1 %v1815_v46  ;;  %v238_v45 = vld [vmem:[%s2633_s1 + $0x170] sm:$0xff]  ;;  %v235_v46 = vld [vmem:[%s2633_s1 + $0x158] sm:$0xff] }
  0x60   : > { %v1752_v59 = vcombine.low %v234_v44, %v238_v45  ;;  %v287_v38 = vld [vmem:[%s2633_s1 + $0x2f8] sm:$0xff] }
  0x62   : > { %1069 = vmatpush1.bf16.msra.mxu0 %v1812_v51  ;;  %1142 = vmatpush1.bf16.msra.mxu1 %v1814_v52  ;;  %v1753_v51 = vcombine.high %v234_v44, %v238_v45  ;;  %v1755_v52 = vcombine.high %v235_v46, %v239_v47  ;;  %v294_v44 = vld [vmem:[%s2633_s1 + $0x330] sm:$0xff]  ;;  %v291_v45 = vld [vmem:[%s2633_s1 + $0x318] sm:$0xff] }
  0x63   : > { %1070 = vmatprep.subr.bf16.mxu0 %v1821_v53  ;;  %1143 = vmatprep.subr.bf16.mxu1 %v1823_v54  ;;  %v242_v53 = vld [vmem:[%s2633_s1 + $0x190] sm:$0xff] }
  0x64   : > { %v246_v54 = vld [vmem:[%s2633_s1 + $0x1b0] sm:$0xff] }
  0x66   : > { %1071 = vmatpush1.bf16.msra.mxu0 %v1820_v60  ;;  %1144 = vmatpush1.bf16.msra.mxu1 %v1822_v61  ;;  %v1754_v60 = vcombine.low %v235_v46, %v239_v47  ;;  %v1761_v61 = vcombine.high %v242_v53, %v246_v54  ;;  %v295_v46 = vld [vmem:[%s2633_s1 + $0x338] sm:$0xff] }
  0x67   : > { %1072 = vmatprep.subr.bf16.mxu0 %v1829_v62  ;;  %1145 = vmatprep.subr.bf16.mxu1 %v1831_v63  ;;  %v1763_v62 = vcombine.high %v243_v57, %v247_v58  ;;  %v250_v63 = vld [vmem:[%s2633_s1 + $0x1d0] sm:$0xff] }
  0x6a   : > { %1073 = vmatpush1.bf16.msra.mxu0 %v1828_v4  ;;  %1146 = vmatpush1.bf16.msra.mxu1 %v1830_v5  ;;  %v1760_v4 = vcombine.low %v242_v53, %v246_v54  ;;  %v1762_v5 = vcombine.low %v243_v57, %v247_v58  ;;  %v302_v53 = vld [vmem:[%s2633_s1 + $0x370] sm:$0xff]  ;;  %v299_v54 = vld [vmem:[%s2633_s1 + $0x358] sm:$0xff] }
  0x6b   : > { %1188 = vmatprep.subr.bf16.mxu0 %v1713_v6  ;;  %1261 = vmatprep.subr.bf16.mxu1 %v1715_v7  ;;  %v1769_v6 = vcombine.high %v250_v63, %v254_v0  ;;  %v1771_v7 = vcombine.high %v251_v1, %v255_v2  ;;  %v303_v57 = vld [vmem:[%s2633_s1 + $0x378] sm:$0xff] }
  0x6d   : > { %1075 = vmatmul.mubr.bf16.vlgmr.msra.gmra.mrb[0].mxu0 %v2267_v10  ;;  %1148 = vmatmul.mubr.bf16.vlgmr.msra.gmra.mrb[0].mxu1 %v2267_v10 }
  0x6e   : > { %1189 = vmatpush1.bf16.msra.mxu0 %v1712_v13  ;;  %1262 = vmatpush1.bf16.msra.mxu1 %v1714_v14  ;;  %v1768_v13 = vcombine.low %v250_v63, %v254_v0  ;;  %v1770_v14 = vcombine.low %v251_v1, %v255_v2  ;;  %v310_v63 = vld [vmem:[%s2633_s1 + $0x3b0] sm:$0xff]  ;;  %v307_v0 = vld [vmem:[%s2633_s1 + $0x398] sm:$0xff] }
  0x6f   : > { %1190 = vmatprep.subr.bf16.mxu0 %v1721_v15  ;;  %1263 = vmatprep.subr.bf16.mxu1 %v1723_v16  ;;  %v1777_v15 = vcombine.high %v258_v8, %v262_v9  ;;  %v1779_v16 = vcombine.high %v259_v11, %v263_v12  ;;  %v311_v1 = vld [vmem:[%s2633_s1 + $0x3b8] sm:$0xff] }
  0x70   : > { %1084 = vmatprep.mubr.bf16.mxu0 %v2282_v19  ;;  %1157 = vmatprep.mubr.bf16.mxu1 %v2282_v19 }
  0x72   : > { %1191 = vmatpush1.bf16.msra.mxu0 %v1720_v22  ;;  %1264 = vmatpush1.bf16.msra.mxu1 %v1722_v23  ;;  %v1776_v22 = vcombine.low %v258_v8, %v262_v9  ;;  %v1778_v23 = vcombine.low %v259_v11, %v263_v12  ;;  %v318_v8 = vld [vmem:[%s2633_s1 + $0x3f0] sm:$0xff]  ;;  %v315_v9 = vld [vmem:[%s2633_s1 + $0x3d8] sm:$0xff] }
  0x73   : > { %1192 = vmatprep.subr.bf16.mxu0 %v1729_v24  ;;  %1265 = vmatprep.subr.bf16.mxu1 %v1731_v25  ;;  %v1785_v24 = vcombine.high %v266_v17, %v270_v18  ;;  %v1787_v25 = vcombine.high %v267_v20, %v271_v21  ;;  %v319_v11 = vld [vmem:[%s2633_s1 + $0x3f8] sm:$0xff]  ;;  %v2494_v18 = vld [vmem:[#allocation2] sm:$0xff] }
  0x74   : > { %v1834_v17 = vcombine.low %v315_v9, %v319_v11 }
  0x75   : > { %1085 = vmatmul.mubr.bf16.gmra.mrb[4].mxu0 %v2307_v30  ;;  %1158 = vmatmul.mubr.bf16.gmra.mrb[4].mxu1 %v2307_v30 }
  0x76   : > { %1193 = vmatpush1.bf16.msra.mxu0 %v1728_v31  ;;  %1266 = vmatpush1.bf16.msra.mxu1 %v1730_v32  ;;  %v1786_v31 = vcombine.low %v267_v20, %v271_v21  ;;  %v1793_v32 = vcombine.high %v274_v26, %v278_v27 }
  0x77   : > { %1194 = vmatprep.subr.bf16.mxu0 %v1737_v33  ;;  %1267 = vmatprep.subr.bf16.mxu1 %v1739_v34  ;;  %v282_v34 = vld [vmem:[%s2633_s1 + $0x2d0] sm:$0xff] }
  0x78   : > { %1094 = vmatprep.mubr.bf16.mxu0 %v2316_v37  ;;  %1167 = vmatprep.mubr.bf16.mxu1 %v2316_v37  ;;  %v1800_v47 = vcombine.low %v282_v34, %v286_v35 }
  0x7a   : > { %1195 = vmatpush1.bf16.msra.mxu0 %v1736_v40  ;;  %1268 = vmatpush1.bf16.msra.mxu1 %v1738_v41  ;;  %v1801_v41 = vcombine.high %v282_v34, %v286_v35 }
  0x7b   : > { %1196 = vmatprep.subr.bf16.mxu0 %v1745_v42  ;;  %1269 = vmatprep.subr.bf16.mxu1 %v1747_v43  ;;  %v1803_v42 = vcombine.high %v283_v36, %v287_v38  ;;  %v290_v43 = vld [vmem:[%s2633_s1 + $0x310] sm:$0xff] }
  0x7c   : > { %v1808_v58 = vcombine.low %v290_v43, %v294_v44 }
  0x7d   : > { %1095 = vmatmul.mubr.bf16.gmra.mrb[8].mxu0 %v2341_v48  ;;  %1168 = vmatmul.mubr.bf16.gmra.mrb[8].mxu1 %v2341_v48 }
  0x7e   : > { %1197 = vmatpush1.bf16.msra.mxu0 %v1744_v49  ;;  %1270 = vmatpush1.bf16.msra.mxu1 %v1746_v50  ;;  %v1802_v49 = vcombine.low %v283_v36, %v287_v38  ;;  %v1809_v50 = vcombine.high %v290_v43, %v294_v44 }
  0x7f   : > { %1198 = vmatprep.subr.bf16.mxu0 %v1753_v51  ;;  %1271 = vmatprep.subr.bf16.mxu1 %v1755_v52  ;;  %v1811_v51 = vcombine.high %v291_v45, %v295_v46  ;;  %v298_v52 = vld [vmem:[%s2633_s1 + $0x350] sm:$0xff] }
  0x80   : > { %1104 = vmatprep.mubr.bf16.mxu0 %v2350_v55  ;;  %1177 = vmatprep.mubr.bf16.mxu1 %v2350_v55  ;;  %v1816_v2 = vcombine.low %v298_v52, %v302_v53 }
  0x82   : > { %1199 = vmatpush1.bf16.msra.mxu0 %v1752_v59  ;;  %1272 = vmatpush1.bf16.msra.mxu1 %v1754_v60  ;;  %v1810_v59 = vcombine.low %v291_v45, %v295_v46  ;;  %v1817_v60 = vcombine.high %v298_v52, %v302_v53 }
  0x83   : > { %1200 = vmatprep.subr.bf16.mxu0 %v1761_v61  ;;  %1273 = vmatprep.subr.bf16.mxu1 %v1763_v62  ;;  %v1819_v61 = vcombine.high %v299_v54, %v303_v57  ;;  %v306_v62 = vld [vmem:[%s2633_s1 + $0x390] sm:$0xff] }
  0x84   : > { %v1824_v12 = vcombine.low %v306_v62, %v310_v63 }
  0x85   : > { %1105 = vmatmul.mubr.bf16.gmra.mrb[12].mxu0 %v2375_v3  ;;  %1178 = vmatmul.mubr.bf16.gmra.mrb[12].mxu1 %v2375_v3 }
  0x86   : > { %1201 = vmatpush1.bf16.msra.mxu0 %v1760_v4  ;;  %1274 = vmatpush1.bf16.msra.mxu1 %v1762_v5  ;;  %v1818_v4 = vcombine.low %v299_v54, %v303_v57  ;;  %v1825_v5 = vcombine.high %v306_v62, %v310_v63 }
  0x87   : > { %1202 = vmatprep.subr.bf16.mxu0 %v1769_v6  ;;  %1275 = vmatprep.subr.bf16.mxu1 %v1771_v7  ;;  %v1827_v6 = vcombine.high %v307_v0, %v311_v1  ;;  %v314_v7 = vld [vmem:[%s2633_s1 + $0x3d0] sm:$0xff] }
  0x88   : > { %1220 = vmatprep.mubr.bf16.mxu0 %v2142_v56  ;;  %1293 = vmatprep.mubr.bf16.mxu1 %v2142_v56  ;;  %v275_v56 = vld [vmem:[%s2633_s1 + $0x298] sm:$0xff] }
  0x89   : > { %v1795_v33 = vcombine.high %v275_v56, %v279_v28  ;;  %v1794_v40 = vcombine.low %v275_v56, %v279_v28 }
  0x8a   : > { %1203 = vmatpush1.bf16.msra.mxu0 %v1768_v13  ;;  %1276 = vmatpush1.bf16.msra.mxu1 %v1770_v14  ;;  %v1826_v13 = vcombine.low %v307_v0, %v311_v1  ;;  %v1833_v14 = vcombine.high %v314_v7, %v318_v8 }
  0x8b   : > { %1204 = vmatprep.subr.bf16.mxu0 %v1777_v15  ;;  %1277 = vmatprep.subr.bf16.mxu1 %v1779_v16  ;;  %v1835_v15 = vcombine.high %v315_v9, %v319_v11  ;;  %v1832_v16 = vcombine.low %v314_v7, %v318_v8 }
  0x8e   : > { %1205 = vmatpush1.bf16.msra.mxu0 %v1776_v22  ;;  %1278 = vmatpush1.bf16.msra.mxu1 %v1778_v23 }
  0x8f   : > { %1206 = vmatprep.subr.bf16.mxu0 %v1785_v24  ;;  %1279 = vmatprep.subr.bf16.mxu1 %v1787_v25 }
  0x92   : > { %1207 = vmatpush1.bf16.msra.mxu0 %v1784_v29  ;;  %1280 = vmatpush1.bf16.msra.mxu1 %v1786_v31 }
  0x93   : > { %1208 = vmatprep.subr.bf16.mxu0 %v1793_v32  ;;  %1281 = vmatprep.subr.bf16.mxu1 %v1795_v33 }
  0x96   : > { %1209 = vmatpush1.bf16.msra.mxu0 %v1792_v39  ;;  %1282 = vmatpush1.bf16.msra.mxu1 %v1794_v40 }
  0x97   : > { %1210 = vmatprep.subr.bf16.mxu0 %v1801_v41  ;;  %1283 = vmatprep.subr.bf16.mxu1 %v1803_v42 }
  0x9a   : > { %1211 = vmatpush1.bf16.msra.mxu0 %v1800_v47  ;;  %1284 = vmatpush1.bf16.msra.mxu1 %v1802_v49 }
  0x9b   : > { %1212 = vmatprep.subr.bf16.mxu0 %v1809_v50  ;;  %1285 = vmatprep.subr.bf16.mxu1 %v1811_v51 }
  0x9e   : > { %1213 = vmatpush1.bf16.msra.mxu0 %v1808_v58  ;;  %1286 = vmatpush1.bf16.msra.mxu1 %v1810_v59 }
  0x9f   : > { %1214 = vmatprep.subr.bf16.mxu0 %v1817_v60  ;;  %1287 = vmatprep.subr.bf16.mxu1 %v1819_v61 }
  0xa2   : > { %1215 = vmatpush1.bf16.msra.mxu0 %v1816_v2  ;;  %1288 = vmatpush1.bf16.msra.mxu1 %v1818_v4 }
  0xa3   : > { %1216 = vmatprep.subr.bf16.mxu0 %v1825_v5  ;;  %1289 = vmatprep.subr.bf16.mxu1 %v1827_v6 }
  0xa6   : > { %1217 = vmatpush1.bf16.msra.mxu0 %v1824_v12  ;;  %1290 = vmatpush1.bf16.msra.mxu1 %v1826_v13 }
  0xa7   : > { %1218 = vmatprep.subr.bf16.mxu0 %v1833_v14  ;;  %1291 = vmatprep.subr.bf16.mxu1 %v1835_v15 }
  0xaa   : > { %1219 = vmatpush1.bf16.msra.mxu0 %v1832_v16  ;;  %1292 = vmatpush1.bf16.msra.mxu1 %v1834_v17 }
  0xad   : > { %1221 = vmatmul.mubr.bf16.vlgmr.msra.gmra.mrb[16].mxu0 %v2267_v10  ;;  %1294 = vmatmul.mubr.bf16.vlgmr.msra.gmra.mrb[16].mxu1 %v2267_v10  ;;  %v322_v10 = vlaneseq }
  0xae   : > { %1230 = vmatprep.mubr.bf16.mxu0 %v2282_v19  ;;  %1303 = vmatprep.mubr.bf16.mxu1 %v2282_v19 }
  0xaf   : > { %v2491_v19 = vshrl.u32 %v322_v10, 7 }
  0xb1   : > { %v336_v20 = vsub.s32 3, %v2491_v19 }
  0xb3   : > { %v2509_v22 = vrot.slane %v2494_v18, %v336_v20 }
  0xb5   : > { %1231 = vmatmul.mubr.bf16.gmra.mrb[20].mxu0 %v2307_v30  ;;  %1304 = vmatmul.mubr.bf16.gmra.mrb[20].mxu1 %v2307_v30  ;;  %v324_v30 = vsub.s32 0, %v2491_v19 }
  0xb6   : > { %1240 = vmatprep.mubr.bf16.mxu0 %v2316_v37  ;;  %1313 = vmatprep.mubr.bf16.mxu1 %v2316_v37  ;;  %v332_v37 = vsub.s32 2, %v2491_v19 }
  0xb8   : > { %v2503_v21 = vrot.slane %v2494_v18, %v332_v37 }
  0xbd   : > { %1241 = vmatmul.mubr.bf16.gmra.mrb[24].mxu0 %v2341_v48  ;;  %1314 = vmatmul.mubr.bf16.gmra.mrb[24].mxu1 %v2341_v48  ;;  %v328_v48 = vsub.s32 1, %v2491_v19 }
  0xbe   : > { %1250 = vmatprep.mubr.bf16.mxu0 %v2350_v55  ;;  %1323 = vmatprep.mubr.bf16.mxu1 %v2350_v55  ;;  %v2500_v55 = vrot.slane %v2494_v18, %v324_v30 }
  0xc5   : > { %1251 = vmatmul.mubr.bf16.gmra.mrb[28].mxu0 %v2375_v3  ;;  %1324 = vmatmul.mubr.bf16.gmra.mrb[28].mxu1 %v2375_v3  ;;  %v2506_v3 = vrot.slane %v2494_v18, %v328_v48 }
 0x140   : > { %v1076_v23 = vpop.f32.mrb[0].mxu0  ;;  %v1149_v25 = vpop.f32.mrb[0].mxu1 }
 0x141   : > { %v1077_v24 = vadd.f32 %v1076_v23, %v2500_v55  ;;  %v1078_v26 = vpop.f32.mrb[1].mxu0  ;;  %v1150_v27 = vadd.f32 %v1149_v25, %v2503_v21  ;;  %v1151_v28 = vpop.f32.mrb[1].mxu1 }
 0x142   : > { %v1079_v56 = vadd.f32 %v1078_v26, %v2506_v3  ;;  %v1080_v29 = vpop.f32.mrb[2].mxu0  ;;  %v1152_v32 = vadd.f32 %v1151_v28, %v2509_v22  ;;  %v1153_v34 = vpop.f32.mrb[2].mxu1 }
 0x143   : > { %v1334_v31 = vmax.f32 %v1077_v24, 0.0  ;;  %v1081_v33 = vadd.f32 %v1080_v29, %v2500_v55  ;;  %v1082_v35 = vpop.f32.mrb[3].mxu0  ;;  %v1336_v36 = vmax.f32 %v1150_v27, 0.0  ;;  %v1154_v39 = vadd.f32 %v1153_v34, %v2503_v21  ;;  %v1155_v41 = vpop.f32.mrb[3].mxu1 }
 0x144   : > { %v1335_v38 = vmax.f32 %v1079_v56, 0.0  ;;  %v1083_v40 = vadd.f32 %v1082_v35, %v2506_v3  ;;  %v1337_v42 = vmax.f32 %v1152_v32, 0.0  ;;  %v1156_v44 = vadd.f32 %v1155_v41, %v2509_v22 }
 0x145   : > { %v1342_v43 = vmax.f32 %v1081_v33, 0.0  ;;  %v1344_v46 = vmax.f32 %v1154_v39, 0.0 }
 0x146   : > { %v1872_v45 = vpack.c.bf16 %v1335_v38, %v1334_v31  ;;  %v1343_v47 = vmax.f32 %v1083_v40, 0.0  ;;  %v1873_v49 = vpack.c.bf16 %v1337_v42, %v1336_v36  ;;  %v1345_v50 = vmax.f32 %v1156_v44, 0.0 }
 0x148   : > { %1590 = vst [vmem:[%s2522_s20] sm:$0xff] %v1872_v45  ;;  %v1876_v51 = vpack.c.bf16 %v1343_v47, %v1342_v43  ;;  %v1086_v52 = vpop.f32.mrb[4].mxu0  ;;  %1591 = vst [vmem:[%s2522_s20 + $0x8] sm:$0xff] %v1873_v49  ;;  %v1877_v53 = vpack.c.bf16 %v1345_v50, %v1344_v46  ;;  %v1159_v57 = vpop.f32.mrb[4].mxu1 }
 0x149   : > { %v1087_v54 = vadd.f32 %v1086_v52, %v2500_v55  ;;  %v1088_v58 = vpop.f32.mrb[5].mxu0  ;;  %v1160_v59 = vadd.f32 %v1159_v57, %v2503_v21  ;;  %v1161_v61 = vpop.f32.mrb[5].mxu1 }
 0x14a   : > { %1594 = vst [vmem:[%s2522_s20 + $0x20] sm:$0xff] %v1876_v51  ;;  %v1089_v60 = vadd.f32 %v1088_v58, %v2506_v3  ;;  %v1090_v62 = vpop.f32.mrb[6].mxu0  ;;  %1595 = vst [vmem:[%s2522_s20 + $0x28] sm:$0xff] %v1877_v53  ;;  %v1162_v0 = vadd.f32 %v1161_v61, %v2509_v22  ;;  %v1163_v2 = vpop.f32.mrb[6].mxu1 }
 0x14b   : > { %v1350_v63 = vmax.f32 %v1087_v54, 0.0  ;;  %v1091_v1 = vadd.f32 %v1090_v62, %v2500_v55  ;;  %v1092_v4 = vpop.f32.mrb[7].mxu0  ;;  %v1352_v5 = vmax.f32 %v1160_v59, 0.0  ;;  %v1164_v7 = vadd.f32 %v1163_v2, %v2503_v21  ;;  %v1165_v9 = vpop.f32.mrb[7].mxu1 }
 0x14c   : > { %v1351_v6 = vmax.f32 %v1089_v60, 0.0  ;;  %v1093_v8 = vadd.f32 %v1092_v4, %v2506_v3  ;;  %v1353_v11 = vmax.f32 %v1162_v0, 0.0  ;;  %v1166_v13 = vadd.f32 %v1165_v9, %v2509_v22 }
 0x14d   : > { %v1358_v12 = vmax.f32 %v1091_v1, 0.0  ;;  %v1360_v15 = vmax.f32 %v1164_v7, 0.0 }
 0x14e   : > { %v1880_v14 = vpack.c.bf16 %v1351_v6, %v1350_v63  ;;  %v1359_v16 = vmax.f32 %v1093_v8, 0.0  ;;  %v1881_v17 = vpack.c.bf16 %v1353_v11, %v1352_v5  ;;  %v1361_v10 = vmax.f32 %v1166_v13, 0.0 }
 0x150   : > { %1598 = vst [vmem:[%s2522_s20 + $0x40] sm:$0xff] %v1880_v14  ;;  %v1884_v30 = vpack.c.bf16 %v1359_v16, %v1358_v12  ;;  %v1096_v37 = vpop.f32.mrb[8].mxu0  ;;  %1599 = vst [vmem:[%s2522_s20 + $0x48] sm:$0xff] %v1881_v17  ;;  %v1885_v48 = vpack.c.bf16 %v1361_v10, %v1360_v15  ;;  %v1169_v23 = vpop.f32.mrb[8].mxu1  ;;  %v344_v10 = vsub.s32 5, %v2491_v19 }
 0x151   : > { %v1097_v20 = vadd.f32 %v1096_v37, %v2500_v55  ;;  %v1098_v24 = vpop.f32.mrb[9].mxu0  ;;  %v1170_v25 = vadd.f32 %v1169_v23, %v2503_v21  ;;  %v1171_v27 = vpop.f32.mrb[9].mxu1 }
 0x152   : > { %1602 = vst [vmem:[%s2522_s20 + $0x60] sm:$0xff] %v1884_v30  ;;  %v1099_v26 = vadd.f32 %v1098_v24, %v2506_v3  ;;  %v1100_v56 = vpop.f32.mrb[10].mxu0  ;;  %1603 = vst [vmem:[%s2522_s20 + $0x68] sm:$0xff] %v1885_v48  ;;  %v1172_v29 = vadd.f32 %v1171_v27, %v2509_v22  ;;  %v1173_v32 = vpop.f32.mrb[10].mxu1  ;;  %v352_v30 = vsub.s32 7, %v2491_v19  ;;  %v2576_v48 = vrot.slane %v2494_v18, %v344_v10 }
 0x153   : > { %v1366_v28 = vmax.f32 %v1097_v20, 0.0  ;;  %v1101_v31 = vadd.f32 %v1100_v56, %v2500_v55  ;;  %v1102_v33 = vpop.f32.mrb[11].mxu0  ;;  %v1368_v34 = vmax.f32 %v1170_v25, 0.0  ;;  %v1174_v36 = vadd.f32 %v1173_v32, %v2503_v21  ;;  %v1175_v39 = vpop.f32.mrb[11].mxu1 }
 0x154   : > { %v1367_v35 = vmax.f32 %v1099_v26, 0.0  ;;  %v1103_v38 = vadd.f32 %v1102_v33, %v2506_v3  ;;  %v1369_v40 = vmax.f32 %v1172_v29, 0.0  ;;  %v1176_v42 = vadd.f32 %v1175_v39, %v2509_v22 }
 0x155   : > { %v1374_v41 = vmax.f32 %v1101_v31, 0.0  ;;  %v1376_v44 = vmax.f32 %v1174_v36, 0.0  ;;  %v2579_v20 = vrot.slane %v2494_v18, %v352_v30 }
 0x156   : > { %v1888_v43 = vpack.c.bf16 %v1367_v35, %v1366_v28  ;;  %v1375_v45 = vmax.f32 %v1103_v38, 0.0  ;;  %v1889_v46 = vpack.c.bf16 %v1369_v40, %v1368_v34  ;;  %v1377_v47 = vmax.f32 %v1176_v42, 0.0 }
 0x158   : > { %1606 = vst [vmem:[%s2522_s20 + $0x80] sm:$0xff] %v1888_v43  ;;  %v1892_v49 = vpack.c.bf16 %v1375_v45, %v1374_v41  ;;  %v1106_v50 = vpop.f32.mrb[12].mxu0  ;;  %1607 = vst [vmem:[%s2522_s20 + $0x88] sm:$0xff] %v1889_v46  ;;  %v1893_v51 = vpack.c.bf16 %v1377_v47, %v1376_v44  ;;  %v1179_v53 = vpop.f32.mrb[12].mxu1 }
 0x159   : > { %v1107_v52 = vadd.f32 %v1106_v50, %v2500_v55  ;;  %v1108_v54 = vpop.f32.mrb[13].mxu0  ;;  %v1180_v57 = vadd.f32 %v1179_v53, %v2503_v21  ;;  %v1181_v59 = vpop.f32.mrb[13].mxu1 }
 0x15a   : > { %1610 = vst [vmem:[%s2522_s20 + $0xa0] sm:$0xff] %v1892_v49  ;;  %v1109_v58 = vadd.f32 %v1108_v54, %v2506_v3  ;;  %v1110_v60 = vpop.f32.mrb[14].mxu0  ;;  %1611 = vst [vmem:[%s2522_s20 + $0xa8] sm:$0xff] %v1893_v51  ;;  %v1182_v62 = vadd.f32 %v1181_v59, %v2509_v22  ;;  %v1183_v0 = vpop.f32.mrb[14].mxu1 }
 0x15b   : > { %v1382_v61 = vmax.f32 %v1107_v52, 0.0  ;;  %v1111_v63 = vadd.f32 %v1110_v60, %v2500_v55  ;;  %v1112_v1 = vpop.f32.mrb[15].mxu0  ;;  %v1384_v2 = vmax.f32 %v1180_v57, 0.0  ;;  %v1184_v5 = vadd.f32 %v1183_v0, %v2503_v21  ;;  %v1185_v7 = vpop.f32.mrb[15].mxu1 }
 0x15c   : > { %v1383_v4 = vmax.f32 %v1109_v58, 0.0  ;;  %v1113_v6 = vadd.f32 %v1112_v1, %v2506_v3  ;;  %v1385_v8 = vmax.f32 %v1182_v62, 0.0  ;;  %v1186_v11 = vadd.f32 %v1185_v7, %v2509_v22 }
 0x15d   : > { %v1390_v9 = vmax.f32 %v1111_v63, 0.0  ;;  %v1392_v13 = vmax.f32 %v1184_v5, 0.0  ;;  %v340_v21 = vsub.s32 4, %v2491_v19  ;;  %v348_v3 = vsub.s32 6, %v2491_v19 }
 0x15e   : > { %v1896_v12 = vpack.c.bf16 %v1383_v4, %v1382_v61  ;;  %v1391_v55 = vmax.f32 %v1113_v6, 0.0  ;;  %v1897_v14 = vpack.c.bf16 %v1385_v8, %v1384_v2  ;;  %v1393_v15 = vmax.f32 %v1186_v11, 0.0 }
 0x15f   : > { %v2570_v22 = vrot.slane %v2494_v18, %v340_v21  ;;  %v2573_v37 = vrot.slane %v2494_v18, %v348_v3 }
 0x160   : > { %1614 = vst [vmem:[%s2522_s20 + $0xc0] sm:$0xff] %v1896_v12  ;;  %v1900_v16 = vpack.c.bf16 %v1391_v55, %v1390_v9  ;;  %1615 = vst [vmem:[%s2522_s20 + $0xc8] sm:$0xff] %v1897_v14  ;;  %v1901_v17 = vpack.c.bf16 %v1393_v15, %v1392_v13 }
 0x162   : > { %1618 = vst [vmem:[%s2522_s20 + $0xe0] sm:$0xff] %v1900_v16  ;;  %1619 = vst [vmem:[%s2522_s20 + $0xe8] sm:$0xff] %v1901_v17 }
 0x180   : > { %v1222_v23 = vpop.f32.mrb[16].mxu0  ;;  %v1295_v25 = vpop.f32.mrb[16].mxu1 }
 0x181   : > { %v1223_v24 = vadd.f32 %v1222_v23, %v2570_v22  ;;  %v1224_v26 = vpop.f32.mrb[17].mxu0  ;;  %v1296_v27 = vadd.f32 %v1295_v25, %v2573_v37  ;;  %v1297_v56 = vpop.f32.mrb[17].mxu1 }
 0x182   : > { %v1225_v19 = vadd.f32 %v1224_v26, %v2576_v48  ;;  %v1226_v28 = vpop.f32.mrb[18].mxu0  ;;  %v1298_v31 = vadd.f32 %v1297_v56, %v2579_v20  ;;  %v1299_v33 = vpop.f32.mrb[18].mxu1 }
 0x183   : > { %v1338_v29 = vmax.f32 %v1223_v24, 0.0  ;;  %v1227_v32 = vadd.f32 %v1226_v28, %v2570_v22  ;;  %v1228_v18 = vpop.f32.mrb[19].mxu0  ;;  %v1340_v34 = vmax.f32 %v1296_v27, 0.0  ;;  %v1300_v36 = vadd.f32 %v1299_v33, %v2573_v37  ;;  %v1301_v39 = vpop.f32.mrb[19].mxu1 }
 0x184   : > { %v1339_v35 = vmax.f32 %v1225_v19, 0.0  ;;  %v1229_v38 = vadd.f32 %v1228_v18, %v2576_v48  ;;  %v1341_v40 = vmax.f32 %v1298_v31, 0.0  ;;  %v1302_v42 = vadd.f32 %v1301_v39, %v2579_v20 }
 0x185   : > { %v1346_v41 = vmax.f32 %v1227_v32, 0.0  ;;  %v1348_v44 = vmax.f32 %v1300_v36, 0.0 }
 0x186   : > { %v1874_v43 = vpack.c.bf16 %v1339_v35, %v1338_v29  ;;  %v1347_v45 = vmax.f32 %v1229_v38, 0.0  ;;  %v1875_v46 = vpack.c.bf16 %v1341_v40, %v1340_v34  ;;  %v1349_v47 = vmax.f32 %v1302_v42, 0.0 }
 0x188   : > { %1592 = vst [vmem:[%s2522_s20 + $0x10] sm:$0xff] %v1874_v43  ;;  %v1878_v49 = vpack.c.bf16 %v1347_v45, %v1346_v41  ;;  %v1232_v50 = vpop.f32.mrb[20].mxu0  ;;  %1593 = vst [vmem:[%s2522_s20 + $0x18] sm:$0xff] %v1875_v46  ;;  %v1879_v51 = vpack.c.bf16 %v1349_v47, %v1348_v44  ;;  %v1305_v53 = vpop.f32.mrb[20].mxu1 }
 0x189   : > { %v1233_v52 = vadd.f32 %v1232_v50, %v2570_v22  ;;  %v1234_v54 = vpop.f32.mrb[21].mxu0  ;;  %v1306_v57 = vadd.f32 %v1305_v53, %v2573_v37  ;;  %v1307_v59 = vpop.f32.mrb[21].mxu1 }
 0x18a   : > { %1596 = vst [vmem:[%s2522_s20 + $0x30] sm:$0xff] %v1878_v49  ;;  %v1235_v58 = vadd.f32 %v1234_v54, %v2576_v48  ;;  %v1236_v60 = vpop.f32.mrb[22].mxu0  ;;  %1597 = vst [vmem:[%s2522_s20 + $0x38] sm:$0xff] %v1879_v51  ;;  %v1308_v62 = vadd.f32 %v1307_v59, %v2579_v20  ;;  %v1309_v0 = vpop.f32.mrb[22].mxu1 }
 0x18b   : > { %v1354_v61 = vmax.f32 %v1233_v52, 0.0  ;;  %v1237_v63 = vadd.f32 %v1236_v60, %v2570_v22  ;;  %v1238_v1 = vpop.f32.mrb[23].mxu0  ;;  %v1356_v2 = vmax.f32 %v1306_v57, 0.0  ;;  %v1310_v5 = vadd.f32 %v1309_v0, %v2573_v37  ;;  %v1311_v7 = vpop.f32.mrb[23].mxu1 }
 0x18c   : > { %v1355_v4 = vmax.f32 %v1235_v58, 0.0  ;;  %v1239_v6 = vadd.f32 %v1238_v1, %v2576_v48  ;;  %v1357_v8 = vmax.f32 %v1308_v62, 0.0  ;;  %v1312_v11 = vadd.f32 %v1311_v7, %v2579_v20 }
 0x18d   : > { %v1362_v9 = vmax.f32 %v1237_v63, 0.0  ;;  %v1364_v13 = vmax.f32 %v1310_v5, 0.0 }
 0x18e   : > { %v1882_v12 = vpack.c.bf16 %v1355_v4, %v1354_v61  ;;  %v1363_v55 = vmax.f32 %v1239_v6, 0.0  ;;  %v1883_v14 = vpack.c.bf16 %v1357_v8, %v1356_v2  ;;  %v1365_v15 = vmax.f32 %v1312_v11, 0.0 }
 0x190   : > { %1600 = vst [vmem:[%s2522_s20 + $0x50] sm:$0xff] %v1882_v12  ;;  %v1886_v16 = vpack.c.bf16 %v1363_v55, %v1362_v9  ;;  %v1242_v17 = vpop.f32.mrb[24].mxu0  ;;  %1601 = vst [vmem:[%s2522_s20 + $0x58] sm:$0xff] %v1883_v14  ;;  %v1887_v21 = vpack.c.bf16 %v1365_v15, %v1364_v13  ;;  %v1315_v10 = vpop.f32.mrb[24].mxu1 }
 0x191   : > { %v1243_v3 = vadd.f32 %v1242_v17, %v2570_v22  ;;  %v1244_v30 = vpop.f32.mrb[25].mxu0  ;;  %v1316_v23 = vadd.f32 %v1315_v10, %v2573_v37  ;;  %v1317_v25 = vpop.f32.mrb[25].mxu1 }
 0x192   : > { %1604 = vst [vmem:[%s2522_s20 + $0x70] sm:$0xff] %v1886_v16  ;;  %v1245_v24 = vadd.f32 %v1244_v30, %v2576_v48  ;;  %v1246_v26 = vpop.f32.mrb[26].mxu0  ;;  %1605 = vst [vmem:[%s2522_s20 + $0x78] sm:$0xff] %v1887_v21  ;;  %v1318_v19 = vadd.f32 %v1317_v25, %v2579_v20  ;;  %v1319_v28 = vpop.f32.mrb[26].mxu1 }
 0x193   : > { %v1370_v27 = vmax.f32 %v1243_v3, 0.0  ;;  %v1247_v56 = vadd.f32 %v1246_v26, %v2570_v22  ;;  %v1248_v29 = vpop.f32.mrb[27].mxu0  ;;  %v1372_v31 = vmax.f32 %v1316_v23, 0.0  ;;  %v1320_v33 = vadd.f32 %v1319_v28, %v2573_v37  ;;  %v1321_v34 = vpop.f32.mrb[27].mxu1 }
 0x194   : > { %v1371_v32 = vmax.f32 %v1245_v24, 0.0  ;;  %v1249_v18 = vadd.f32 %v1248_v29, %v2576_v48  ;;  %v1373_v35 = vmax.f32 %v1318_v19, 0.0  ;;  %v1322_v38 = vadd.f32 %v1321_v34, %v2579_v20 }
 0x195   : > { %v1378_v36 = vmax.f32 %v1247_v56, 0.0  ;;  %v1380_v40 = vmax.f32 %v1320_v33, 0.0 }
 0x196   : > { %v1890_v39 = vpack.c.bf16 %v1371_v32, %v1370_v27  ;;  %v1379_v41 = vmax.f32 %v1249_v18, 0.0  ;;  %v1891_v42 = vpack.c.bf16 %v1373_v35, %v1372_v31  ;;  %v1381_v43 = vmax.f32 %v1322_v38, 0.0 }
 0x198   : > { %1608 = vst [vmem:[%s2522_s20 + $0x90] sm:$0xff] %v1890_v39  ;;  %v1894_v44 = vpack.c.bf16 %v1379_v41, %v1378_v36  ;;  %v1252_v45 = vpop.f32.mrb[28].mxu0  ;;  %1609 = vst [vmem:[%s2522_s20 + $0x98] sm:$0xff] %v1891_v42  ;;  %v1895_v46 = vpack.c.bf16 %v1381_v43, %v1380_v40  ;;  %v1325_v49 = vpop.f32.mrb[28].mxu1 }
 0x199   : > { %v1253_v47 = vadd.f32 %v1252_v45, %v2570_v22  ;;  %v1254_v50 = vpop.f32.mrb[29].mxu0  ;;  %v1326_v51 = vadd.f32 %v1325_v49, %v2573_v37  ;;  %v1327_v53 = vpop.f32.mrb[29].mxu1 }
 0x19a   : > { %1612 = vst [vmem:[%s2522_s20 + $0xb0] sm:$0xff] %v1894_v44  ;;  %v1255_v52 = vadd.f32 %v1254_v50, %v2576_v48  ;;  %v1256_v54 = vpop.f32.mrb[30].mxu0  ;;  %1613 = vst [vmem:[%s2522_s20 + $0xb8] sm:$0xff] %v1895_v46  ;;  %v1328_v58 = vadd.f32 %v1327_v53, %v2579_v20  ;;  %v1329_v60 = vpop.f32.mrb[30].mxu1 }
 0x19b   : > { %v1386_v57 = vmax.f32 %v1253_v47, 0.0  ;;  %v1257_v59 = vadd.f32 %v1256_v54, %v2570_v22  ;;  %v1258_v61 = vpop.f32.mrb[31].mxu0  ;;  %v1388_v62 = vmax.f32 %v1326_v51, 0.0  ;;  %v1330_v0 = vadd.f32 %v1329_v60, %v2573_v37  ;;  %v1331_v2 = vpop.f32.mrb[31].mxu1 }
 0x19c   : > { %v1387_v63 = vmax.f32 %v1255_v52, 0.0  ;;  %v1259_v1 = vadd.f32 %v1258_v61, %v2576_v48  ;;  %v1389_v4 = vmax.f32 %v1328_v58, 0.0  ;;  %v1332_v6 = vadd.f32 %v1331_v2, %v2579_v20 }
 0x19d   : > { %v1394_v5 = vmax.f32 %v1257_v59, 0.0  ;;  %v1396_v8 = vmax.f32 %v1330_v0, 0.0 }
 0x19e   : > { %v1898_v7 = vpack.c.bf16 %v1387_v63, %v1386_v57  ;;  %v1395_v22 = vmax.f32 %v1259_v1, 0.0  ;;  %v1899_v9 = vpack.c.bf16 %v1389_v4, %v1388_v62  ;;  %v1397_v11 = vmax.f32 %v1332_v6, 0.0 }
 0x1a0   : > { %1616 = vst [vmem:[%s2522_s20 + $0xd0] sm:$0xff] %v1898_v7  ;;  %v1902_v12 = vpack.c.bf16 %v1395_v22, %v1394_v5  ;;  %1617 = vst [vmem:[%s2522_s20 + $0xd8] sm:$0xff] %v1899_v9  ;;  %v1903_v13 = vpack.c.bf16 %v1397_v11, %v1396_v8 }
 0x1a2   : > { %1620 = vst [vmem:[%s2522_s20 + $0xf0] sm:$0xff] %v1902_v12  ;;  %1621 = vst [vmem:[%s2522_s20 + $0xf8] sm:$0xff] %v1903_v13 }
 0x1a3 PF: > { %s14_s12 = sadd.s32 1, %s1973_s12  }
 0x1a4   : > { %p11_p3 = scmp.ge.s32.totalorder %s14_s12, 4  }
 0x1a6   :  { %13 = sbr.rel (!%p11_p3) target bundleno = 1 (0x1), region = 67 }
 0x1ad   :  { %1643 = vsyncpa [#allocation3], 1 }
 0x1ae   :  { %1645 = vsyncpa [#allocation3 + $0x1], 1 }

// kernel: encoder_forward.4
= control target key start
LH: loop header
LB: loop body
LE: loop exit
PB: predicated region body
PF: predicated region fallthrough
CT: control target
= control target key end

     0   :  { %s3325_s12 = smov 0   ;;  %s3814_s0 = inlined_call_operand.vmem [shape: bf16[4,272,256], index: 0, kind: input, shape index: {}]   ;;  %s3815_s1 = inlined_call_operand.vmem [shape: bf16[2,256,32], index: 1, kind: input, shape index: {}]   ;;  %s3816_s2 = inlined_call_operand.vmem [shape: f32[1,32], index: 2, kind: input, shape index: {}]   ;;  %s3817_s3 = inlined_call_operand.vmem [shape: bf16[4,256,32], index: 3, kind: output, shape index: {}]  }
   0x1 LB: > { %s2268_s13 = sadd.s32 4294967295, %s3303_s12   ;;  %p2272_p0 = scmp.ge.s32.totalorder %s3303_s12, 1  ;;  %s3303_s12 = sphi %s3325_s12, %s13_s12  }
   0x2   : > { %p139_p1 = scmp.lt.s32.totalorder %s3303_s12, 3 }
   0x4   : > { %p140_p2 = pnand %p2272_p0, %p139_p1 }
   0x5   : > { %v3130_v0 = vld [vmem:[%s3815_s1 + $0xc0] sm:$0xff] (!%p140_p2)   ;;  %v3134_v4 = vld [vmem:[%s3815_s1 + $0xc8] sm:$0xff] (!%p140_p2)   ;;  %v3138_v8 = vld [vmem:[%s3815_s1 + $0xd0] sm:$0xff] (!%p140_p2)   ;;  %s2273_s19 = sshll.u32 (!%p140_p2), %s2268_s13, 1  ;;  %vm1162_vm0 = vcmask (!%p140_p2), 257024  }
   0x6   : > { %143 = sbr.rel (%p140_p2) target bundleno = 514 (0x202), region = 32  ;;  %v3131_v1 = vld [vmem:[%s3815_s1 + $0x40] sm:$0xff] (!%p140_p2)   ;;  %2673 = vmatprep.subr.bf16.mxu0 (!%p140_p2), %v3130_v0  ;;  %v3135_v5 = vld [vmem:[%s3815_s1 + $0x48] sm:$0xff] (!%p140_p2)   ;;  %v3139_v9 = vld [vmem:[%s3815_s1 + $0x50] sm:$0xff] (!%p140_p2)   ;;  %p166_p3 = scmp.lt.s32.totalorder (!%p140_p2), %s2273_s19, 3 }
   0x7   : > { %v3132_v2 = vld [vmem:[%s3815_s1 + $0x80] sm:$0xff] (!%p140_p2)   ;;  %2785 = vmatprep.subr.bf16.mxu1 (!%p140_p2), %v3131_v1  ;;  %v3136_v6 = vld [vmem:[%s3815_s1 + $0x88] sm:$0xff] (!%p140_p2)   ;;  %v3140_v10 = vld [vmem:[%s3815_s1 + $0x90] sm:$0xff] (!%p140_p2)  }
   0x8   : > { %v3133_v3 = vld [vmem:[%s3815_s1] sm:$0xff] (!%p140_p2)   ;;  %2674 = vmatpush3.bf16.msra.mxu0 (!%p140_p2), %v3132_v2  ;;  %v3137_v7 = vld [vmem:[%s3815_s1 + $0x8] sm:$0xff] (!%p140_p2)   ;;  %v3141_v11 = vld [vmem:[%s3815_s1 + $0x10] sm:$0xff] (!%p140_p2)  }
   0x9   : > { %2786 = vmatpush3.bf16.msra.mxu1 (!%p140_p2), %v3133_v3  ;;  %2675 = vmatprep.subr.bf16.mxu0 (!%p140_p2), %v3134_v4  ;;  %v3142_v12 = vld [vmem:[%s3815_s1 + $0xd8] sm:$0xff] (!%p140_p2)   ;;  %v3146_v16 = vld [vmem:[%s3815_s1 + $0xe0] sm:$0xff] (!%p140_p2)   ;;  %v3150_v20 = vld [vmem:[%s3815_s1 + $0xe8] sm:$0xff] (!%p140_p2)  }
   0xa   : > { %2787 = vmatprep.subr.bf16.mxu1 (!%p140_p2), %v3135_v5  ;;  %v3143_v13 = vld [vmem:[%s3815_s1 + $0x58] sm:$0xff] (!%p140_p2)   ;;  %v3147_v17 = vld [vmem:[%s3815_s1 + $0x60] sm:$0xff] (!%p140_p2)   ;;  %v3151_v21 = vld [vmem:[%s3815_s1 + $0x68] sm:$0xff] (!%p140_p2)  }
   0xb   : > { %v3144_v14 = vld [vmem:[%s3815_s1 + $0x98] sm:$0xff] (!%p140_p2)   ;;  %v3148_v18 = vld [vmem:[%s3815_s1 + $0xa0] sm:$0xff] (!%p140_p2)   ;;  %v3152_v22 = vld [vmem:[%s3815_s1 + $0xa8] sm:$0xff] (!%p140_p2)  }
   0xc   : > { %2676 = vmatpush3.bf16.msra.mxu0 (!%p140_p2), %v3136_v6  ;;  %v3145_v15 = vld [vmem:[%s3815_s1 + $0x18] sm:$0xff] (!%p140_p2)   ;;  %v3149_v19 = vld [vmem:[%s3815_s1 + $0x20] sm:$0xff] (!%p140_p2)   ;;  %v3153_v23 = vld [vmem:[%s3815_s1 + $0x28] sm:$0xff] (!%p140_p2)  }
   0xd   : > { %2788 = vmatpush3.bf16.msra.mxu1 %v3137_v7  ;;  %2677 = vmatprep.subr.bf16.mxu0 %v3138_v8  ;;  %s3819_s19 = smov (!%p166_p3, %s2273_s19), 3  ;;  %v3154_v24 = vld [vmem:[%s3815_s1 + $0xf0] sm:$0xff]   ;;  %v3158_v28 = vld [vmem:[%s3815_s1 + $0xf8] sm:$0xff]   ;;  %v3168_v36 = vld [vmem:[%s3815_s1 + $0xc0] sm:$0xff]  }
   0xe   : > { %2789 = vmatprep.subr.bf16.mxu1 %v3139_v9  ;;  %v3155_v25 = vld [vmem:[%s3815_s1 + $0x70] sm:$0xff]   ;;  %s3121_s16 = smul.u32 272, %s3819_s19  ;;  %v3159_v29 = vld [vmem:[%s3815_s1 + $0x78] sm:$0xff]   ;;  %v3169_v37 = vld [vmem:[%s3815_s1 + $0x40] sm:$0xff]   ;;  %s2608_s26 = sshll.u32 %s3819_s19, 7 }
   0xf   : > { %v3156_v26 = vld [vmem:[%s3815_s1 + $0xb0] sm:$0xff]   ;;  %v3160_v30 = vld [vmem:[%s3815_s1 + $0xb8] sm:$0xff]   ;;  %v3170_v38 = vld [vmem:[%s3815_s1 + $0x80] sm:$0xff]   ;;  %s3608_s29 = scalar_lea.vmem %s3817_s3, %s2608_s26 }
  0x10   : > { %2678 = vmatpush3.bf16.msra.mxu0 %v3140_v10  ;;  %v3157_v27 = vld [vmem:[%s3815_s1 + $0x30] sm:$0xff]   ;;  %s3431_s13 = scalar_lea.vmem %s3814_s0, %s3121_s16  ;;  %v3161_v31 = vld [vmem:[%s3815_s1 + $0x38] sm:$0xff]   ;;  %v3171_v39 = vld [vmem:[%s3815_s1] sm:$0xff]  }
  0x11   : > { %2790 = vmatpush3.bf16.msra.mxu1 %v3141_v11  ;;  %2679 = vmatprep.subr.bf16.mxu0 %v3142_v12  ;;  %v3162_v32 = vld [vmem:[%s3431_s13 + $0x10] ss:$8 sps:$4 sm:$0xff]   ;;  %v3164_v33 = vld [vmem:[%s3431_s13 + $0x14] ss:$8 sps:$4 sm:$0xff]   ;;  %v3165_v34 = vld [vmem:[%s3431_s13] ss:$8 sps:$4 sm:$0xff]  }
  0x12   : > { %2791 = vmatprep.subr.bf16.mxu1 %v3143_v13  ;;  %v3167_v35 = vld [vmem:[%s3431_s13 + $0x4] ss:$8 sps:$4 sm:$0xff]   ;;  %567 = vmatprep.mubr.bf16.mxu0 %v3164_v33  ;;  %v3174_v41 = vld [vmem:[%s3431_s13 + $0x20] ss:$8 sps:$4 sm:$0xff]   ;;  %v3175_v42 = vld [vmem:[%s3431_s13 + $0x34] ss:$8 sps:$4 sm:$0xff]  }
  0x13   : > { %834 = vmatprep.mubr.bf16.mxu1 %v3167_v35  ;;  %v3172_v40 = vld [vmem:[%s3431_s13 + $0x24] ss:$8 sps:$4 sm:$0xff]   ;;  %v3177_v47 = vld [vmem:[%s3431_s13 + $0x30] ss:$8 sps:$4 sm:$0xff]   ;;  %v3184_v53 = vld [vmem:[%s3431_s13 + $0x40] ss:$8 sps:$4 sm:$0xff]  }
  0x14   : > { %2680 = vmatpush3.bf16.msra.mxu0 %v3144_v14  ;;  %v3178_v43 = vld [vmem:[%s3815_s1 + $0xc8] sm:$0xff]   ;;  %v3188_v49 = vld [vmem:[%s3815_s1 + $0xd0] sm:$0xff]   ;;  %v3198_v55 = vld [vmem:[%s3815_s1 + $0xd8] sm:$0xff]  }
  0x15   : > { %2792 = vmatpush3.bf16.msra.mxu1 %v3145_v15  ;;  %2681 = vmatprep.subr.bf16.mxu0 %v3146_v16  ;;  %v3179_v44 = vld [vmem:[%s3815_s1 + $0x48] sm:$0xff]   ;;  %v3189_v50 = vld [vmem:[%s3815_s1 + $0x50] sm:$0xff]   ;;  %v3199_v56 = vld [vmem:[%s3815_s1 + $0x58] sm:$0xff]  }
  0x16   : > { %2793 = vmatprep.subr.bf16.mxu1 %v3147_v17  ;;  %v3180_v45 = vld [vmem:[%s3815_s1 + $0x88] sm:$0xff]   ;;  %v3190_v51 = vld [vmem:[%s3815_s1 + $0x90] sm:$0xff]   ;;  %v3200_v57 = vld [vmem:[%s3815_s1 + $0x98] sm:$0xff]  }
  0x17   : > { %v3181_v46 = vld [vmem:[%s3815_s1 + $0x8] sm:$0xff]   ;;  %v3191_v52 = vld [vmem:[%s3815_s1 + $0x10] sm:$0xff]   ;;  %v3201_v58 = vld [vmem:[%s3815_s1 + $0x18] sm:$0xff]  }
  0x18   : > { %2682 = vmatpush3.bf16.msra.mxu0 %v3148_v18  ;;  %v3182_v48 = vld [vmem:[%s3431_s13 + $0x44] ss:$8 sps:$4 sm:$0xff]   ;;  %v3185_v54 = vld [vmem:[%s3431_s13 + $0x54] ss:$8 sps:$4 sm:$0xff]   ;;  %v3187_v59 = vld [vmem:[%s3431_s13 + $0x50] ss:$8 sps:$4 sm:$0xff]  }
  0x19   : > { %2794 = vmatpush3.bf16.msra.mxu1 %v3149_v19  ;;  %2683 = vmatprep.subr.bf16.mxu0 %v3150_v20  ;;  %v3208_v60 = vld [vmem:[%s3815_s1 + $0xe0] sm:$0xff]   ;;  %v3218_v1 = vld [vmem:[%s3815_s1 + $0xe8] sm:$0xff]   ;;  %v3195_v6 = vld [vmem:[%s3431_s13 + $0x74] ss:$8 sps:$4 sm:$0xff]  }
  0x1a   : > { %2795 = vmatprep.subr.bf16.mxu1 %v3151_v21  ;;  %v3192_v61 = vld [vmem:[%s3431_s13 + $0x64] ss:$8 sps:$4 sm:$0xff]   ;;  %v3194_v5 = vld [vmem:[%s3431_s13 + $0x60] ss:$8 sps:$4 sm:$0xff]   ;;  %v3228_v7 = vld [vmem:[%s3815_s1 + $0xf0] sm:$0xff]  }
  0x1b   : > { %v3209_v62 = vld [vmem:[%s3815_s1 + $0x60] sm:$0xff]   ;;  %v3219_v2 = vld [vmem:[%s3815_s1 + $0x68] sm:$0xff]   ;;  %v3229_v8 = vld [vmem:[%s3815_s1 + $0x70] sm:$0xff]  }
  0x1c   : > { %2684 = vmatpush3.bf16.msra.mxu0 %v3152_v22  ;;  %v3210_v63 = vld [vmem:[%s3815_s1 + $0xa0] sm:$0xff]   ;;  %v3220_v3 = vld [vmem:[%s3815_s1 + $0xa8] sm:$0xff]   ;;  %v3230_v9 = vld [vmem:[%s3815_s1 + $0xb0] sm:$0xff]  }
  0x1d   : > { %2796 = vmatpush3.bf16.msra.mxu1 %v3153_v23  ;;  %2685 = vmatprep.subr.bf16.mxu0 %v3154_v24  ;;  %v3211_v0 = vld [vmem:[%s3815_s1 + $0x20] sm:$0xff]   ;;  %v3221_v4 = vld [vmem:[%s3815_s1 + $0x28] sm:$0xff]   ;;  %v3231_v10 = vld [vmem:[%s3815_s1 + $0x30] sm:$0xff]  }
  0x1e   : > { %2797 = vmatprep.subr.bf16.mxu1 %v3155_v25  ;;  %v3197_v11 = vld [vmem:[%s3431_s13 + $0x70] ss:$8 sps:$4 sm:$0xff]   ;;  %v3202_v12 = vld [vmem:[%s3431_s13 + $0x84] ss:$8 sps:$4 sm:$0xff]   ;;  %v3204_v17 = vld [vmem:[%s3431_s13 + $0x80] ss:$8 sps:$4 sm:$0xff]  }
  0x1f   : > { %v3238_v13 = vld [vmem:[%s3815_s1 + $0xf8] sm:$0xff]   ;;  %v3212_v20 = vld [vmem:[%s3431_s13 + $0xa4] ss:$8 sps:$4 sm:$0xff]   ;;  %v3214_v21 = vld [vmem:[%s3431_s13 + $0xa0] ss:$8 sps:$4 sm:$0xff]  }
  0x20   : > { %2686 = vmatpush3.bf16.msra.mxu0 %v3156_v26  ;;  %v3239_v14 = vld [vmem:[%s3815_s1 + $0x78] sm:$0xff]   ;;  %v3222_v24 = vld [vmem:[%s3431_s13 + $0xc4] ss:$8 sps:$4 sm:$0xff]   ;;  %v3224_v25 = vld [vmem:[%s3431_s13 + $0xc0] ss:$8 sps:$4 sm:$0xff]  }
  0x21   : > { %2798 = vmatpush3.bf16.msra.mxu1 %v3157_v27  ;;  %2687 = vmatprep.subr.bf16.mxu0 %v3158_v28  ;;  %v3240_v15 = vld [vmem:[%s3815_s1 + $0xb8] sm:$0xff]   ;;  %v3232_v28 = vld [vmem:[%s3431_s13 + $0xe4] ss:$8 sps:$4 sm:$0xff]  }
  0x22   : > { %2799 = vmatprep.subr.bf16.mxu1 %v3159_v29  ;;  %v3241_v16 = vld [vmem:[%s3815_s1 + $0x38] sm:$0xff]   ;;  %v3234_v29 = vld [vmem:[%s3431_s13 + $0xe0] ss:$8 sps:$4 sm:$0xff]  }
  0x23   : > { %v3205_v18 = vld [vmem:[%s3431_s13 + $0x94] ss:$8 sps:$4 sm:$0xff]   ;;  %v3207_v19 = vld [vmem:[%s3431_s13 + $0x90] ss:$8 sps:$4 sm:$0xff]  }
  0x24   : > { %2688 = vmatpush3.bf16.msra.mxu0 %v3160_v30  ;;  %v3215_v22 = vld [vmem:[%s3431_s13 + $0xb4] ss:$8 sps:$4 sm:$0xff]   ;;  %v3217_v23 = vld [vmem:[%s3431_s13 + $0xb0] ss:$8 sps:$4 sm:$0xff]  }
  0x25   : > { %2800 = vmatpush3.bf16.msra.mxu1 %v3161_v31  ;;  %2897 = vmatprep.subr.bf16.mxu0 %v3168_v36  ;;  %v3225_v26 = vld [vmem:[%s3431_s13 + $0xd4] ss:$8 sps:$4 sm:$0xff]   ;;  %v3227_v27 = vld [vmem:[%s3431_s13 + $0xd0] ss:$8 sps:$4 sm:$0xff]   ;;  %v3245_v36 = vld [vmem:[%s3431_s13 + $0x120] ss:$8 sps:$4 sm:$0xff]  }
  0x26   : > { %3009 = vmatprep.subr.bf16.mxu1 %v3169_v37  ;;  %v3235_v30 = vld [vmem:[%s3431_s13 + $0xf4] ss:$8 sps:$4 sm:$0xff]   ;;  %v3237_v31 = vld [vmem:[%s3431_s13 + $0xf0] ss:$8 sps:$4 sm:$0xff]  }
  0x27   : > { %568 = vmatmul.mubr.bf16.vlgmr.msra.gmra.mrb[0].mxu0 %v3162_v32  ;;  %v3250_v35 = vld [vmem:[%s3431_s13 + $0x114] ss:$8 sps:$4 sm:$0xff]   ;;  %v3248_v37 = vld [vmem:[%s3431_s13 + $0x110] ss:$8 sps:$4 sm:$0xff]  }
  0x28   : > { %835 = vmatmul.mubr.bf16.vlgmr.msra.gmra.mrb[0].mxu1 %v3165_v34  ;;  %2898 = vmatpush3.bf16.msra.mxu0 %v3170_v38  ;;  %v3247_v34 = vld [vmem:[%s3431_s13 + $0x124] ss:$8 sps:$4 sm:$0xff]   ;;  %v3251_v38 = vld [vmem:[%s3431_s13 + $0x134] ss:$8 sps:$4 sm:$0xff]  }
  0x29   : > { %842 = vmatprep.mubr.bf16.mxu1 %v3164_v33  ;;  %3010 = vmatpush3.bf16.msra.mxu1 %v3171_v39  ;;  %v3244_v33 = vld [vmem:[%s3431_s13 + $0x100] ss:$8 sps:$4 sm:$0xff]   ;;  %v3253_v39 = vld [vmem:[%s3431_s13 + $0x130] ss:$8 sps:$4 sm:$0xff]  }
  0x2a   : > { %575 = vmatprep.mubr.bf16.mxu0 %v3172_v40  ;;  %2899 = vmatprep.subr.bf16.mxu0 %v3178_v43  ;;  %v3259_v43 = vld [vmem:[%s3431_s13 + $0x150] ss:$8 sps:$4 sm:$0xff]  }
  0x2b   : > { %3011 = vmatprep.subr.bf16.mxu1 %v3179_v44  ;;  %v3260_v44 = vld [vmem:[%s3431_s13 + $0x164] ss:$8 sps:$4 sm:$0xff]  }
  0x2c   : > { %2900 = vmatpush3.bf16.msra.mxu0 %v3180_v45  ;;  %v3262_v45 = vld [vmem:[%s3431_s13 + $0x160] ss:$8 sps:$4 sm:$0xff]  }
  0x2d   : > { %3012 = vmatpush3.bf16.msra.mxu1 %v3181_v46  ;;  %2901 = vmatprep.subr.bf16.mxu0 %v3188_v49  ;;  %v3263_v46 = vld [vmem:[%s3431_s13 + $0x174] ss:$8 sps:$4 sm:$0xff]   ;;  %v3268_v49 = vld [vmem:[%s3431_s13 + $0x180] ss:$8 sps:$4 sm:$0xff]  }
  0x2e   : > { %3013 = vmatprep.subr.bf16.mxu1 %v3189_v50  ;;  %v3269_v50 = vld [vmem:[%s3431_s13 + $0x194] ss:$8 sps:$4 sm:$0xff]  }
  0x2f   : > { %576 = vmatmul.mubr.bf16.gmra.mrb[4].mxu0 %v3174_v41 }
  0x30   : > { %843 = vmatmul.mubr.bf16.gmra.mrb[4].mxu1 %v3162_v32  ;;  %583 = vmatprep.mubr.bf16.mxu0 %v3175_v42  ;;  %v3242_v32 = vld [vmem:[%s3431_s13 + $0x104] ss:$8 sps:$4 sm:$0xff]  }
  0x31   : > { %850 = vmatprep.mubr.bf16.mxu1 %v3172_v40  ;;  %2902 = vmatpush3.bf16.msra.mxu0 %v3190_v51  ;;  %v3254_v40 = vld [vmem:[%s3431_s13 + $0x144] ss:$8 sps:$4 sm:$0xff]   ;;  %v3271_v51 = vld [vmem:[%s3431_s13 + $0x190] ss:$8 sps:$4 sm:$0xff]  }
  0x32   : > { %3014 = vmatpush3.bf16.msra.mxu1 %v3191_v52  ;;  %2903 = vmatprep.subr.bf16.mxu0 %v3198_v55  ;;  %v3272_v52 = vld [vmem:[%s3431_s13 + $0x1a4] ss:$8 sps:$4 sm:$0xff]   ;;  %v3277_v55 = vld [vmem:[%s3431_s13 + $0x1b0] ss:$8 sps:$4 sm:$0xff]  }
  0x33   : > { %3015 = vmatprep.subr.bf16.mxu1 %v3199_v56  ;;  %v3278_v56 = vld [vmem:[%s3431_s13 + $0x1c4] ss:$8 sps:$4 sm:$0xff]  }
  0x35   : > { %2904 = vmatpush3.bf16.msra.mxu0 %v3200_v57  ;;  %v3280_v57 = vld [vmem:[%s3431_s13 + $0x1c0] ss:$8 sps:$4 sm:$0xff]  }
  0x36   : > { %3016 = vmatpush3.bf16.msra.mxu1 %v3201_v58  ;;  %2905 = vmatprep.subr.bf16.mxu0 %v3208_v60  ;;  %v3281_v58 = vld [vmem:[%s3431_s13 + $0x1d4] ss:$8 sps:$4 sm:$0xff]  }
  0x37   : > { %584 = vmatmul.mubr.bf16.gmra.mrb[8].mxu0 %v3177_v47  ;;  %3017 = vmatprep.subr.bf16.mxu1 %v3209_v62  ;;  %v3283_v62 = vld [vmem:[%s3431_s13 + $0x1d0] ss:$8 sps:$4 sm:$0xff]  }
  0x38   : > { %851 = vmatmul.mubr.bf16.gmra.mrb[8].mxu1 %v3174_v41  ;;  %591 = vmatprep.mubr.bf16.mxu0 %v3182_v48  ;;  %v3256_v41 = vld [vmem:[%s3431_s13 + $0x140] ss:$8 sps:$4 sm:$0xff]  }
  0x39   : > { %858 = vmatprep.mubr.bf16.mxu1 %v3175_v42  ;;  %2906 = vmatpush3.bf16.msra.mxu0 %v3210_v63  ;;  %v3257_v42 = vld [vmem:[%s3431_s13 + $0x154] ss:$8 sps:$4 sm:$0xff]  }
  0x3a   : > { %3018 = vmatpush3.bf16.msra.mxu1 %v3211_v0  ;;  %2907 = vmatprep.subr.bf16.mxu0 %v3218_v1 }
  0x3b   : > { %3019 = vmatprep.subr.bf16.mxu1 %v3219_v2  ;;  %v3284_v2 = vld [vmem:[%s3431_s13 + $0x1e4] ss:$8 sps:$4 sm:$0xff]  }
  0x3d   : > { %2908 = vmatpush3.bf16.msra.mxu0 %v3220_v3 }
  0x3e   : > { %3020 = vmatpush3.bf16.msra.mxu1 %v3221_v4  ;;  %2909 = vmatprep.subr.bf16.mxu0 %v3228_v7 }
  0x3f   : > { %592 = vmatmul.mubr.bf16.gmra.mrb[12].mxu0 %v3184_v53  ;;  %3021 = vmatprep.subr.bf16.mxu1 %v3229_v8 }
  0x40   : > { %859 = vmatmul.mubr.bf16.gmra.mrb[12].mxu1 %v3177_v47  ;;  %599 = vmatprep.mubr.bf16.mxu0 %v3185_v54  ;;  %v3265_v47 = vld [vmem:[%s3431_s13 + $0x170] ss:$8 sps:$4 sm:$0xff]  }
  0x41   : > { %866 = vmatprep.mubr.bf16.mxu1 %v3182_v48  ;;  %2910 = vmatpush3.bf16.msra.mxu0 %v3230_v9  ;;  %v3266_v48 = vld [vmem:[%s3431_s13 + $0x184] ss:$8 sps:$4 sm:$0xff]  }
  0x42   : > { %3022 = vmatpush3.bf16.msra.mxu1 %v3231_v10  ;;  %2911 = vmatprep.subr.bf16.mxu0 %v3238_v13 }
  0x43   : > { %3023 = vmatprep.subr.bf16.mxu1 %v3239_v14 }
  0x45   : > { %2912 = vmatpush3.bf16.msra.mxu0 %v3240_v15 }
  0x46   : > { %3024 = vmatpush3.bf16.msra.mxu1 %v3241_v16 }
  0x47   : > { %600 = vmatmul.mubr.bf16.gmra.mrb[16].mxu0 %v3187_v59 }
  0x48   : > { %867 = vmatmul.mubr.bf16.gmra.mrb[16].mxu1 %v3184_v53  ;;  %607 = vmatprep.mubr.bf16.mxu0 %v3192_v61  ;;  %v3274_v53 = vld [vmem:[%s3431_s13 + $0x1a0] ss:$8 sps:$4 sm:$0xff]  }
  0x49   : > { %874 = vmatprep.mubr.bf16.mxu1 %v3185_v54  ;;  %v3275_v54 = vld [vmem:[%s3431_s13 + $0x1b4] ss:$8 sps:$4 sm:$0xff]  }
  0x4f   : > { %608 = vmatmul.mubr.bf16.gmra.mrb[20].mxu0 %v3194_v5 }
  0x50   : > { %875 = vmatmul.mubr.bf16.gmra.mrb[20].mxu1 %v3187_v59  ;;  %615 = vmatprep.mubr.bf16.mxu0 %v3195_v6 }
  0x51   : > { %882 = vmatprep.mubr.bf16.mxu1 %v3192_v61 }
  0x57   : > { %616 = vmatmul.mubr.bf16.gmra.mrb[24].mxu0 %v3197_v11 }
  0x58   : > { %883 = vmatmul.mubr.bf16.gmra.mrb[24].mxu1 %v3194_v5  ;;  %623 = vmatprep.mubr.bf16.mxu0 %v3202_v12 }
  0x59   : > { %890 = vmatprep.mubr.bf16.mxu1 %v3195_v6  ;;  %v3599_v6 = vld [vmem:[%s3816_s2] ss:$0 sm:$0xff] }
  0x5f   : > { %624 = vmatmul.mubr.bf16.gmra.mrb[28].mxu0 %v3204_v17 }
  0x60   : > { %891 = vmatmul.mubr.bf16.gmra.mrb[28].mxu1 %v3197_v11  ;;  %631 = vmatprep.mubr.bf16.mxu0 %v3205_v18 }
  0x61   : > { %898 = vmatprep.mubr.bf16.mxu1 %v3202_v12 }
  0x67   : > { %632 = vmatmul.mubr.bf16.gmra.mrb[32].mxu0 %v3207_v19 }
  0x68   : > { %899 = vmatmul.mubr.bf16.gmra.mrb[32].mxu1 %v3204_v17  ;;  %639 = vmatprep.mubr.bf16.mxu0 %v3212_v20 }
  0x69   : > { %906 = vmatprep.mubr.bf16.mxu1 %v3205_v18  ;;  %v3286_v18 = vld [vmem:[%s3431_s13 + $0x1e0] ss:$8 sps:$4 sm:$0xff]  }
  0x6f   : > { %640 = vmatmul.mubr.bf16.gmra.mrb[36].mxu0 %v3214_v21 }
  0x70   : > { %907 = vmatmul.mubr.bf16.gmra.mrb[36].mxu1 %v3207_v19  ;;  %647 = vmatprep.mubr.bf16.mxu0 %v3215_v22 }
  0x71   : > { %914 = vmatprep.mubr.bf16.mxu1 %v3212_v20 }
  0x77   : > { %648 = vmatmul.mubr.bf16.gmra.mrb[40].mxu0 %v3217_v23 }
  0x78   : > { %915 = vmatmul.mubr.bf16.gmra.mrb[40].mxu1 %v3214_v21  ;;  %655 = vmatprep.mubr.bf16.mxu0 %v3222_v24 }
  0x79   : > { %922 = vmatprep.mubr.bf16.mxu1 %v3215_v22  ;;  %v3287_v22 = vld [vmem:[%s3431_s13 + $0x1f4] ss:$8 sps:$4 sm:$0xff]  }
  0x7f   : > { %656 = vmatmul.mubr.bf16.gmra.mrb[44].mxu0 %v3224_v25 }
  0x80   : > { %923 = vmatmul.mubr.bf16.gmra.mrb[44].mxu1 %v3217_v23  ;;  %663 = vmatprep.mubr.bf16.mxu0 %v3225_v26 }
  0x81   : > { %930 = vmatprep.mubr.bf16.mxu1 %v3222_v24 }
  0x87   : > { %664 = vmatmul.mubr.bf16.gmra.mrb[48].mxu0 %v3227_v27 }
  0x88   : > { %931 = vmatmul.mubr.bf16.gmra.mrb[48].mxu1 %v3224_v25  ;;  %671 = vmatprep.mubr.bf16.mxu0 %v3232_v28 }
  0x89   : > { %938 = vmatprep.mubr.bf16.mxu1 %v3225_v26 }
  0x8f   : > { %672 = vmatmul.mubr.bf16.gmra.mrb[52].mxu0 %v3234_v29 }
  0x90   : > { %939 = vmatmul.mubr.bf16.gmra.mrb[52].mxu1 %v3227_v27  ;;  %679 = vmatprep.mubr.bf16.mxu0 %v3235_v30 }
  0x91   : > { %946 = vmatprep.mubr.bf16.mxu1 %v3232_v28 }
  0x97   : > { %680 = vmatmul.mubr.bf16.gmra.mrb[56].mxu0 %v3237_v31 }
  0x98   : > { %947 = vmatmul.mubr.bf16.gmra.mrb[56].mxu1 %v3234_v29  ;;  %687 = vmatprep.mubr.bf16.mxu0 %v3242_v32 }
  0x99   : > { %954 = vmatprep.mubr.bf16.mxu1 %v3235_v30 }
  0x9f   : > { %688 = vmatmul.mubr.bf16.gmra.mrb[60].mxu0 %v3244_v33 }
  0xa0   : > { %955 = vmatmul.mubr.bf16.gmra.mrb[60].mxu1 %v3237_v31  ;;  %1582 = vmatprep.mubr.bf16.mxu0 %v3247_v34 }
  0xa1   : > { %1849 = vmatprep.mubr.bf16.mxu1 %v3250_v35 }
  0xa7   : > { %1583 = vmatmul.mubr.bf16.vlgmr.msra.gmra.mrb[64].mxu0 %v3245_v36 }
  0xa8   : > { %1850 = vmatmul.mubr.bf16.vlgmr.msra.gmra.mrb[64].mxu1 %v3248_v37  ;;  %1590 = vmatprep.mubr.bf16.mxu0 %v3251_v38 }
  0xa9   : > { %1857 = vmatprep.mubr.bf16.mxu1 %v3247_v34 }
  0xaf   : > { %1591 = vmatmul.mubr.bf16.gmra.mrb[68].mxu0 %v3253_v39 }
  0xb0   : > { %1858 = vmatmul.mubr.bf16.gmra.mrb[68].mxu1 %v3245_v36  ;;  %1598 = vmatprep.mubr.bf16.mxu0 %v3254_v40 }
  0xb1   : > { %1865 = vmatprep.mubr.bf16.mxu1 %v3251_v38 }
  0xb7   : > { %1599 = vmatmul.mubr.bf16.gmra.mrb[72].mxu0 %v3256_v41 }
  0xb8   : > { %1866 = vmatmul.mubr.bf16.gmra.mrb[72].mxu1 %v3253_v39  ;;  %1606 = vmatprep.mubr.bf16.mxu0 %v3257_v42 }
  0xb9   : > { %1873 = vmatprep.mubr.bf16.mxu1 %v3254_v40  ;;  %v3289_v40 = vld [vmem:[%s3431_s13 + $0x1f0] ss:$8 sps:$4 sm:$0xff]  }
  0xbf   : > { %1607 = vmatmul.mubr.bf16.gmra.mrb[76].mxu0 %v3259_v43 }
  0xc0   : > { %1874 = vmatmul.mubr.bf16.gmra.mrb[76].mxu1 %v3256_v41  ;;  %1614 = vmatprep.mubr.bf16.mxu0 %v3260_v44 }
  0xc1   : > { %1881 = vmatprep.mubr.bf16.mxu1 %v3257_v42 }
  0xc7   : > { %1615 = vmatmul.mubr.bf16.gmra.mrb[80].mxu0 %v3262_v45 }
  0xc8   : > { %1882 = vmatmul.mubr.bf16.gmra.mrb[80].mxu1 %v3259_v43  ;;  %1622 = vmatprep.mubr.bf16.mxu0 %v3263_v46 }
  0xc9   : > { %1889 = vmatprep.mubr.bf16.mxu1 %v3260_v44  ;;  %v3290_v44 = vld [vmem:[%s3431_s13 + $0x204] ss:$8 sps:$4 sm:$0xff]  }
  0xcf   : > { %1623 = vmatmul.mubr.bf16.gmra.mrb[84].mxu0 %v3265_v47 }
  0xd0   : > { %1890 = vmatmul.mubr.bf16.gmra.mrb[84].mxu1 %v3262_v45  ;;  %1630 = vmatprep.mubr.bf16.mxu0 %v3266_v48 }
  0xd1   : > { %1897 = vmatprep.mubr.bf16.mxu1 %v3263_v46 }
  0xd7   : > { %1631 = vmatmul.mubr.bf16.gmra.mrb[88].mxu0 %v3268_v49 }
  0xd8   : > { %1898 = vmatmul.mubr.bf16.gmra.mrb[88].mxu1 %v3265_v47  ;;  %1638 = vmatprep.mubr.bf16.mxu0 %v3269_v50 }
  0xd9   : > { %1905 = vmatprep.mubr.bf16.mxu1 %v3266_v48 }
  0xdf   : > { %1639 = vmatmul.mubr.bf16.gmra.mrb[92].mxu0 %v3271_v51 }
  0xe0   : > { %1906 = vmatmul.mubr.bf16.gmra.mrb[92].mxu1 %v3268_v49  ;;  %1646 = vmatprep.mubr.bf16.mxu0 %v3272_v52 }
  0xe1   : > { %1913 = vmatprep.mubr.bf16.mxu1 %v3269_v50 }
  0xe7   : > { %1647 = vmatmul.mubr.bf16.gmra.mrb[96].mxu0 %v3274_v53 }
  0xe8   : > { %1914 = vmatmul.mubr.bf16.gmra.mrb[96].mxu1 %v3271_v51  ;;  %1654 = vmatprep.mubr.bf16.mxu0 %v3275_v54 }
  0xe9   : > { %1921 = vmatprep.mubr.bf16.mxu1 %v3272_v52 }
  0xef   : > { %1655 = vmatmul.mubr.bf16.gmra.mrb[100].mxu0 %v3277_v55 }
  0xf0   : > { %1922 = vmatmul.mubr.bf16.gmra.mrb[100].mxu1 %v3274_v53  ;;  %1662 = vmatprep.mubr.bf16.mxu0 %v3278_v56 }
  0xf1   : > { %1929 = vmatprep.mubr.bf16.mxu1 %v3275_v54 }
  0xf7   : > { %1663 = vmatmul.mubr.bf16.gmra.mrb[104].mxu0 %v3280_v57 }
  0xf8   : > { %1930 = vmatmul.mubr.bf16.gmra.mrb[104].mxu1 %v3277_v55  ;;  %1670 = vmatprep.mubr.bf16.mxu0 %v3281_v58 }
  0xf9   : > { %1937 = vmatprep.mubr.bf16.mxu1 %v3278_v56 }
  0xfa   : > { %v2689_v59 = vpop.f32.mrb[0].mxu0 }
  0xfb   : > { %v2801_v60 = vpop.f32.mrb[0].mxu1  ;;  %v2690_v61 = vpop.f32.mrb[1].mxu0 }
  0xfc   : > { %v2691_v63 = vadd.f32 %v2690_v61, %v2689_v59  ;;  %v2802_v0 = vpop.f32.mrb[1].mxu1  ;;  %v2692_v1 = vpop.f32.mrb[2].mxu0 }
  0xfd   : > { %v2803_v3 = vadd.f32 %v2802_v0, %v2801_v60  ;;  %v2804_v4 = vpop.f32.mrb[2].mxu1  ;;  %v2693_v5 = vpop.f32.mrb[3].mxu0 }
  0xfe   : > { %v2694_v7 = vadd.f32 %v2693_v5, %v2692_v1  ;;  %v2805_v8 = vpop.f32.mrb[3].mxu1 }
  0xff   : > { %v837_v9 = vadd.f32 %v2803_v3, %v2691_v63  ;;  %v2806_v10 = vadd.f32 %v2805_v8, %v2804_v4  ;;  %1671 = vmatmul.mubr.bf16.gmra.mrb[108].mxu0 %v3283_v62 }
 0x100   : > { %1938 = vmatmul.mubr.bf16.gmra.mrb[108].mxu1 %v3280_v57  ;;  %1678 = vmatprep.mubr.bf16.mxu0 %v3284_v2 }
 0x101   : > { %v970_v11 = vadd.f32 %v3599_v6, %v837_v9  ;;  %v840_v12 = vadd.f32 %v2806_v10, %v2694_v7  ;;  %1945 = vmatprep.mubr.bf16.mxu1 %v3281_v58 }
 0x102   : > { %v2695_v13 = vpop.f32.mrb[4].mxu0 }
 0x103   : > { %v1002_v14 = vmax.f32 %v970_v11, 0.0  ;;  %v971_v15 = vadd.f32 %v3599_v6, %v840_v12  ;;  %v2807_v16 = vpop.f32.mrb[4].mxu1  ;;  %v2696_v17 = vpop.f32.mrb[5].mxu0 }
 0x104   : > { %v2697_v19 = vadd.f32 %v2696_v17, %v2695_v13  ;;  %v2808_v20 = vpop.f32.mrb[5].mxu1  ;;  %v2698_v21 = vpop.f32.mrb[6].mxu0 }
 0x105   : > { %v2609_v23 = vpack.c.bf16 %v1002_v14, %v1002_v14  ;;  %v1003_v24 = vmax.f32 %v971_v15, 0.0  ;;  %v2809_v25 = vadd.f32 %v2808_v20, %v2807_v16  ;;  %v2810_v26 = vpop.f32.mrb[6].mxu1  ;;  %v2699_v27 = vpop.f32.mrb[7].mxu0 }
 0x106   : > { %v2700_v28 = vadd.f32 %v2699_v27, %v2698_v21  ;;  %v2811_v29 = vpop.f32.mrb[7].mxu1  ;;  %v3295_v21 = vld [vmem:[%s3431_s13 + $0x210] ss:$8 sps:$4 sm:$0xff]  }
 0x107   : > { %1163 = vst.msk [vmem:[%s3608_s29] sm:$0xf] %vm1162_vm0, %v2609_v23  ;;  %v2610_v30 = vpack.c.bf16 %v1003_v24, %v1003_v24  ;;  %v845_v31 = vadd.f32 %v2809_v25, %v2697_v19  ;;  %v2812_v32 = vadd.f32 %v2811_v29, %v2810_v26  ;;  %1679 = vmatmul.mubr.bf16.gmra.mrb[112].mxu0 %v3286_v18 }
 0x108   : > { %1946 = vmatmul.mubr.bf16.gmra.mrb[112].mxu1 %v3283_v62  ;;  %1686 = vmatprep.mubr.bf16.mxu0 %v3287_v22  ;;  %v3292_v62 = vld [vmem:[%s3431_s13 + $0x200] ss:$8 sps:$4 sm:$0xff]  }
 0x109   : > { %1164 = vst.msk [vmem:[%s3608_s29 + $0x4] sm:$0xf] %vm1162_vm0, %v2610_v30  ;;  %v972_v33 = vadd.f32 %v3599_v6, %v845_v31  ;;  %v848_v34 = vadd.f32 %v2812_v32, %v2700_v28  ;;  %1953 = vmatprep.mubr.bf16.mxu1 %v3284_v2  ;;  %v3293_v2 = vld [vmem:[%s3431_s13 + $0x214] ss:$8 sps:$4 sm:$0xff]  }
 0x10a   : > { %v2701_v35 = vpop.f32.mrb[8].mxu0 }
 0x10b   : > { %v1004_v36 = vmax.f32 %v972_v33, 0.0  ;;  %v973_v37 = vadd.f32 %v3599_v6, %v848_v34  ;;  %v2813_v38 = vpop.f32.mrb[8].mxu1  ;;  %v2702_v39 = vpop.f32.mrb[9].mxu0 }
 0x10c   : > { %v2703_v41 = vadd.f32 %v2702_v39, %v2701_v35  ;;  %v2814_v42 = vpop.f32.mrb[9].mxu1  ;;  %v2704_v43 = vpop.f32.mrb[10].mxu0 }
 0x10d   : > { %v2611_v45 = vpack.c.bf16 %v1004_v36, %v1004_v36  ;;  %v1005_v46 = vmax.f32 %v973_v37, 0.0  ;;  %v2815_v47 = vadd.f32 %v2814_v42, %v2813_v38  ;;  %v2816_v48 = vpop.f32.mrb[10].mxu1  ;;  %v2705_v49 = vpop.f32.mrb[11].mxu0 }
 0x10e   : > { %v2706_v50 = vadd.f32 %v2705_v49, %v2704_v43  ;;  %v2817_v51 = vpop.f32.mrb[11].mxu1 }
 0x10f   : > { %1165 = vst.msk [vmem:[%s3608_s29 + $0x8] sm:$0xf] %vm1162_vm0, %v2611_v45  ;;  %v2612_v52 = vpack.c.bf16 %v1005_v46, %v1005_v46  ;;  %v853_v53 = vadd.f32 %v2815_v47, %v2703_v41  ;;  %v2818_v54 = vadd.f32 %v2817_v51, %v2816_v48  ;;  %1687 = vmatmul.mubr.bf16.gmra.mrb[116].mxu0 %v3289_v40 }
 0x110   : > { %1954 = vmatmul.mubr.bf16.gmra.mrb[116].mxu1 %v3286_v18  ;;  %1694 = vmatprep.mubr.bf16.mxu0 %v3290_v44 }
 0x111   : > { %1166 = vst.msk [vmem:[%s3608_s29 + $0xc] sm:$0xf] %vm1162_vm0, %v2612_v52  ;;  %v974_v55 = vadd.f32 %v3599_v6, %v853_v53  ;;  %v856_v56 = vadd.f32 %v2818_v54, %v2706_v50  ;;  %1961 = vmatprep.mubr.bf16.mxu1 %v3287_v22 }
 0x112   : > { %v2707_v57 = vpop.f32.mrb[12].mxu0 }
 0x113   : > { %v1006_v58 = vmax.f32 %v974_v55, 0.0  ;;  %v975_v59 = vadd.f32 %v3599_v6, %v856_v56  ;;  %v2819_v60 = vpop.f32.mrb[12].mxu1  ;;  %v2708_v61 = vpop.f32.mrb[13].mxu0 }
 0x114   : > { %v2709_v63 = vadd.f32 %v2708_v61, %v2707_v57  ;;  %v2820_v0 = vpop.f32.mrb[13].mxu1  ;;  %v2710_v1 = vpop.f32.mrb[14].mxu0 }
 0x115   : > { %v2613_v3 = vpack.c.bf16 %v1006_v58, %v1006_v58  ;;  %v1007_v4 = vmax.f32 %v975_v59, 0.0  ;;  %v2821_v5 = vadd.f32 %v2820_v0, %v2819_v60  ;;  %v2822_v7 = vpop.f32.mrb[14].mxu1  ;;  %v2711_v8 = vpop.f32.mrb[15].mxu0 }
 0x116   : > { %v2712_v9 = vadd.f32 %v2711_v8, %v2710_v1  ;;  %v2823_v10 = vpop.f32.mrb[15].mxu1 }
 0x117   : > { %1167 = vst.msk [vmem:[%s3608_s29 + $0x10] sm:$0xf] %vm1162_vm0, %v2613_v3  ;;  %v2614_v11 = vpack.c.bf16 %v1007_v4, %v1007_v4  ;;  %v861_v12 = vadd.f32 %v2821_v5, %v2709_v63  ;;  %v2824_v13 = vadd.f32 %v2823_v10, %v2822_v7  ;;  %1695 = vmatmul.mubr.bf16.gmra.mrb[120].mxu0 %v3292_v62 }
 0x118   : > { %1962 = vmatmul.mubr.bf16.gmra.mrb[120].mxu1 %v3289_v40  ;;  %1702 = vmatprep.mubr.bf16.mxu0 %v3293_v2 }
 0x119   : > { %1168 = vst.msk [vmem:[%s3608_s29 + $0x14] sm:$0xf] %vm1162_vm0, %v2614_v11  ;;  %v976_v14 = vadd.f32 %v3599_v6, %v861_v12  ;;  %v864_v15 = vadd.f32 %v2824_v13, %v2712_v9  ;;  %1969 = vmatprep.mubr.bf16.mxu1 %v3290_v44 }
 0x11a   : > { %v2713_v16 = vpop.f32.mrb[16].mxu0 }
 0x11b   : > { %v1008_v17 = vmax.f32 %v976_v14, 0.0  ;;  %v977_v18 = vadd.f32 %v3599_v6, %v864_v15  ;;  %v2825_v19 = vpop.f32.mrb[16].mxu1  ;;  %v2714_v20 = vpop.f32.mrb[17].mxu0 }
 0x11c   : > { %v2715_v22 = vadd.f32 %v2714_v20, %v2713_v16  ;;  %v2826_v23 = vpop.f32.mrb[17].mxu1  ;;  %v2716_v24 = vpop.f32.mrb[18].mxu0 }
 0x11d   : > { %v2615_v25 = vpack.c.bf16 %v1008_v17, %v1008_v17  ;;  %v1009_v26 = vmax.f32 %v977_v18, 0.0  ;;  %v2827_v27 = vadd.f32 %v2826_v23, %v2825_v19  ;;  %v2828_v28 = vpop.f32.mrb[18].mxu1  ;;  %v2717_v29 = vpop.f32.mrb[19].mxu0 }
 0x11e   : > { %v2718_v30 = vadd.f32 %v2717_v29, %v2716_v24  ;;  %v2829_v31 = vpop.f32.mrb[19].mxu1 }
 0x11f   : > { %1169 = vst.msk [vmem:[%s3608_s29 + $0x18] sm:$0xf] %vm1162_vm0, %v2615_v25  ;;  %v2616_v32 = vpack.c.bf16 %v1009_v26, %v1009_v26  ;;  %v869_v33 = vadd.f32 %v2827_v27, %v2715_v22  ;;  %v2830_v34 = vadd.f32 %v2829_v31, %v2828_v28  ;;  %1703 = vmatmul.mubr.bf16.gmra.mrb[124].mxu0 %v3295_v21 }
 0x120   : > { %1970 = vmatmul.mubr.bf16.gmra.mrb[124].mxu1 %v3292_v62 }
 0x121   : > { %1170 = vst.msk [vmem:[%s3608_s29 + $0x1c] sm:$0xf] %vm1162_vm0, %v2616_v32  ;;  %v978_v35 = vadd.f32 %v3599_v6, %v869_v33  ;;  %v872_v36 = vadd.f32 %v2830_v34, %v2718_v30 }
 0x122   : > { %v2719_v37 = vpop.f32.mrb[20].mxu0 }
 0x123   : > { %v1010_v38 = vmax.f32 %v978_v35, 0.0  ;;  %v979_v39 = vadd.f32 %v3599_v6, %v872_v36  ;;  %v2831_v40 = vpop.f32.mrb[20].mxu1  ;;  %v2720_v41 = vpop.f32.mrb[21].mxu0 }
 0x124   : > { %v2721_v42 = vadd.f32 %v2720_v41, %v2719_v37  ;;  %v2832_v43 = vpop.f32.mrb[21].mxu1  ;;  %v2722_v44 = vpop.f32.mrb[22].mxu0 }
 0x125   : > { %v2617_v45 = vpack.c.bf16 %v1010_v38, %v1010_v38  ;;  %v1011_v46 = vmax.f32 %v979_v39, 0.0  ;;  %v2833_v47 = vadd.f32 %v2832_v43, %v2831_v40  ;;  %v2834_v48 = vpop.f32.mrb[22].mxu1  ;;  %v2723_v49 = vpop.f32.mrb[23].mxu0 }
 0x126   : > { %v2724_v50 = vadd.f32 %v2723_v49, %v2722_v44  ;;  %v2835_v51 = vpop.f32.mrb[23].mxu1 }
 0x127   : > { %1171 = vst.msk [vmem:[%s3608_s29 + $0x20] sm:$0xf] %vm1162_vm0, %v2617_v45  ;;  %v2618_v52 = vpack.c.bf16 %v1011_v46, %v1011_v46  ;;  %v877_v53 = vadd.f32 %v2833_v47, %v2721_v42  ;;  %v2836_v54 = vadd.f32 %v2835_v51, %v2834_v48 }
 0x129   : > { %1172 = vst.msk [vmem:[%s3608_s29 + $0x24] sm:$0xf] %vm1162_vm0, %v2618_v52  ;;  %v980_v55 = vadd.f32 %v3599_v6, %v877_v53  ;;  %v880_v56 = vadd.f32 %v2836_v54, %v2724_v50 }
 0x12a   : > { %v2725_v57 = vpop.f32.mrb[24].mxu0 }
 0x12b   : > { %v1012_v58 = vmax.f32 %v980_v55, 0.0  ;;  %v981_v59 = vadd.f32 %v3599_v6, %v880_v56  ;;  %v2837_v60 = vpop.f32.mrb[24].mxu1  ;;  %v2726_v61 = vpop.f32.mrb[25].mxu0 }
 0x12c   : > { %v2727_v62 = vadd.f32 %v2726_v61, %v2725_v57  ;;  %v2838_v63 = vpop.f32.mrb[25].mxu1  ;;  %v2728_v0 = vpop.f32.mrb[26].mxu0 }
 0x12d   : > { %v2619_v1 = vpack.c.bf16 %v1012_v58, %v1012_v58  ;;  %v1013_v2 = vmax.f32 %v981_v59, 0.0  ;;  %v2839_v3 = vadd.f32 %v2838_v63, %v2837_v60  ;;  %v2840_v4 = vpop.f32.mrb[26].mxu1  ;;  %v2729_v5 = vpop.f32.mrb[27].mxu0 }
 0x12e   : > { %v2730_v7 = vadd.f32 %v2729_v5, %v2728_v0  ;;  %v2841_v8 = vpop.f32.mrb[27].mxu1 }
 0x12f   : > { %1173 = vst.msk [vmem:[%s3608_s29 + $0x28] sm:$0xf] %vm1162_vm0, %v2619_v1  ;;  %v2620_v9 = vpack.c.bf16 %v1013_v2, %v1013_v2  ;;  %v885_v10 = vadd.f32 %v2839_v3, %v2727_v62  ;;  %v2842_v11 = vadd.f32 %v2841_v8, %v2840_v4 }
 0x131   : > { %1174 = vst.msk [vmem:[%s3608_s29 + $0x2c] sm:$0xf] %vm1162_vm0, %v2620_v9  ;;  %v982_v12 = vadd.f32 %v3599_v6, %v885_v10  ;;  %v888_v13 = vadd.f32 %v2842_v11, %v2730_v7 }
 0x132   : > { %v2731_v14 = vpop.f32.mrb[28].mxu0 }
 0x133   : > { %v1014_v15 = vmax.f32 %v982_v12, 0.0  ;;  %v983_v16 = vadd.f32 %v3599_v6, %v888_v13  ;;  %v2843_v17 = vpop.f32.mrb[28].mxu1  ;;  %v2732_v18 = vpop.f32.mrb[29].mxu0 }
 0x134   : > { %v2733_v19 = vadd.f32 %v2732_v18, %v2731_v14  ;;  %v2844_v20 = vpop.f32.mrb[29].mxu1  ;;  %v2734_v21 = vpop.f32.mrb[30].mxu0 }
 0x135   : > { %v2621_v22 = vpack.c.bf16 %v1014_v15, %v1014_v15  ;;  %v1015_v23 = vmax.f32 %v983_v16, 0.0  ;;  %v2845_v24 = vadd.f32 %v2844_v20, %v2843_v17  ;;  %v2846_v25 = vpop.f32.mrb[30].mxu1  ;;  %v2735_v26 = vpop.f32.mrb[31].mxu0 }
 0x136   : > { %v2736_v27 = vadd.f32 %v2735_v26, %v2734_v21  ;;  %v2847_v28 = vpop.f32.mrb[31].mxu1 }
 0x137   : > { %1175 = vst.msk [vmem:[%s3608_s29 + $0x30] sm:$0xf] %vm1162_vm0, %v2621_v22  ;;  %v2622_v29 = vpack.c.bf16 %v1015_v23, %v1015_v23  ;;  %v893_v30 = vadd.f32 %v2845_v24, %v2733_v19  ;;  %v2848_v31 = vadd.f32 %v2847_v28, %v2846_v25 }
 0x139   : > { %1176 = vst.msk [vmem:[%s3608_s29 + $0x34] sm:$0xf] %vm1162_vm0, %v2622_v29  ;;  %v984_v32 = vadd.f32 %v3599_v6, %v893_v30  ;;  %v896_v33 = vadd.f32 %v2848_v31, %v2736_v27 }
 0x13a   : > { %v2737_v34 = vpop.f32.mrb[32].mxu0 }
 0x13b   : > { %v1016_v35 = vmax.f32 %v984_v32, 0.0  ;;  %v985_v36 = vadd.f32 %v3599_v6, %v896_v33  ;;  %v2849_v37 = vpop.f32.mrb[32].mxu1  ;;  %v2738_v38 = vpop.f32.mrb[33].mxu0 }
 0x13c   : > { %v2739_v39 = vadd.f32 %v2738_v38, %v2737_v34  ;;  %v2850_v40 = vpop.f32.mrb[33].mxu1  ;;  %v2740_v41 = vpop.f32.mrb[34].mxu0 }
 0x13d   : > { %v2623_v42 = vpack.c.bf16 %v1016_v35, %v1016_v35  ;;  %v1017_v43 = vmax.f32 %v985_v36, 0.0  ;;  %v2851_v44 = vadd.f32 %v2850_v40, %v2849_v37  ;;  %v2852_v45 = vpop.f32.mrb[34].mxu1  ;;  %v2741_v46 = vpop.f32.mrb[35].mxu0 }
 0x13e   : > { %v2742_v47 = vadd.f32 %v2741_v46, %v2740_v41  ;;  %v2853_v48 = vpop.f32.mrb[35].mxu1 }
 0x13f   : > { %1177 = vst.msk [vmem:[%s3608_s29 + $0x38] sm:$0xf] %vm1162_vm0, %v2623_v42  ;;  %v2624_v49 = vpack.c.bf16 %v1017_v43, %v1017_v43  ;;  %v901_v50 = vadd.f32 %v2851_v44, %v2739_v39  ;;  %v2854_v51 = vadd.f32 %v2853_v48, %v2852_v45 }
 0x141   : > { %1178 = vst.msk [vmem:[%s3608_s29 + $0x3c] sm:$0xf] %vm1162_vm0, %v2624_v49  ;;  %v986_v52 = vadd.f32 %v3599_v6, %v901_v50  ;;  %v904_v53 = vadd.f32 %v2854_v51, %v2742_v47 }
 0x142   : > { %v2743_v54 = vpop.f32.mrb[36].mxu0 }
 0x143   : > { %v1018_v55 = vmax.f32 %v986_v52, 0.0  ;;  %v987_v56 = vadd.f32 %v3599_v6, %v904_v53  ;;  %v2855_v57 = vpop.f32.mrb[36].mxu1  ;;  %v2744_v58 = vpop.f32.mrb[37].mxu0 }
 0x144   : > { %v2745_v59 = vadd.f32 %v2744_v58, %v2743_v54  ;;  %v2856_v60 = vpop.f32.mrb[37].mxu1  ;;  %v2746_v61 = vpop.f32.mrb[38].mxu0 }
 0x145   : > { %v2625_v62 = vpack.c.bf16 %v1018_v55, %v1018_v55  ;;  %v1019_v63 = vmax.f32 %v987_v56, 0.0  ;;  %v2857_v0 = vadd.f32 %v2856_v60, %v2855_v57  ;;  %v2858_v1 = vpop.f32.mrb[38].mxu1  ;;  %v2747_v2 = vpop.f32.mrb[39].mxu0 }
 0x146   : > { %v2748_v3 = vadd.f32 %v2747_v2, %v2746_v61  ;;  %v2859_v4 = vpop.f32.mrb[39].mxu1 }
 0x147   : > { %1179 = vst.msk [vmem:[%s3608_s29 + $0x40] sm:$0xf] %vm1162_vm0, %v2625_v62  ;;  %v2626_v5 = vpack.c.bf16 %v1019_v63, %v1019_v63  ;;  %v909_v7 = vadd.f32 %v2857_v0, %v2745_v59  ;;  %v2860_v8 = vadd.f32 %v2859_v4, %v2858_v1 }
 0x149   : > { %1180 = vst.msk [vmem:[%s3608_s29 + $0x44] sm:$0xf] %vm1162_vm0, %v2626_v5  ;;  %v988_v9 = vadd.f32 %v3599_v6, %v909_v7  ;;  %v912_v10 = vadd.f32 %v2860_v8, %v2748_v3 }
 0x14a   : > { %v2749_v11 = vpop.f32.mrb[40].mxu0 }
 0x14b   : > { %v1020_v12 = vmax.f32 %v988_v9, 0.0  ;;  %v989_v13 = vadd.f32 %v3599_v6, %v912_v10  ;;  %v2861_v14 = vpop.f32.mrb[40].mxu1  ;;  %v2750_v15 = vpop.f32.mrb[41].mxu0 }
 0x14c   : > { %v2751_v16 = vadd.f32 %v2750_v15, %v2749_v11  ;;  %v2862_v17 = vpop.f32.mrb[41].mxu1  ;;  %v2752_v18 = vpop.f32.mrb[42].mxu0 }
 0x14d   : > { %v2627_v19 = vpack.c.bf16 %v1020_v12, %v1020_v12  ;;  %v1021_v20 = vmax.f32 %v989_v13, 0.0  ;;  %v2863_v21 = vadd.f32 %v2862_v17, %v2861_v14  ;;  %v2864_v22 = vpop.f32.mrb[42].mxu1  ;;  %v2753_v23 = vpop.f32.mrb[43].mxu0 }
 0x14e   : > { %v2754_v24 = vadd.f32 %v2753_v23, %v2752_v18  ;;  %v2865_v25 = vpop.f32.mrb[43].mxu1 }
 0x14f   : > { %1181 = vst.msk [vmem:[%s3608_s29 + $0x48] sm:$0xf] %vm1162_vm0, %v2627_v19  ;;  %v2628_v26 = vpack.c.bf16 %v1021_v20, %v1021_v20  ;;  %v917_v27 = vadd.f32 %v2863_v21, %v2751_v16  ;;  %v2866_v28 = vadd.f32 %v2865_v25, %v2864_v22 }
 0x151   : > { %1182 = vst.msk [vmem:[%s3608_s29 + $0x4c] sm:$0xf] %vm1162_vm0, %v2628_v26  ;;  %v990_v29 = vadd.f32 %v3599_v6, %v917_v27  ;;  %v920_v30 = vadd.f32 %v2866_v28, %v2754_v24 }
 0x152   : > { %v2755_v31 = vpop.f32.mrb[44].mxu0 }
 0x153   : > { %v1022_v32 = vmax.f32 %v990_v29, 0.0  ;;  %v991_v33 = vadd.f32 %v3599_v6, %v920_v30  ;;  %v2867_v34 = vpop.f32.mrb[44].mxu1  ;;  %v2756_v35 = vpop.f32.mrb[45].mxu0 }
 0x154   : > { %v2757_v36 = vadd.f32 %v2756_v35, %v2755_v31  ;;  %v2868_v37 = vpop.f32.mrb[45].mxu1  ;;  %v2758_v38 = vpop.f32.mrb[46].mxu0 }
 0x155   : > { %v2629_v39 = vpack.c.bf16 %v1022_v32, %v1022_v32  ;;  %v1023_v40 = vmax.f32 %v991_v33, 0.0  ;;  %v2869_v41 = vadd.f32 %v2868_v37, %v2867_v34  ;;  %v2870_v42 = vpop.f32.mrb[46].mxu1  ;;  %v2759_v43 = vpop.f32.mrb[47].mxu0 }
 0x156   : > { %v2760_v44 = vadd.f32 %v2759_v43, %v2758_v38  ;;  %v2871_v45 = vpop.f32.mrb[47].mxu1 }
 0x157   : > { %1183 = vst.msk [vmem:[%s3608_s29 + $0x50] sm:$0xf] %vm1162_vm0, %v2629_v39  ;;  %v2630_v46 = vpack.c.bf16 %v1023_v40, %v1023_v40  ;;  %v925_v47 = vadd.f32 %v2869_v41, %v2757_v36  ;;  %v2872_v48 = vadd.f32 %v2871_v45, %v2870_v42 }
 0x159   : > { %1184 = vst.msk [vmem:[%s3608_s29 + $0x54] sm:$0xf] %vm1162_vm0, %v2630_v46  ;;  %v992_v49 = vadd.f32 %v3599_v6, %v925_v47  ;;  %v928_v50 = vadd.f32 %v2872_v48, %v2760_v44 }
 0x15a   : > { %v2761_v51 = vpop.f32.mrb[48].mxu0 }
 0x15b   : > { %v1024_v52 = vmax.f32 %v992_v49, 0.0  ;;  %v993_v53 = vadd.f32 %v3599_v6, %v928_v50  ;;  %v2873_v54 = vpop.f32.mrb[48].mxu1  ;;  %v2762_v55 = vpop.f32.mrb[49].mxu0 }
 0x15c   : > { %v2763_v56 = vadd.f32 %v2762_v55, %v2761_v51  ;;  %v2874_v57 = vpop.f32.mrb[49].mxu1  ;;  %v2764_v58 = vpop.f32.mrb[50].mxu0 }
 0x15d   : > { %v2631_v59 = vpack.c.bf16 %v1024_v52, %v1024_v52  ;;  %v1025_v60 = vmax.f32 %v993_v53, 0.0  ;;  %v2875_v61 = vadd.f32 %v2874_v57, %v2873_v54  ;;  %v2876_v62 = vpop.f32.mrb[50].mxu1  ;;  %v2765_v63 = vpop.f32.mrb[51].mxu0 }
 0x15e   : > { %v2766_v0 = vadd.f32 %v2765_v63, %v2764_v58  ;;  %v2877_v1 = vpop.f32.mrb[51].mxu1 }
 0x15f   : > { %1185 = vst.msk [vmem:[%s3608_s29 + $0x58] sm:$0xf] %vm1162_vm0, %v2631_v59  ;;  %v2632_v2 = vpack.c.bf16 %v1025_v60, %v1025_v60  ;;  %v933_v3 = vadd.f32 %v2875_v61, %v2763_v56  ;;  %v2878_v4 = vadd.f32 %v2877_v1, %v2876_v62 }
 0x161   : > { %1186 = vst.msk [vmem:[%s3608_s29 + $0x5c] sm:$0xf] %vm1162_vm0, %v2632_v2  ;;  %v994_v5 = vadd.f32 %v3599_v6, %v933_v3  ;;  %v936_v7 = vadd.f32 %v2878_v4, %v2766_v0 }
 0x162   : > { %v2767_v8 = vpop.f32.mrb[52].mxu0 }
 0x163   : > { %v1026_v9 = vmax.f32 %v994_v5, 0.0  ;;  %v995_v10 = vadd.f32 %v3599_v6, %v936_v7  ;;  %v2879_v11 = vpop.f32.mrb[52].mxu1  ;;  %v2768_v12 = vpop.f32.mrb[53].mxu0 }
 0x164   : > { %v2769_v13 = vadd.f32 %v2768_v12, %v2767_v8  ;;  %v2880_v14 = vpop.f32.mrb[53].mxu1  ;;  %v2770_v15 = vpop.f32.mrb[54].mxu0 }
 0x165   : > { %v2633_v16 = vpack.c.bf16 %v1026_v9, %v1026_v9  ;;  %v1027_v17 = vmax.f32 %v995_v10, 0.0  ;;  %v2881_v18 = vadd.f32 %v2880_v14, %v2879_v11  ;;  %v2882_v19 = vpop.f32.mrb[54].mxu1  ;;  %v2771_v20 = vpop.f32.mrb[55].mxu0 }
 0x166   : > { %v2772_v21 = vadd.f32 %v2771_v20, %v2770_v15  ;;  %v2883_v22 = vpop.f32.mrb[55].mxu1 }
 0x167   : > { %1187 = vst.msk [vmem:[%s3608_s29 + $0x60] sm:$0xf] %vm1162_vm0, %v2633_v16  ;;  %v2634_v23 = vpack.c.bf16 %v1027_v17, %v1027_v17  ;;  %v941_v24 = vadd.f32 %v2881_v18, %v2769_v13  ;;  %v2884_v25 = vadd.f32 %v2883_v22, %v2882_v19 }
 0x169   : > { %1188 = vst.msk [vmem:[%s3608_s29 + $0x64] sm:$0xf] %vm1162_vm0, %v2634_v23  ;;  %v996_v26 = vadd.f32 %v3599_v6, %v941_v24  ;;  %v944_v27 = vadd.f32 %v2884_v25, %v2772_v21 }
 0x16a   : > { %v2773_v28 = vpop.f32.mrb[56].mxu0 }
 0x16b   : > { %v1028_v29 = vmax.f32 %v996_v26, 0.0  ;;  %v997_v30 = vadd.f32 %v3599_v6, %v944_v27  ;;  %v2885_v31 = vpop.f32.mrb[56].mxu1  ;;  %v2774_v32 = vpop.f32.mrb[57].mxu0 }
 0x16c   : > { %v2775_v33 = vadd.f32 %v2774_v32, %v2773_v28  ;;  %v2886_v34 = vpop.f32.mrb[57].mxu1  ;;  %v2776_v35 = vpop.f32.mrb[58].mxu0 }
 0x16d   : > { %v2635_v36 = vpack.c.bf16 %v1028_v29, %v1028_v29  ;;  %v1029_v37 = vmax.f32 %v997_v30, 0.0  ;;  %v2887_v38 = vadd.f32 %v2886_v34, %v2885_v31  ;;  %v2888_v39 = vpop.f32.mrb[58].mxu1  ;;  %v2777_v40 = vpop.f32.mrb[59].mxu0 }
 0x16e   : > { %v2778_v41 = vadd.f32 %v2777_v40, %v2776_v35  ;;  %v2889_v42 = vpop.f32.mrb[59].mxu1 }
 0x16f   : > { %1189 = vst.msk [vmem:[%s3608_s29 + $0x68] sm:$0xf] %vm1162_vm0, %v2635_v36  ;;  %v2636_v43 = vpack.c.bf16 %v1029_v37, %v1029_v37  ;;  %v949_v44 = vadd.f32 %v2887_v38, %v2775_v33  ;;  %v2890_v45 = vadd.f32 %v2889_v42, %v2888_v39 }
 0x171   : > { %1190 = vst.msk [vmem:[%s3608_s29 + $0x6c] sm:$0xf] %vm1162_vm0, %v2636_v43  ;;  %v998_v46 = vadd.f32 %v3599_v6, %v949_v44  ;;  %v952_v47 = vadd.f32 %v2890_v45, %v2778_v41 }
 0x172   : > { %v2779_v48 = vpop.f32.mrb[60].mxu0 }
 0x173   : > { %v1030_v49 = vmax.f32 %v998_v46, 0.0  ;;  %v999_v50 = vadd.f32 %v3599_v6, %v952_v47  ;;  %v2891_v51 = vpop.f32.mrb[60].mxu1  ;;  %v2780_v52 = vpop.f32.mrb[61].mxu0 }
 0x174   : > { %v2781_v53 = vadd.f32 %v2780_v52, %v2779_v48  ;;  %v2892_v54 = vpop.f32.mrb[61].mxu1  ;;  %v2782_v55 = vpop.f32.mrb[62].mxu0 }
 0x175   : > { %v2637_v56 = vpack.c.bf16 %v1030_v49, %v1030_v49  ;;  %v1031_v57 = vmax.f32 %v999_v50, 0.0  ;;  %v2893_v58 = vadd.f32 %v2892_v54, %v2891_v51  ;;  %v2894_v59 = vpop.f32.mrb[62].mxu1  ;;  %v2783_v60 = vpop.f32.mrb[63].mxu0 }
 0x176   : > { %v2784_v61 = vadd.f32 %v2783_v60, %v2782_v55  ;;  %v2895_v62 = vpop.f32.mrb[63].mxu1 }
 0x177   : > { %1191 = vst.msk [vmem:[%s3608_s29 + $0x70] sm:$0xf] %vm1162_vm0, %v2637_v56  ;;  %v2638_v63 = vpack.c.bf16 %v1031_v57, %v1031_v57  ;;  %v957_v0 = vadd.f32 %v2893_v58, %v2781_v53  ;;  %v2896_v1 = vadd.f32 %v2895_v62, %v2894_v59 }
 0x179   : > { %1192 = vst.msk [vmem:[%s3608_s29 + $0x74] sm:$0xf] %vm1162_vm0, %v2638_v63  ;;  %v1000_v2 = vadd.f32 %v3599_v6, %v957_v0  ;;  %v960_v3 = vadd.f32 %v2896_v1, %v2784_v61 }
 0x17a   : > { %v2913_v4 = vpop.f32.mrb[64].mxu0 }
 0x17b   : > { %v1032_v5 = vmax.f32 %v1000_v2, 0.0  ;;  %v1001_v7 = vadd.f32 %v3599_v6, %v960_v3  ;;  %v3025_v8 = vpop.f32.mrb[64].mxu1  ;;  %v2914_v9 = vpop.f32.mrb[65].mxu0 }
 0x17c   : > { %v2915_v10 = vadd.f32 %v2914_v9, %v2913_v4  ;;  %v3026_v11 = vpop.f32.mrb[65].mxu1  ;;  %v2916_v12 = vpop.f32.mrb[66].mxu0 }
 0x17d   : > { %v2639_v13 = vpack.c.bf16 %v1032_v5, %v1032_v5  ;;  %v1033_v14 = vmax.f32 %v1001_v7, 0.0  ;;  %v3027_v15 = vadd.f32 %v3026_v11, %v3025_v8  ;;  %v3028_v16 = vpop.f32.mrb[66].mxu1  ;;  %v2917_v17 = vpop.f32.mrb[67].mxu0 }
 0x17e   : > { %v2918_v18 = vadd.f32 %v2917_v17, %v2916_v12  ;;  %v3029_v19 = vpop.f32.mrb[67].mxu1 }
 0x17f   : > { %1193 = vst.msk [vmem:[%s3608_s29 + $0x78] sm:$0xf] %vm1162_vm0, %v2639_v13  ;;  %v2640_v20 = vpack.c.bf16 %v1033_v14, %v1033_v14  ;;  %v1852_v21 = vadd.f32 %v3027_v15, %v2915_v10  ;;  %v3030_v22 = vadd.f32 %v3029_v19, %v3028_v16 }
 0x181   : > { %1194 = vst.msk [vmem:[%s3608_s29 + $0x7c] sm:$0xf] %vm1162_vm0, %v2640_v20  ;;  %v1985_v23 = vadd.f32 %v3599_v6, %v1852_v21  ;;  %v1855_v24 = vadd.f32 %v3030_v22, %v2918_v18 }
 0x182   : > { %v2919_v25 = vpop.f32.mrb[68].mxu0 }
 0x183   : > { %v2017_v26 = vmax.f32 %v1985_v23, 0.0  ;;  %v1986_v27 = vadd.f32 %v3599_v6, %v1855_v24  ;;  %v3031_v28 = vpop.f32.mrb[68].mxu1  ;;  %v2920_v29 = vpop.f32.mrb[69].mxu0 }
 0x184   : > { %v2921_v30 = vadd.f32 %v2920_v29, %v2919_v25  ;;  %v3032_v31 = vpop.f32.mrb[69].mxu1  ;;  %v2922_v32 = vpop.f32.mrb[70].mxu0 }
 0x185   : > { %v2641_v33 = vpack.c.bf16 %v2017_v26, %v2017_v26  ;;  %v2018_v34 = vmax.f32 %v1986_v27, 0.0  ;;  %v3033_v35 = vadd.f32 %v3032_v31, %v3031_v28  ;;  %v3034_v36 = vpop.f32.mrb[70].mxu1  ;;  %v2923_v37 = vpop.f32.mrb[71].mxu0 }
 0x186   : > { %v2924_v38 = vadd.f32 %v2923_v37, %v2922_v32  ;;  %v3035_v39 = vpop.f32.mrb[71].mxu1 }
 0x187   : > { %2574 = vst.msk [vmem:[%s3608_s29 + $0x80] sm:$0xf] %vm1162_vm0, %v2641_v33  ;;  %v2642_v40 = vpack.c.bf16 %v2018_v34, %v2018_v34  ;;  %v1860_v41 = vadd.f32 %v3033_v35, %v2921_v30  ;;  %v3036_v42 = vadd.f32 %v3035_v39, %v3034_v36 }
 0x189   : > { %2575 = vst.msk [vmem:[%s3608_s29 + $0x84] sm:$0xf] %vm1162_vm0, %v2642_v40  ;;  %v1987_v43 = vadd.f32 %v3599_v6, %v1860_v41  ;;  %v1863_v44 = vadd.f32 %v3036_v42, %v2924_v38 }
 0x18a   : > { %v2925_v45 = vpop.f32.mrb[72].mxu0 }
 0x18b   : > { %v2019_v46 = vmax.f32 %v1987_v43, 0.0  ;;  %v1988_v47 = vadd.f32 %v3599_v6, %v1863_v44  ;;  %v3037_v48 = vpop.f32.mrb[72].mxu1  ;;  %v2926_v49 = vpop.f32.mrb[73].mxu0 }
 0x18c   : > { %v2927_v50 = vadd.f32 %v2926_v49, %v2925_v45  ;;  %v3038_v51 = vpop.f32.mrb[73].mxu1  ;;  %v2928_v52 = vpop.f32.mrb[74].mxu0 }
 0x18d   : > { %v2643_v53 = vpack.c.bf16 %v2019_v46, %v2019_v46  ;;  %v2020_v54 = vmax.f32 %v1988_v47, 0.0  ;;  %v3039_v55 = vadd.f32 %v3038_v51, %v3037_v48  ;;  %v3040_v56 = vpop.f32.mrb[74].mxu1  ;;  %v2929_v57 = vpop.f32.mrb[75].mxu0 }
 0x18e   : > { %v2930_v58 = vadd.f32 %v2929_v57, %v2928_v52  ;;  %v3041_v59 = vpop.f32.mrb[75].mxu1 }
 0x18f   : > { %2576 = vst.msk [vmem:[%s3608_s29 + $0x88] sm:$0xf] %vm1162_vm0, %v2643_v53  ;;  %v2644_v60 = vpack.c.bf16 %v2020_v54, %v2020_v54  ;;  %v1868_v61 = vadd.f32 %v3039_v55, %v2927_v50  ;;  %v3042_v62 = vadd.f32 %v3041_v59, %v3040_v56 }
 0x191   : > { %2577 = vst.msk [vmem:[%s3608_s29 + $0x8c] sm:$0xf] %vm1162_vm0, %v2644_v60  ;;  %v1989_v63 = vadd.f32 %v3599_v6, %v1868_v61  ;;  %v1871_v0 = vadd.f32 %v3042_v62, %v2930_v58 }
 0x192   : > { %v2931_v1 = vpop.f32.mrb[76].mxu0 }
 0x193   : > { %v2021_v2 = vmax.f32 %v1989_v63, 0.0  ;;  %v1990_v3 = vadd.f32 %v3599_v6, %v1871_v0  ;;  %v3043_v4 = vpop.f32.mrb[76].mxu1  ;;  %v2932_v5 = vpop.f32.mrb[77].mxu0 }
 0x194   : > { %v2933_v7 = vadd.f32 %v2932_v5, %v2931_v1  ;;  %v3044_v8 = vpop.f32.mrb[77].mxu1  ;;  %v2934_v9 = vpop.f32.mrb[78].mxu0 }
 0x195   : > { %v2645_v10 = vpack.c.bf16 %v2021_v2, %v2021_v2  ;;  %v2022_v11 = vmax.f32 %v1990_v3, 0.0  ;;  %v3045_v12 = vadd.f32 %v3044_v8, %v3043_v4  ;;  %v3046_v13 = vpop.f32.mrb[78].mxu1  ;;  %v2935_v14 = vpop.f32.mrb[79].mxu0 }
 0x196   : > { %v2936_v15 = vadd.f32 %v2935_v14, %v2934_v9  ;;  %v3047_v16 = vpop.f32.mrb[79].mxu1 }
 0x197   : > { %2578 = vst.msk [vmem:[%s3608_s29 + $0x90] sm:$0xf] %vm1162_vm0, %v2645_v10  ;;  %v2646_v17 = vpack.c.bf16 %v2022_v11, %v2022_v11  ;;  %v1876_v18 = vadd.f32 %v3045_v12, %v2933_v7  ;;  %v3048_v19 = vadd.f32 %v3047_v16, %v3046_v13 }
 0x199   : > { %2579 = vst.msk [vmem:[%s3608_s29 + $0x94] sm:$0xf] %vm1162_vm0, %v2646_v17  ;;  %v1991_v20 = vadd.f32 %v3599_v6, %v1876_v18  ;;  %v1879_v21 = vadd.f32 %v3048_v19, %v2936_v15 }
 0x19a   : > { %v2937_v22 = vpop.f32.mrb[80].mxu0 }
 0x19b   : > { %v2023_v23 = vmax.f32 %v1991_v20, 0.0  ;;  %v1992_v24 = vadd.f32 %v3599_v6, %v1879_v21  ;;  %v3049_v25 = vpop.f32.mrb[80].mxu1  ;;  %v2938_v26 = vpop.f32.mrb[81].mxu0 }
 0x19c   : > { %v2939_v27 = vadd.f32 %v2938_v26, %v2937_v22  ;;  %v3050_v28 = vpop.f32.mrb[81].mxu1  ;;  %v2940_v29 = vpop.f32.mrb[82].mxu0 }
 0x19d   : > { %v2647_v30 = vpack.c.bf16 %v2023_v23, %v2023_v23  ;;  %v2024_v31 = vmax.f32 %v1992_v24, 0.0  ;;  %v3051_v32 = vadd.f32 %v3050_v28, %v3049_v25  ;;  %v3052_v33 = vpop.f32.mrb[82].mxu1  ;;  %v2941_v34 = vpop.f32.mrb[83].mxu0 }
 0x19e   : > { %v2942_v35 = vadd.f32 %v2941_v34, %v2940_v29  ;;  %v3053_v36 = vpop.f32.mrb[83].mxu1 }
 0x19f   : > { %2580 = vst.msk [vmem:[%s3608_s29 + $0x98] sm:$0xf] %vm1162_vm0, %v2647_v30  ;;  %v2648_v37 = vpack.c.bf16 %v2024_v31, %v2024_v31  ;;  %v1884_v38 = vadd.f32 %v3051_v32, %v2939_v27  ;;  %v3054_v39 = vadd.f32 %v3053_v36, %v3052_v33 }
 0x1a1   : > { %2581 = vst.msk [vmem:[%s3608_s29 + $0x9c] sm:$0xf] %vm1162_vm0, %v2648_v37  ;;  %v1993_v40 = vadd.f32 %v3599_v6, %v1884_v38  ;;  %v1887_v41 = vadd.f32 %v3054_v39, %v2942_v35 }
 0x1a2   : > { %v2943_v42 = vpop.f32.mrb[84].mxu0 }
 0x1a3   : > { %v2025_v43 = vmax.f32 %v1993_v40, 0.0  ;;  %v1994_v44 = vadd.f32 %v3599_v6, %v1887_v41  ;;  %v3055_v45 = vpop.f32.mrb[84].mxu1  ;;  %v2944_v46 = vpop.f32.mrb[85].mxu0 }
 0x1a4   : > { %v2945_v47 = vadd.f32 %v2944_v46, %v2943_v42  ;;  %v3056_v48 = vpop.f32.mrb[85].mxu1  ;;  %v2946_v49 = vpop.f32.mrb[86].mxu0 }
 0x1a5   : > { %v2649_v50 = vpack.c.bf16 %v2025_v43, %v2025_v43  ;;  %v2026_v51 = vmax.f32 %v1994_v44, 0.0  ;;  %v3057_v52 = vadd.f32 %v3056_v48, %v3055_v45  ;;  %v3058_v53 = vpop.f32.mrb[86].mxu1  ;;  %v2947_v54 = vpop.f32.mrb[87].mxu0 }
 0x1a6   : > { %v2948_v55 = vadd.f32 %v2947_v54, %v2946_v49  ;;  %v3059_v56 = vpop.f32.mrb[87].mxu1 }
 0x1a7   : > { %2582 = vst.msk [vmem:[%s3608_s29 + $0xa0] sm:$0xf] %vm1162_vm0, %v2649_v50  ;;  %v2650_v57 = vpack.c.bf16 %v2026_v51, %v2026_v51  ;;  %v1892_v58 = vadd.f32 %v3057_v52, %v2945_v47  ;;  %v3060_v59 = vadd.f32 %v3059_v56, %v3058_v53 }
 0x1a9   : > { %2583 = vst.msk [vmem:[%s3608_s29 + $0xa4] sm:$0xf] %vm1162_vm0, %v2650_v57  ;;  %v1995_v60 = vadd.f32 %v3599_v6, %v1892_v58  ;;  %v1895_v61 = vadd.f32 %v3060_v59, %v2948_v55 }
 0x1aa   : > { %v2949_v62 = vpop.f32.mrb[88].mxu0 }
 0x1ab   : > { %v2027_v63 = vmax.f32 %v1995_v60, 0.0  ;;  %v1996_v0 = vadd.f32 %v3599_v6, %v1895_v61  ;;  %v3061_v1 = vpop.f32.mrb[88].mxu1  ;;  %v2950_v2 = vpop.f32.mrb[89].mxu0  ;;  %v3749_v6 = vld [vmem:[%s3816_s2] ss:$0 sm:$0xff] }
 0x1ac   : > { %v2951_v3 = vadd.f32 %v2950_v2, %v2949_v62  ;;  %v3062_v4 = vpop.f32.mrb[89].mxu1  ;;  %v2952_v5 = vpop.f32.mrb[90].mxu0 }
 0x1ad   : > { %v2651_v7 = vpack.c.bf16 %v2027_v63, %v2027_v63  ;;  %v2028_v8 = vmax.f32 %v1996_v0, 0.0  ;;  %v3063_v9 = vadd.f32 %v3062_v4, %v3061_v1  ;;  %v3064_v10 = vpop.f32.mrb[90].mxu1  ;;  %v2953_v11 = vpop.f32.mrb[91].mxu0 }
 0x1ae   : > { %v2954_v12 = vadd.f32 %v2953_v11, %v2952_v5  ;;  %v3065_v13 = vpop.f32.mrb[91].mxu1 }
 0x1af   : > { %2584 = vst.msk [vmem:[%s3608_s29 + $0xa8] sm:$0xf] %vm1162_vm0, %v2651_v7  ;;  %v2652_v14 = vpack.c.bf16 %v2028_v8, %v2028_v8  ;;  %v1900_v15 = vadd.f32 %v3063_v9, %v2951_v3  ;;  %v3066_v16 = vadd.f32 %v3065_v13, %v3064_v10 }
 0x1b1   : > { %2585 = vst.msk [vmem:[%s3608_s29 + $0xac] sm:$0xf] %vm1162_vm0, %v2652_v14  ;;  %v1997_v17 = vadd.f32 %v3749_v6, %v1900_v15  ;;  %v1903_v18 = vadd.f32 %v3066_v16, %v2954_v12 }
 0x1b2   : > { %v2955_v19 = vpop.f32.mrb[92].mxu0 }
 0x1b3   : > { %v2029_v20 = vmax.f32 %v1997_v17, 0.0  ;;  %v1998_v21 = vadd.f32 %v3749_v6, %v1903_v18  ;;  %v3067_v22 = vpop.f32.mrb[92].mxu1  ;;  %v2956_v23 = vpop.f32.mrb[93].mxu0 }
 0x1b4   : > { %v2957_v24 = vadd.f32 %v2956_v23, %v2955_v19  ;;  %v3068_v25 = vpop.f32.mrb[93].mxu1  ;;  %v2958_v26 = vpop.f32.mrb[94].mxu0 }
 0x1b5   : > { %v2653_v27 = vpack.c.bf16 %v2029_v20, %v2029_v20  ;;  %v2030_v28 = vmax.f32 %v1998_v21, 0.0  ;;  %v3069_v29 = vadd.f32 %v3068_v25, %v3067_v22  ;;  %v3070_v30 = vpop.f32.mrb[94].mxu1  ;;  %v2959_v31 = vpop.f32.mrb[95].mxu0 }
 0x1b6   : > { %v2960_v32 = vadd.f32 %v2959_v31, %v2958_v26  ;;  %v3071_v33 = vpop.f32.mrb[95].mxu1 }
 0x1b7   : > { %2586 = vst.msk [vmem:[%s3608_s29 + $0xb0] sm:$0xf] %vm1162_vm0, %v2653_v27  ;;  %v2654_v34 = vpack.c.bf16 %v2030_v28, %v2030_v28  ;;  %v1908_v35 = vadd.f32 %v3069_v29, %v2957_v24  ;;  %v3072_v36 = vadd.f32 %v3071_v33, %v3070_v30 }
 0x1b9   : > { %2587 = vst.msk [vmem:[%s3608_s29 + $0xb4] sm:$0xf] %vm1162_vm0, %v2654_v34  ;;  %v1999_v37 = vadd.f32 %v3749_v6, %v1908_v35  ;;  %v1911_v38 = vadd.f32 %v3072_v36, %v2960_v32 }
 0x1ba   : > { %v2961_v39 = vpop.f32.mrb[96].mxu0 }
 0x1bb   : > { %v2031_v40 = vmax.f32 %v1999_v37, 0.0  ;;  %v2000_v41 = vadd.f32 %v3749_v6, %v1911_v38  ;;  %v3073_v42 = vpop.f32.mrb[96].mxu1  ;;  %v2962_v43 = vpop.f32.mrb[97].mxu0 }
 0x1bc   : > { %v2963_v44 = vadd.f32 %v2962_v43, %v2961_v39  ;;  %v3074_v45 = vpop.f32.mrb[97].mxu1  ;;  %v2964_v46 = vpop.f32.mrb[98].mxu0 }
 0x1bd   : > { %v2655_v47 = vpack.c.bf16 %v2031_v40, %v2031_v40  ;;  %v2032_v48 = vmax.f32 %v2000_v41, 0.0  ;;  %v3075_v49 = vadd.f32 %v3074_v45, %v3073_v42  ;;  %v3076_v50 = vpop.f32.mrb[98].mxu1  ;;  %v2965_v51 = vpop.f32.mrb[99].mxu0 }
 0x1be   : > { %v2966_v52 = vadd.f32 %v2965_v51, %v2964_v46  ;;  %v3077_v53 = vpop.f32.mrb[99].mxu1 }
 0x1bf   : > { %2588 = vst.msk [vmem:[%s3608_s29 + $0xb8] sm:$0xf] %vm1162_vm0, %v2655_v47  ;;  %v2656_v54 = vpack.c.bf16 %v2032_v48, %v2032_v48  ;;  %v1916_v55 = vadd.f32 %v3075_v49, %v2963_v44  ;;  %v3078_v56 = vadd.f32 %v3077_v53, %v3076_v50 }
 0x1c1   : > { %2589 = vst.msk [vmem:[%s3608_s29 + $0xbc] sm:$0xf] %vm1162_vm0, %v2656_v54  ;;  %v2001_v57 = vadd.f32 %v3749_v6, %v1916_v55  ;;  %v1919_v58 = vadd.f32 %v3078_v56, %v2966_v52 }
 0x1c2   : > { %v2967_v59 = vpop.f32.mrb[100].mxu0 }
 0x1c3   : > { %v2033_v60 = vmax.f32 %v2001_v57, 0.0  ;;  %v2002_v61 = vadd.f32 %v3749_v6, %v1919_v58  ;;  %v3079_v62 = vpop.f32.mrb[100].mxu1  ;;  %v2968_v63 = vpop.f32.mrb[101].mxu0 }
 0x1c4   : > { %v2969_v0 = vadd.f32 %v2968_v63, %v2967_v59  ;;  %v3080_v1 = vpop.f32.mrb[101].mxu1  ;;  %v2970_v2 = vpop.f32.mrb[102].mxu0 }
 0x1c5   : > { %v2657_v3 = vpack.c.bf16 %v2033_v60, %v2033_v60  ;;  %v2034_v4 = vmax.f32 %v2002_v61, 0.0  ;;  %v3081_v5 = vadd.f32 %v3080_v1, %v3079_v62  ;;  %v3082_v7 = vpop.f32.mrb[102].mxu1  ;;  %v2971_v8 = vpop.f32.mrb[103].mxu0 }
 0x1c6   : > { %v2972_v9 = vadd.f32 %v2971_v8, %v2970_v2  ;;  %v3083_v10 = vpop.f32.mrb[103].mxu1 }
 0x1c7   : > { %2590 = vst.msk [vmem:[%s3608_s29 + $0xc0] sm:$0xf] %vm1162_vm0, %v2657_v3  ;;  %v2658_v11 = vpack.c.bf16 %v2034_v4, %v2034_v4  ;;  %v1924_v12 = vadd.f32 %v3081_v5, %v2969_v0  ;;  %v3084_v13 = vadd.f32 %v3083_v10, %v3082_v7 }
 0x1c9   : > { %2591 = vst.msk [vmem:[%s3608_s29 + $0xc4] sm:$0xf] %vm1162_vm0, %v2658_v11  ;;  %v2003_v14 = vadd.f32 %v3749_v6, %v1924_v12  ;;  %v1927_v15 = vadd.f32 %v3084_v13, %v2972_v9 }
 0x1ca   : > { %v2973_v16 = vpop.f32.mrb[104].mxu0 }
 0x1cb   : > { %v2035_v17 = vmax.f32 %v2003_v14, 0.0  ;;  %v2004_v18 = vadd.f32 %v3749_v6, %v1927_v15  ;;  %v3085_v19 = vpop.f32.mrb[104].mxu1  ;;  %v2974_v20 = vpop.f32.mrb[105].mxu0 }
 0x1cc   : > { %v2975_v21 = vadd.f32 %v2974_v20, %v2973_v16  ;;  %v3086_v22 = vpop.f32.mrb[105].mxu1  ;;  %v2976_v23 = vpop.f32.mrb[106].mxu0 }
 0x1cd   : > { %v2659_v24 = vpack.c.bf16 %v2035_v17, %v2035_v17  ;;  %v2036_v25 = vmax.f32 %v2004_v18, 0.0  ;;  %v3087_v26 = vadd.f32 %v3086_v22, %v3085_v19  ;;  %v3088_v27 = vpop.f32.mrb[106].mxu1  ;;  %v2977_v28 = vpop.f32.mrb[107].mxu0 }
 0x1ce   : > { %v2978_v29 = vadd.f32 %v2977_v28, %v2976_v23  ;;  %v3089_v30 = vpop.f32.mrb[107].mxu1 }
 0x1cf   : > { %2592 = vst.msk [vmem:[%s3608_s29 + $0xc8] sm:$0xf] %vm1162_vm0, %v2659_v24  ;;  %v2660_v31 = vpack.c.bf16 %v2036_v25, %v2036_v25  ;;  %v1932_v32 = vadd.f32 %v3087_v26, %v2975_v21  ;;  %v3090_v33 = vadd.f32 %v3089_v30, %v3088_v27 }
 0x1d1   : > { %2593 = vst.msk [vmem:[%s3608_s29 + $0xcc] sm:$0xf] %vm1162_vm0, %v2660_v31  ;;  %v2005_v34 = vadd.f32 %v3749_v6, %v1932_v32  ;;  %v1935_v35 = vadd.f32 %v3090_v33, %v2978_v29 }
 0x1d2   : > { %v2979_v36 = vpop.f32.mrb[108].mxu0 }
 0x1d3   : > { %v2037_v37 = vmax.f32 %v2005_v34, 0.0  ;;  %v2006_v38 = vadd.f32 %v3749_v6, %v1935_v35  ;;  %v3091_v39 = vpop.f32.mrb[108].mxu1  ;;  %v2980_v40 = vpop.f32.mrb[109].mxu0 }
 0x1d4   : > { %v2981_v41 = vadd.f32 %v2980_v40, %v2979_v36  ;;  %v3092_v42 = vpop.f32.mrb[109].mxu1  ;;  %v2982_v43 = vpop.f32.mrb[110].mxu0 }
 0x1d5   : > { %v2661_v44 = vpack.c.bf16 %v2037_v37, %v2037_v37  ;;  %v2038_v45 = vmax.f32 %v2006_v38, 0.0  ;;  %v3093_v46 = vadd.f32 %v3092_v42, %v3091_v39  ;;  %v3094_v47 = vpop.f32.mrb[110].mxu1  ;;  %v2983_v48 = vpop.f32.mrb[111].mxu0 }
 0x1d6   : > { %v2984_v49 = vadd.f32 %v2983_v48, %v2982_v43  ;;  %v3095_v50 = vpop.f32.mrb[111].mxu1 }
 0x1d7   : > { %2594 = vst.msk [vmem:[%s3608_s29 + $0xd0] sm:$0xf] %vm1162_vm0, %v2661_v44  ;;  %v2662_v51 = vpack.c.bf16 %v2038_v45, %v2038_v45  ;;  %v1940_v52 = vadd.f32 %v3093_v46, %v2981_v41  ;;  %v3096_v53 = vadd.f32 %v3095_v50, %v3094_v47 }
 0x1d9   : > { %2595 = vst.msk [vmem:[%s3608_s29 + $0xd4] sm:$0xf] %vm1162_vm0, %v2662_v51  ;;  %v2007_v54 = vadd.f32 %v3749_v6, %v1940_v52  ;;  %v1943_v55 = vadd.f32 %v3096_v53, %v2984_v49 }
 0x1da   : > { %v2985_v56 = vpop.f32.mrb[112].mxu0 }
 0x1db   : > { %v2039_v57 = vmax.f32 %v2007_v54, 0.0  ;;  %v2008_v58 = vadd.f32 %v3749_v6, %v1943_v55  ;;  %v3097_v59 = vpop.f32.mrb[112].mxu1  ;;  %v2986_v60 = vpop.f32.mrb[113].mxu0 }
 0x1dc   : > { %v2987_v61 = vadd.f32 %v2986_v60, %v2985_v56  ;;  %v3098_v62 = vpop.f32.mrb[113].mxu1  ;;  %v2988_v63 = vpop.f32.mrb[114].mxu0 }
 0x1dd   : > { %v2663_v0 = vpack.c.bf16 %v2039_v57, %v2039_v57  ;;  %v2040_v1 = vmax.f32 %v2008_v58, 0.0  ;;  %v3099_v2 = vadd.f32 %v3098_v62, %v3097_v59  ;;  %v3100_v3 = vpop.f32.mrb[114].mxu1  ;;  %v2989_v4 = vpop.f32.mrb[115].mxu0 }
 0x1de   : > { %v2990_v5 = vadd.f32 %v2989_v4, %v2988_v63  ;;  %v3101_v7 = vpop.f32.mrb[115].mxu1 }
 0x1df   : > { %2596 = vst.msk [vmem:[%s3608_s29 + $0xd8] sm:$0xf] %vm1162_vm0, %v2663_v0  ;;  %v2664_v8 = vpack.c.bf16 %v2040_v1, %v2040_v1  ;;  %v1948_v9 = vadd.f32 %v3099_v2, %v2987_v61  ;;  %v3102_v10 = vadd.f32 %v3101_v7, %v3100_v3 }
 0x1e1   : > { %2597 = vst.msk [vmem:[%s3608_s29 + $0xdc] sm:$0xf] %vm1162_vm0, %v2664_v8  ;;  %v2009_v11 = vadd.f32 %v3749_v6, %v1948_v9  ;;  %v1951_v12 = vadd.f32 %v3102_v10, %v2990_v5 }
 0x1e2   : > { %v2991_v13 = vpop.f32.mrb[116].mxu0 }
 0x1e3   : > { %v2041_v14 = vmax.f32 %v2009_v11, 0.0  ;;  %v2010_v15 = vadd.f32 %v3749_v6, %v1951_v12  ;;  %v3103_v16 = vpop.f32.mrb[116].mxu1  ;;  %v2992_v17 = vpop.f32.mrb[117].mxu0 }
 0x1e4   : > { %v2993_v18 = vadd.f32 %v2992_v17, %v2991_v13  ;;  %v3104_v19 = vpop.f32.mrb[117].mxu1  ;;  %v2994_v20 = vpop.f32.mrb[118].mxu0 }
 0x1e5   : > { %v2665_v21 = vpack.c.bf16 %v2041_v14, %v2041_v14  ;;  %v2042_v22 = vmax.f32 %v2010_v15, 0.0  ;;  %v3105_v23 = vadd.f32 %v3104_v19, %v3103_v16  ;;  %v3106_v24 = vpop.f32.mrb[118].mxu1  ;;  %v2995_v25 = vpop.f32.mrb[119].mxu0 }
 0x1e6   : > { %v2996_v26 = vadd.f32 %v2995_v25, %v2994_v20  ;;  %v3107_v27 = vpop.f32.mrb[119].mxu1 }
 0x1e7   : > { %2598 = vst.msk [vmem:[%s3608_s29 + $0xe0] sm:$0xf] %vm1162_vm0, %v2665_v21  ;;  %v2666_v28 = vpack.c.bf16 %v2042_v22, %v2042_v22  ;;  %v1956_v29 = vadd.f32 %v3105_v23, %v2993_v18  ;;  %v3108_v30 = vadd.f32 %v3107_v27, %v3106_v24 }
 0x1e9   : > { %2599 = vst.msk [vmem:[%s3608_s29 + $0xe4] sm:$0xf] %vm1162_vm0, %v2666_v28  ;;  %v2011_v31 = vadd.f32 %v3749_v6, %v1956_v29  ;;  %v1959_v32 = vadd.f32 %v3108_v30, %v2996_v26 }
 0x1ea   : > { %v2997_v33 = vpop.f32.mrb[120].mxu0 }
 0x1eb   : > { %v2043_v34 = vmax.f32 %v2011_v31, 0.0  ;;  %v2012_v35 = vadd.f32 %v3749_v6, %v1959_v32  ;;  %v3109_v36 = vpop.f32.mrb[120].mxu1  ;;  %v2998_v37 = vpop.f32.mrb[121].mxu0 }
 0x1ec   : > { %v2999_v38 = vadd.f32 %v2998_v37, %v2997_v33  ;;  %v3110_v39 = vpop.f32.mrb[121].mxu1  ;;  %v3000_v40 = vpop.f32.mrb[122].mxu0 }
 0x1ed   : > { %v2667_v41 = vpack.c.bf16 %v2043_v34, %v2043_v34  ;;  %v2044_v42 = vmax.f32 %v2012_v35, 0.0  ;;  %v3111_v43 = vadd.f32 %v3110_v39, %v3109_v36  ;;  %v3112_v44 = vpop.f32.mrb[122].mxu1  ;;  %v3001_v45 = vpop.f32.mrb[123].mxu0 }
 0x1ee   : > { %v3002_v46 = vadd.f32 %v3001_v45, %v3000_v40  ;;  %v3113_v47 = vpop.f32.mrb[123].mxu1 }
 0x1ef   : > { %2600 = vst.msk [vmem:[%s3608_s29 + $0xe8] sm:$0xf] %vm1162_vm0, %v2667_v41  ;;  %v2668_v48 = vpack.c.bf16 %v2044_v42, %v2044_v42  ;;  %v1964_v49 = vadd.f32 %v3111_v43, %v2999_v38  ;;  %v3114_v50 = vadd.f32 %v3113_v47, %v3112_v44 }
 0x1f1   : > { %2601 = vst.msk [vmem:[%s3608_s29 + $0xec] sm:$0xf] %vm1162_vm0, %v2668_v48  ;;  %v2013_v51 = vadd.f32 %v3749_v6, %v1964_v49  ;;  %v1967_v52 = vadd.f32 %v3114_v50, %v3002_v46 }
 0x1f2   : > { %v3003_v53 = vpop.f32.mrb[124].mxu0 }
 0x1f3   : > { %v2045_v54 = vmax.f32 %v2013_v51, 0.0  ;;  %v2014_v55 = vadd.f32 %v3749_v6, %v1967_v52  ;;  %v3115_v56 = vpop.f32.mrb[124].mxu1  ;;  %v3004_v57 = vpop.f32.mrb[125].mxu0 }
 0x1f4   : > { %v3005_v58 = vadd.f32 %v3004_v57, %v3003_v53  ;;  %v3116_v59 = vpop.f32.mrb[125].mxu1  ;;  %v3006_v60 = vpop.f32.mrb[126].mxu0 }
 0x1f5   : > { %v2669_v61 = vpack.c.bf16 %v2045_v54, %v2045_v54  ;;  %v2046_v62 = vmax.f32 %v2014_v55, 0.0  ;;  %v3117_v63 = vadd.f32 %v3116_v59, %v3115_v56  ;;  %v3118_v0 = vpop.f32.mrb[126].mxu1  ;;  %v3007_v1 = vpop.f32.mrb[127].mxu0 }
 0x1f6   : > { %v3008_v2 = vadd.f32 %v3007_v1, %v3006_v60  ;;  %v3119_v3 = vpop.f32.mrb[127].mxu1 }
 0x1f7   : > { %2602 = vst.msk [vmem:[%s3608_s29 + $0xf0] sm:$0xf] %vm1162_vm0, %v2669_v61  ;;  %v2670_v4 = vpack.c.bf16 %v2046_v62, %v2046_v62  ;;  %v1972_v5 = vadd.f32 %v3117_v63, %v3005_v58  ;;  %v3120_v7 = vadd.f32 %v3119_v3, %v3118_v0 }
 0x1f9   : > { %2603 = vst.msk [vmem:[%s3608_s29 + $0xf4] sm:$0xf] %vm1162_vm0, %v2670_v4  ;;  %v2015_v8 = vadd.f32 %v3749_v6, %v1972_v5  ;;  %v1975_v9 = vadd.f32 %v3120_v7, %v3008_v2 }
 0x1fb   : > { %v2047_v10 = vmax.f32 %v2015_v8, 0.0  ;;  %v2016_v11 = vadd.f32 %v3749_v6, %v1975_v9 }
 0x1fd   : > { %v2671_v12 = vpack.c.bf16 %v2047_v10, %v2047_v10  ;;  %v2048_v13 = vmax.f32 %v2016_v11, 0.0 }
 0x1ff   : > { %2604 = vst.msk [vmem:[%s3608_s29 + $0xf8] sm:$0xf] %vm1162_vm0, %v2671_v12  ;;  %v2672_v14 = vpack.c.bf16 %v2048_v13, %v2048_v13 }
 0x201   : > { %2605 = vst.msk [vmem:[%s3608_s29 + $0xfc] sm:$0xf] %vm1162_vm0, %v2672_v14 }
 0x202 PF: > { %s13_s12 = sadd.s32 1, %s3303_s12  }
 0x203   : > { %p10_p4 = scmp.ge.s32.totalorder %s13_s12, 4  }
 0x205   :  { %12 = sbr.rel (!%p10_p4) target bundleno = 1 (0x1), region = 65 }

// kernel: encoder_forward.5
= control target key start
LH: loop header
LB: loop body
LE: loop exit
PB: predicated region body
PF: predicated region fallthrough
CT: control target
= control target key end

     0   :  { %s8110_s0 = inlined_call_operand.vmem [shape: bf16[2,16,2048], index: 0, kind: input, shape index: {}]   ;;  %s8111_s1 = inlined_call_operand.vmem [shape: bf16[2048,256], index: 1, kind: input, shape index: {}]   ;;  %s8112_s2 = inlined_call_operand.vmem [shape: f32[1,256], index: 2, kind: input, shape index: {}]   ;;  %s8113_s3 = inlined_call_operand.vmem [shape: bf16[4,256,128], index: 3, kind: input, shape index: {}]   ;;  %s8114_s4 = inlined_call_operand.vmem [shape: f32[1,128], index: 4, kind: input, shape index: {}]   ;;  %s8115_s5 = inlined_call_operand.vmem [shape: bf16[4,128,256], index: 5, kind: input, shape index: {}]   ;;  %s8116_s6 = inlined_call_operand.vmem [shape: f32[1,256], index: 6, kind: input, shape index: {}]   ;;  %s8117_s7 = inlined_call_operand.vmem [shape: bf16[256,256], index: 7, kind: input, shape index: {}]   ;;  %s8118_s8 = inlined_call_operand.vmem [shape: f32[1,256], index: 8, kind: input, shape index: {}]   ;;  %s8119_s9 = inlined_call_operand.vmem [shape: bf16[256,128], index: 9, kind: input, shape index: {}]   ;;  %s8120_s10 = inlined_call_operand.vmem [shape: f32[1,128], index: 10, kind: input, shape index: {}]   ;;  %s8121_s11 = inlined_call_operand.vmem [shape: bf16[256,128], index: 11, kind: input, shape index: {}]   ;;  %s8122_s12 = inlined_call_operand.vmem [shape: f32[1,128], index: 12, kind: input, shape index: {}]   ;;  %s8123_s13 = inlined_call_operand.vmem [shape: bf16[256,128], index: 13, kind: input, shape index: {}]   ;;  %s8124_s14 = inlined_call_operand.vmem [shape: f32[1,128], index: 14, kind: input, shape index: {}]   ;;  %s8125_s15 = inlined_call_operand.vmem [shape: f32[2,2,128], index: 15, kind: input, shape index: {}]   ;;  %s8126_s16 = inlined_call_operand.vmem [shape: f32[2,2,128], index: 16, kind: output, shape index: {0}]   ;;  %s8127_s17 = inlined_call_operand.hbm [shape: f32[2,1,128], index: 17, kind: output, shape index: {1}]  }
   0x1   :  { %8136 = sst [smem:[#allocation12_spill]] %s8110_s0 }
   0x2   :  { %8137 = sst [smem:[#allocation13_spill]] %s8111_s1 }
   0x3   :  { %8138 = sst [smem:[#allocation14_spill]] %s8112_s2 }
   0x4   :  { %8139 = sst [smem:[#allocation15_spill]] %s8127_s17 }
   0x5   :  { %23 = vsyncpa [#allocation4], 0 }
   0x6   :  { %25 = vsyncpa [#allocation4 + $0x1], 0  ;;  %s6494_s24 = smov 0   ;;  %s6496_s25 = smov 0  }
   0x7   :  { %s6498_s26 = smov 0   ;;  %s6500_s27 = smov 0  }
   0x8 LB: > { %8140 = sst [smem:[#allocation6_spill]] %s6388_s24  ;;  %s6515_s28 = sadd.s32 4294967295, %s6400_s27   ;;  %s6400_s27 = sphi %s6500_s27, %s8156_s27   ;;  %s6396_s26 = sphi %s6498_s26, %s8158_s26   ;;  %s6392_s25 = sphi %s6496_s25, %s8160_s25   ;;  %s6388_s24 = sphi %s6494_s24, %s8159_s24  }
   0x9   : > { %8141 = sst [smem:[#allocation7_spill]] %s6396_s26  ;;  %s4807_s29 = sadd.s32 4294967294, %s6400_s27  }
   0xa   : > { %8142 = sst [smem:[#allocation8_spill]] %s6400_s27  ;;  %s6519_s0 = sadd.s32 1, %s6400_s27  }
   0xb   : > { %8143 = sst [smem:[#allocation9_spill]] %s6519_s0  ;;  %s410_s30 = sadd.s32 1, %s6396_s26 }
   0xc   : > { %s407_s18 = ssub.s32 %s6400_s27, %s6519_s0  ;;  %p420_p0 = scmp.ne.s32.totalorder %s6396_s26, %s6392_s25 }
   0xd   : > { %p408_p1 = scmp.eq.s32.totalorder %s407_s18, 0  ;;  %p421_p2 = scmp.eq.s32.totalorder %s6515_s28, 1 }
   0xe   : > { %p426_p3 = scmp.ne.s32.totalorder %s6392_s25, %s6388_s24  ;;  %p427_p4 = scmp.eq.s32.totalorder %s4807_s29, 1 }
   0xf   : > { %s6530_s19 = scalar_select %p408_p1, %s6396_s26, %s410_s30  }
  0x10   : > { %p6532_p5 = por %p421_p2, %p420_p0  ;;  %p6536_p6 = por %p427_p4, %p426_p3 }
  0x11   : > { %8144 = sst [smem:[#allocation10_spill]] %s6530_s19  ;;  %p4810_p7 = scmp.ge.s32.totalorder %s6400_s27, 1 }
  0x12   : > { %s8146_s20 = scalar_select %p6536_p6, 1, 0 }
  0x13   : > { %p502_p8 = scmp.lt.s32.totalorder %s6400_s27, 3 }
  0x14   : > { %8147 = sst [smem:[#allocation11_spill]] %s8146_s20 }
  0x15   : > { %p503_p9 = pnand %p4810_p7, %p502_p8 }
  0x16   : > { %s8148_s23 = sld [smem:[#allocation13_spill]] (!%p503_p9)  ;;  %p561_p10 = scmp.lt.s32.totalorder (!%p503_p9), %s6515_s28, 1  ;;  %vm2579_vm0 = vcmask (!%p503_p9), 1040384   ;;  %vm2580_vm1 = vcmask (!%p503_p9), 1044484  }
  0x17   : > { %506 = sbr.rel (%p503_p9) target bundleno = 1890 (0x762), region = 84  ;;  %s8149_s27 = sld [smem:[#allocation12_spill]] (!%p503_p9)  ;;  %vm2581_vm2 = vmor (!%p503_p9), %vm2579_vm0, %vm2580_vm1 }
  0x18   : > { %s8150_s2 = sld [smem:[#allocation14_spill]] (!%p503_p9)  ;;  %s559_s24 = sand.u32 (!%p503_p9), 1, %s6392_s25  }
  0x19   : > { %s5453_s21 = sshll.u32 (!%p503_p9), %s6515_s28, 4 }
  0x1c   : > { %v5685_v0 = vld [vmem:[%s8148_s23 + $0x104] ss:$8 sps:$4 sm:$0xff] (!%p503_p9)   ;;  %v5687_v1 = vld [vmem:[%s8148_s23 + $0x100] ss:$8 sps:$4 sm:$0xff] (!%p503_p9)   ;;  %v5688_v2 = vld [vmem:[%s8148_s23 + $0x114] ss:$8 sps:$4 sm:$0xff] (!%p503_p9)  }
  0x1d   : > { %2262 = vmatprep.subr.bf16.mxu0 (!%p503_p9), %v5685_v0  ;;  %v5690_v3 = vld [vmem:[%s8148_s23 + $0x110] ss:$8 sps:$4 sm:$0xff] (!%p503_p9)   ;;  %v5691_v4 = vld [vmem:[%s8148_s23 + $0x124] ss:$8 sps:$4 sm:$0xff] (!%p503_p9)   ;;  %v5693_v5 = vld [vmem:[%s8148_s23 + $0x120] ss:$8 sps:$4 sm:$0xff] (!%p503_p9)  }
  0x1e   : > { %2263 = vmatpush1.bf16.msra.mxu0 %v5687_v1  ;;  %v5694_v6 = vld [vmem:[%s8148_s23 + $0x134] ss:$8 sps:$4 sm:$0xff]   ;;  %v5696_v7 = vld [vmem:[%s8148_s23 + $0x130] ss:$8 sps:$4 sm:$0xff]   ;;  %s6568_s0 = scalar_select %p561_p10, %s6515_s28, 1 }
  0x1f   : > { %2264 = vmatprep.subr.bf16.mxu0 %v5688_v2  ;;  %v5697_v8 = vld [vmem:[%s8148_s23 + $0x144] ss:$8 sps:$4 sm:$0xff]   ;;  %v5699_v9 = vld [vmem:[%s8148_s23 + $0x140] ss:$8 sps:$4 sm:$0xff]   ;;  %v5700_v10 = vld [vmem:[%s8148_s23 + $0x154] ss:$8 sps:$4 sm:$0xff]  }
  0x20   : > { %s5456_s22 = sshll.u32 %s6568_s0, 7  ;;  %v5702_v11 = vld [vmem:[%s8148_s23 + $0x150] ss:$8 sps:$4 sm:$0xff]   ;;  %v5703_v12 = vld [vmem:[%s8148_s23 + $0x164] ss:$8 sps:$4 sm:$0xff]   ;;  %s4813_s20 = sshll.u32 %s6568_s0, 1 }
  0x21   : > { %s6583_s17 = scalar_lea.vmem %s8149_s27, %s5456_s22  ;;  %v5705_v16 = vld [vmem:[%s8148_s23 + $0x160] ss:$8 sps:$4 sm:$0xff]   ;;  %v5706_v17 = vld [vmem:[%s8148_s23 + $0x174] ss:$8 sps:$4 sm:$0xff]   ;;  %v5708_v18 = vld [vmem:[%s8148_s23 + $0x170] ss:$8 sps:$4 sm:$0xff]   ;;  %s573_s29 = scalar_lea.vmem %s8126_s16, %s4813_s20 }
  0x22   : > { %2265 = vmatpush1.bf16.msra.mxu0 %v5690_v3  ;;  %v576_v13 = vld [vmem:[%s6583_s17 + $0x8] sm:$0xff]  ;;  %v5712_v21 = vld [vmem:[%s8148_s23 + $0x194] ss:$8 sps:$4 sm:$0xff]   ;;  %v5714_v22 = vld [vmem:[%s8148_s23 + $0x190] ss:$8 sps:$4 sm:$0xff]   ;;  %s569_s30 = scalar_lea.vmem %s8125_s15, %s4813_s20  ;;  %s8151_s27 = sld [smem:[#allocation15_spill]] }
  0x23   : > { %2266 = vmatprep.subr.bf16.mxu0 %v5691_v4  ;;  %v584_v14 = vld [vmem:[%s6583_s17 + $0x48] sm:$0xff]  ;;  %v5718_v25 = vld [vmem:[%s8148_s23 + $0x1b4] ss:$8 sps:$4 sm:$0xff]   ;;  %v5720_v26 = vld [vmem:[%s8148_s23 + $0x1b0] ss:$8 sps:$4 sm:$0xff]   ;;  %s6403_s28 = smov [#allocation3]  }
  0x24   : > { %v4818_v15 = vcombine.high %v576_v13, %v584_v14  ;;  %v5709_v19 = vld [vmem:[%s8148_s23 + $0x184] ss:$8 sps:$4 sm:$0xff]   ;;  %v5711_v20 = vld [vmem:[%s8148_s23 + $0x180] ss:$8 sps:$4 sm:$0xff]   ;;  %v5724_v29 = vld [vmem:[%s8148_s23 + $0x1d4] ss:$8 sps:$4 sm:$0xff]   ;;  %v4817_v38 = vcombine.low %v576_v13, %v584_v14 }
  0x25   : > { %v5715_v23 = vld [vmem:[%s8148_s23 + $0x1a4] ss:$8 sps:$4 sm:$0xff]   ;;  %v5717_v24 = vld [vmem:[%s8148_s23 + $0x1a0] ss:$8 sps:$4 sm:$0xff]   ;;  %v5726_v30 = vld [vmem:[%s8148_s23 + $0x1d0] ss:$8 sps:$4 sm:$0xff]  }
  0x26   : > { %2267 = vmatpush1.bf16.msra.mxu0 %v5693_v5  ;;  %2294 = vmatprep.mubr.bf16.mxu0 %v4818_v15  ;;  %v5721_v27 = vld [vmem:[%s8148_s23 + $0x1c4] ss:$8 sps:$4 sm:$0xff]   ;;  %v5723_v28 = vld [vmem:[%s8148_s23 + $0x1c0] ss:$8 sps:$4 sm:$0xff]   ;;  %v5730_v33 = vld [vmem:[%s8148_s23 + $0x1f4] ss:$8 sps:$4 sm:$0xff]  }
  0x27   : > { %2268 = vmatprep.subr.bf16.mxu0 %v5694_v6  ;;  %v5727_v31 = vld [vmem:[%s8148_s23 + $0x1e4] ss:$8 sps:$4 sm:$0xff]   ;;  %v5729_v32 = vld [vmem:[%s8148_s23 + $0x1e0] ss:$8 sps:$4 sm:$0xff]   ;;  %v5732_v34 = vld [vmem:[%s8148_s23 + $0x1f0] ss:$8 sps:$4 sm:$0xff]  }
  0x28   : > { %v5735_v35 = vld [vmem:[%s8148_s23 + $0x204] ss:$8 sps:$4 sm:$0xff]   ;;  %v6654_v36 = vld [vmem:[%s6583_s17 + $0x10] sm:$0xff]  ;;  %v5733_v39 = vld [vmem:[%s8148_s23 + $0x200] ss:$8 sps:$4 sm:$0xff]   ;;  %s8152_s22 = smov %s8151_s27  ;;  %s8068_s20 = scalar_lea.hbm %s8151_s27, %s5453_s21 }
  0x29   : > { %v6657_v37 = vld [vmem:[%s6583_s17 + $0x50] sm:$0xff]  ;;  %v5741_v43 = vld [vmem:[%s8148_s23 + $0x224] ss:$8 sps:$4 sm:$0xff]   ;;  %v5739_v44 = vld [vmem:[%s8148_s23 + $0x220] ss:$8 sps:$4 sm:$0xff]   ;;  %s6342_s18 = sshll.u32 %s6403_s28, 4  ;;  %s6343_s18 = int_to_ptr.vmem [resolvable:$false] %s6342_s18 }
  0x2a   : > { %2269 = vmatpush1.bf16.msra.mxu0 %v5696_v7  ;;  %v4820_v40 = vcombine.high %v6654_v36, %v6657_v37  ;;  %v5738_v41 = vld [vmem:[%s8148_s23 + $0x214] ss:$8 sps:$4 sm:$0xff]   ;;  %v5736_v42 = vld [vmem:[%s8148_s23 + $0x210] ss:$8 sps:$4 sm:$0xff]   ;;  %v5747_v47 = vld [vmem:[%s8148_s23 + $0x244] ss:$8 sps:$4 sm:$0xff]  }
  0x2b   : > { %2270 = vmatprep.subr.bf16.mxu0 %v5697_v8  ;;  %v5744_v45 = vld [vmem:[%s8148_s23 + $0x234] ss:$8 sps:$4 sm:$0xff]   ;;  %v5742_v46 = vld [vmem:[%s8148_s23 + $0x230] ss:$8 sps:$4 sm:$0xff]   ;;  %v5745_v48 = vld [vmem:[%s8148_s23 + $0x240] ss:$8 sps:$4 sm:$0xff]  }
  0x2c   : > { %v5750_v49 = vld [vmem:[%s8148_s23 + $0x254] ss:$8 sps:$4 sm:$0xff]   ;;  %v5748_v50 = vld [vmem:[%s8148_s23 + $0x250] ss:$8 sps:$4 sm:$0xff]   ;;  %v5753_v51 = vld [vmem:[%s8148_s23 + $0x264] ss:$8 sps:$4 sm:$0xff]  }
  0x2d   : > { %v5751_v52 = vld [vmem:[%s8148_s23 + $0x260] ss:$8 sps:$4 sm:$0xff]   ;;  %v5756_v53 = vld [vmem:[%s8148_s23 + $0x274] ss:$8 sps:$4 sm:$0xff]   ;;  %v5754_v54 = vld [vmem:[%s8148_s23 + $0x270] ss:$8 sps:$4 sm:$0xff]  }
  0x2e   : > { %2271 = vmatpush1.bf16.msra.mxu0 %v5699_v9  ;;  %v5759_v55 = vld [vmem:[%s8148_s23 + $0x284] ss:$8 sps:$4 sm:$0xff]   ;;  %v5757_v56 = vld [vmem:[%s8148_s23 + $0x280] ss:$8 sps:$4 sm:$0xff]   ;;  %v5762_v57 = vld [vmem:[%s8148_s23 + $0x294] ss:$8 sps:$4 sm:$0xff]  }
  0x2f   : > { %2272 = vmatprep.subr.bf16.mxu0 %v5700_v10  ;;  %v5760_v58 = vld [vmem:[%s8148_s23 + $0x290] ss:$8 sps:$4 sm:$0xff]   ;;  %v5765_v59 = vld [vmem:[%s8148_s23 + $0x2a4] ss:$8 sps:$4 sm:$0xff]   ;;  %v5763_v60 = vld [vmem:[%s8148_s23 + $0x2a0] ss:$8 sps:$4 sm:$0xff]   ;;  %v4819_v10 = vcombine.low %v6654_v36, %v6657_v37 }
  0x30   : > { %v5768_v61 = vld [vmem:[%s8148_s23 + $0x2b4] ss:$8 sps:$4 sm:$0xff]   ;;  %v5766_v62 = vld [vmem:[%s8148_s23 + $0x2b0] ss:$8 sps:$4 sm:$0xff]   ;;  %v5771_v63 = vld [vmem:[%s8148_s23 + $0x2c4] ss:$8 sps:$4 sm:$0xff]  }
  0x31   : > { %v5769_v0 = vld [vmem:[%s8148_s23 + $0x2c0] ss:$8 sps:$4 sm:$0xff]   ;;  %v5774_v1 = vld [vmem:[%s8148_s23 + $0x2d4] ss:$8 sps:$4 sm:$0xff]   ;;  %v5772_v2 = vld [vmem:[%s8148_s23 + $0x2d0] ss:$8 sps:$4 sm:$0xff]  }
  0x32   : > { %2273 = vmatpush1.bf16.msra.mxu0 %v5702_v11  ;;  %v5777_v3 = vld [vmem:[%s8148_s23 + $0x2e4] ss:$8 sps:$4 sm:$0xff]   ;;  %v5775_v4 = vld [vmem:[%s8148_s23 + $0x2e0] ss:$8 sps:$4 sm:$0xff]   ;;  %v5780_v5 = vld [vmem:[%s8148_s23 + $0x2f4] ss:$8 sps:$4 sm:$0xff]  }
  0x33   : > { %2274 = vmatprep.subr.bf16.mxu0 %v5703_v12  ;;  %v5778_v6 = vld [vmem:[%s8148_s23 + $0x2f0] ss:$8 sps:$4 sm:$0xff]   ;;  %v5783_v7 = vld [vmem:[%s8148_s23 + $0x304] ss:$8 sps:$4 sm:$0xff]   ;;  %v5781_v11 = vld [vmem:[%s8148_s23 + $0x300] ss:$8 sps:$4 sm:$0xff]  }
  0x34   : > { %v6758_v8 = vld [vmem:[%s6583_s17 + $0x18] sm:$0xff]  ;;  %v5789_v15 = vld [vmem:[%s8148_s23 + $0x324] ss:$8 sps:$4 sm:$0xff]   ;;  %v5817_v36 = vld [vmem:[%s8148_s23 + $0x3c0] ss:$8 sps:$4 sm:$0xff]  }
  0x35   : > { %v6761_v9 = vld [vmem:[%s6583_s17 + $0x58] sm:$0xff] }
  0x36   : > { %2275 = vmatpush1.bf16.msra.mxu0 %v5705_v16  ;;  %v4822_v12 = vcombine.high %v6758_v8, %v6761_v9  ;;  %v5786_v13 = vld [vmem:[%s8148_s23 + $0x314] ss:$8 sps:$4 sm:$0xff]   ;;  %v5784_v14 = vld [vmem:[%s8148_s23 + $0x310] ss:$8 sps:$4 sm:$0xff]   ;;  %v5787_v16 = vld [vmem:[%s8148_s23 + $0x320] ss:$8 sps:$4 sm:$0xff]  }
  0x37   : > { %2276 = vmatprep.subr.bf16.mxu0 %v5706_v17  ;;  %v5792_v17 = vld [vmem:[%s8148_s23 + $0x334] ss:$8 sps:$4 sm:$0xff]  }
  0x38   : > { %v5822_v37 = vld [vmem:[%s8148_s23 + $0x3d4] ss:$8 sps:$4 sm:$0xff]  }
  0x3a   : > { %2277 = vmatpush1.bf16.msra.mxu0 %v5708_v18  ;;  %v5790_v18 = vld [vmem:[%s8148_s23 + $0x330] ss:$8 sps:$4 sm:$0xff]  }
  0x3b   : > { %2278 = vmatprep.subr.bf16.mxu0 %v5709_v19  ;;  %v5795_v19 = vld [vmem:[%s8148_s23 + $0x344] ss:$8 sps:$4 sm:$0xff]  }
  0x3e   : > { %2279 = vmatpush1.bf16.msra.mxu0 %v5711_v20  ;;  %v5793_v20 = vld [vmem:[%s8148_s23 + $0x340] ss:$8 sps:$4 sm:$0xff]  }
  0x3f   : > { %2280 = vmatprep.subr.bf16.mxu0 %v5712_v21  ;;  %v5798_v21 = vld [vmem:[%s8148_s23 + $0x354] ss:$8 sps:$4 sm:$0xff]  }
  0x42   : > { %2281 = vmatpush1.bf16.msra.mxu0 %v5714_v22  ;;  %v5796_v22 = vld [vmem:[%s8148_s23 + $0x350] ss:$8 sps:$4 sm:$0xff]  }
  0x43   : > { %2282 = vmatprep.subr.bf16.mxu0 %v5715_v23  ;;  %v5801_v23 = vld [vmem:[%s8148_s23 + $0x364] ss:$8 sps:$4 sm:$0xff]  }
  0x46   : > { %2283 = vmatpush1.bf16.msra.mxu0 %v5717_v24  ;;  %v5799_v24 = vld [vmem:[%s8148_s23 + $0x360] ss:$8 sps:$4 sm:$0xff]  }
  0x47   : > { %2284 = vmatprep.subr.bf16.mxu0 %v5718_v25  ;;  %v5804_v25 = vld [vmem:[%s8148_s23 + $0x374] ss:$8 sps:$4 sm:$0xff]  }
  0x4a   : > { %2285 = vmatpush1.bf16.msra.mxu0 %v5720_v26  ;;  %v5802_v26 = vld [vmem:[%s8148_s23 + $0x370] ss:$8 sps:$4 sm:$0xff]  }
  0x4b   : > { %2286 = vmatprep.subr.bf16.mxu0 %v5721_v27  ;;  %v5807_v27 = vld [vmem:[%s8148_s23 + $0x384] ss:$8 sps:$4 sm:$0xff]  }
  0x4e   : > { %2287 = vmatpush1.bf16.msra.mxu0 %v5723_v28  ;;  %v5805_v28 = vld [vmem:[%s8148_s23 + $0x380] ss:$8 sps:$4 sm:$0xff]  }
  0x4f   : > { %2288 = vmatprep.subr.bf16.mxu0 %v5724_v29  ;;  %v5810_v29 = vld [vmem:[%s8148_s23 + $0x394] ss:$8 sps:$4 sm:$0xff]  }
  0x52   : > { %2289 = vmatpush1.bf16.msra.mxu0 %v5726_v30  ;;  %v5808_v30 = vld [vmem:[%s8148_s23 + $0x390] ss:$8 sps:$4 sm:$0xff]  }
  0x53   : > { %2290 = vmatprep.subr.bf16.mxu0 %v5727_v31  ;;  %v5813_v31 = vld [vmem:[%s8148_s23 + $0x3a4] ss:$8 sps:$4 sm:$0xff]  }
  0x56   : > { %2291 = vmatpush1.bf16.msra.mxu0 %v5729_v32  ;;  %v5811_v32 = vld [vmem:[%s8148_s23 + $0x3a0] ss:$8 sps:$4 sm:$0xff]  }
  0x57   : > { %2292 = vmatprep.subr.bf16.mxu0 %v5730_v33  ;;  %v5816_v33 = vld [vmem:[%s8148_s23 + $0x3b4] ss:$8 sps:$4 sm:$0xff]  }
  0x5a   : > { %2293 = vmatpush1.bf16.msra.mxu0 %v5732_v34  ;;  %v5814_v34 = vld [vmem:[%s8148_s23 + $0x3b0] ss:$8 sps:$4 sm:$0xff]  }
  0x5b   : > { %2305 = vmatprep.subr.bf16.mxu0 %v5735_v35  ;;  %v5819_v35 = vld [vmem:[%s8148_s23 + $0x3c4] ss:$8 sps:$4 sm:$0xff]  }
  0x5d   : > { %2295 = vmatmul.mubr.bf16.vlgmr.msra.gmra.mrb[0].mxu0 %v4817_v38  ;;  %v5820_v38 = vld [vmem:[%s8148_s23 + $0x3d0] ss:$8 sps:$4 sm:$0xff]  }
  0x5e   : > { %2306 = vmatpush1.bf16.msra.mxu0 %v5733_v39  ;;  %2337 = vmatprep.mubr.bf16.mxu0 %v4820_v40  ;;  %v5825_v39 = vld [vmem:[%s8148_s23 + $0x3e4] ss:$8 sps:$4 sm:$0xff]   ;;  %v5823_v40 = vld [vmem:[%s8148_s23 + $0x3e0] ss:$8 sps:$4 sm:$0xff]  }
  0x5f   : > { %2307 = vmatprep.subr.bf16.mxu0 %v5738_v41  ;;  %v5828_v41 = vld [vmem:[%s8148_s23 + $0x3f4] ss:$8 sps:$4 sm:$0xff]  }
  0x62   : > { %2308 = vmatpush1.bf16.msra.mxu0 %v5736_v42  ;;  %v5826_v42 = vld [vmem:[%s8148_s23 + $0x3f0] ss:$8 sps:$4 sm:$0xff]  }
  0x63   : > { %2309 = vmatprep.subr.bf16.mxu0 %v5741_v43  ;;  %v5831_v43 = vld [vmem:[%s8148_s23 + $0x404] ss:$8 sps:$4 sm:$0xff]  }
  0x66   : > { %2310 = vmatpush1.bf16.msra.mxu0 %v5739_v44  ;;  %v6864_v44 = vld [vmem:[%s6583_s17 + $0x20] sm:$0xff] }
  0x67   : > { %2311 = vmatprep.subr.bf16.mxu0 %v5744_v45  ;;  %v6867_v45 = vld [vmem:[%s6583_s17 + $0x60] sm:$0xff] }
  0x6a   : > { %2312 = vmatpush1.bf16.msra.mxu0 %v5742_v46  ;;  %v4821_v46 = vcombine.low %v6758_v8, %v6761_v9  ;;  %v5865_v8 = vld [vmem:[%s8148_s23 + $0x4c0] ss:$8 sps:$4 sm:$0xff]   ;;  %v5870_v9 = vld [vmem:[%s8148_s23 + $0x4d4] ss:$8 sps:$4 sm:$0xff]  }
  0x6b   : > { %2313 = vmatprep.subr.bf16.mxu0 %v5747_v47  ;;  %v5829_v47 = vld [vmem:[%s8148_s23 + $0x400] ss:$8 sps:$4 sm:$0xff]  }
  0x6e   : > { %2314 = vmatpush1.bf16.msra.mxu0 %v5745_v48  ;;  %v4824_v48 = vcombine.high %v6864_v44, %v6867_v45 }
  0x6f   : > { %2315 = vmatprep.subr.bf16.mxu0 %v5750_v49  ;;  %v5834_v49 = vld [vmem:[%s8148_s23 + $0x414] ss:$8 sps:$4 sm:$0xff]  }
  0x72   : > { %2316 = vmatpush1.bf16.msra.mxu0 %v5748_v50  ;;  %v5832_v50 = vld [vmem:[%s8148_s23 + $0x410] ss:$8 sps:$4 sm:$0xff]  }
  0x73   : > { %2317 = vmatprep.subr.bf16.mxu0 %v5753_v51  ;;  %v5837_v51 = vld [vmem:[%s8148_s23 + $0x424] ss:$8 sps:$4 sm:$0xff]  }
  0x76   : > { %2318 = vmatpush1.bf16.msra.mxu0 %v5751_v52  ;;  %v5835_v52 = vld [vmem:[%s8148_s23 + $0x420] ss:$8 sps:$4 sm:$0xff]  }
  0x77   : > { %2319 = vmatprep.subr.bf16.mxu0 %v5756_v53  ;;  %v5840_v53 = vld [vmem:[%s8148_s23 + $0x434] ss:$8 sps:$4 sm:$0xff]  }
  0x7a   : > { %2320 = vmatpush1.bf16.msra.mxu0 %v5754_v54  ;;  %v5838_v54 = vld [vmem:[%s8148_s23 + $0x430] ss:$8 sps:$4 sm:$0xff]  }
  0x7b   : > { %2321 = vmatprep.subr.bf16.mxu0 %v5759_v55  ;;  %v5843_v55 = vld [vmem:[%s8148_s23 + $0x444] ss:$8 sps:$4 sm:$0xff]  }
  0x7e   : > { %2322 = vmatpush1.bf16.msra.mxu0 %v5757_v56  ;;  %v5841_v56 = vld [vmem:[%s8148_s23 + $0x440] ss:$8 sps:$4 sm:$0xff]  }
  0x7f   : > { %2323 = vmatprep.subr.bf16.mxu0 %v5762_v57  ;;  %v5846_v57 = vld [vmem:[%s8148_s23 + $0x454] ss:$8 sps:$4 sm:$0xff]  }
  0x82   : > { %2324 = vmatpush1.bf16.msra.mxu0 %v5760_v58  ;;  %v5844_v58 = vld [vmem:[%s8148_s23 + $0x450] ss:$8 sps:$4 sm:$0xff]  }
  0x83   : > { %2325 = vmatprep.subr.bf16.mxu0 %v5765_v59  ;;  %v5849_v59 = vld [vmem:[%s8148_s23 + $0x464] ss:$8 sps:$4 sm:$0xff]  }
  0x86   : > { %2326 = vmatpush1.bf16.msra.mxu0 %v5763_v60  ;;  %v5847_v60 = vld [vmem:[%s8148_s23 + $0x460] ss:$8 sps:$4 sm:$0xff]  }
  0x87   : > { %2327 = vmatprep.subr.bf16.mxu0 %v5768_v61  ;;  %v5852_v61 = vld [vmem:[%s8148_s23 + $0x474] ss:$8 sps:$4 sm:$0xff]  }
  0x8a   : > { %2328 = vmatpush1.bf16.msra.mxu0 %v5766_v62  ;;  %v5850_v62 = vld [vmem:[%s8148_s23 + $0x470] ss:$8 sps:$4 sm:$0xff]  }
  0x8b   : > { %2329 = vmatprep.subr.bf16.mxu0 %v5771_v63  ;;  %v5855_v63 = vld [vmem:[%s8148_s23 + $0x484] ss:$8 sps:$4 sm:$0xff]  }
  0x8e   : > { %2330 = vmatpush1.bf16.msra.mxu0 %v5769_v0  ;;  %v5853_v0 = vld [vmem:[%s8148_s23 + $0x480] ss:$8 sps:$4 sm:$0xff]  }
  0x8f   : > { %2331 = vmatprep.subr.bf16.mxu0 %v5774_v1  ;;  %v5858_v1 = vld [vmem:[%s8148_s23 + $0x494] ss:$8 sps:$4 sm:$0xff]  }
  0x92   : > { %2332 = vmatpush1.bf16.msra.mxu0 %v5772_v2  ;;  %v5856_v2 = vld [vmem:[%s8148_s23 + $0x490] ss:$8 sps:$4 sm:$0xff]  }
  0x93   : > { %2333 = vmatprep.subr.bf16.mxu0 %v5777_v3  ;;  %v5861_v3 = vld [vmem:[%s8148_s23 + $0x4a4] ss:$8 sps:$4 sm:$0xff]  }
  0x96   : > { %2334 = vmatpush1.bf16.msra.mxu0 %v5775_v4  ;;  %v5859_v4 = vld [vmem:[%s8148_s23 + $0x4a0] ss:$8 sps:$4 sm:$0xff]  }
  0x97   : > { %2335 = vmatprep.subr.bf16.mxu0 %v5780_v5  ;;  %v5864_v5 = vld [vmem:[%s8148_s23 + $0x4b4] ss:$8 sps:$4 sm:$0xff]  }
  0x9a   : > { %2336 = vmatpush1.bf16.msra.mxu0 %v5778_v6  ;;  %v5862_v6 = vld [vmem:[%s8148_s23 + $0x4b0] ss:$8 sps:$4 sm:$0xff]  }
  0x9b   : > { %2348 = vmatprep.subr.bf16.mxu0 %v5783_v7  ;;  %v5867_v7 = vld [vmem:[%s8148_s23 + $0x4c4] ss:$8 sps:$4 sm:$0xff]  }
  0x9d   : > { %2338 = vmatmul.mubr.bf16.vlgmr.msra.gmra.mrb[0].mxu0 %v4819_v10  ;;  %v5868_v10 = vld [vmem:[%s8148_s23 + $0x4d0] ss:$8 sps:$4 sm:$0xff]  }
  0x9e   : > { %2349 = vmatpush1.bf16.msra.mxu0 %v5781_v11  ;;  %2380 = vmatprep.mubr.bf16.mxu0 %v4822_v12  ;;  %v5873_v11 = vld [vmem:[%s8148_s23 + $0x4e4] ss:$8 sps:$4 sm:$0xff]   ;;  %v5871_v12 = vld [vmem:[%s8148_s23 + $0x4e0] ss:$8 sps:$4 sm:$0xff]  }
  0x9f   : > { %2350 = vmatprep.subr.bf16.mxu0 %v5786_v13  ;;  %v5876_v13 = vld [vmem:[%s8148_s23 + $0x4f4] ss:$8 sps:$4 sm:$0xff]  }
  0xa2   : > { %2351 = vmatpush1.bf16.msra.mxu0 %v5784_v14  ;;  %v5874_v14 = vld [vmem:[%s8148_s23 + $0x4f0] ss:$8 sps:$4 sm:$0xff]  }
  0xa3   : > { %2352 = vmatprep.subr.bf16.mxu0 %v5789_v15  ;;  %v5879_v15 = vld [vmem:[%s8148_s23 + $0x504] ss:$8 sps:$4 sm:$0xff]  }
  0xa6   : > { %2353 = vmatpush1.bf16.msra.mxu0 %v5787_v16  ;;  %v6970_v16 = vld [vmem:[%s6583_s17 + $0x28] sm:$0xff] }
  0xa7   : > { %2354 = vmatprep.subr.bf16.mxu0 %v5792_v17  ;;  %v5970_v17 = vld [vmem:[%s8148_s23 + $0x4] ss:$8 sps:$4 sm:$0xff]  }
  0xa8   : > { %2219 = vmatprep.subr.bf16.mxu1 %v5970_v17  ;;  %v6062_v17 = vld [vmem:[%s8148_s23 + $0xf0] ss:$8 sps:$4 sm:$0xff]  }
  0xaa   : > { %2355 = vmatpush1.bf16.msra.mxu0 %v5790_v18  ;;  %v5972_v18 = vld [vmem:[%s8148_s23] ss:$8 sps:$4 sm:$0xff]  }
  0xab   : > { %2356 = vmatprep.subr.bf16.mxu0 %v5795_v19  ;;  %v6979_v19 = vld [vmem:[%s6583_s17 + $0x68] sm:$0xff]  ;;  %2220 = vmatpush1.bf16.msra.mxu1 %v5972_v18  ;;  %v5924_v18 = vld [vmem:[%s8148_s23 + $0x5f4] ss:$8 sps:$4 sm:$0xff]  }
  0xae   : > { %2357 = vmatpush1.bf16.msra.mxu0 %v5793_v20  ;;  %v4823_v20 = vcombine.low %v6864_v44, %v6867_v45  ;;  %v6008_v44 = vld [vmem:[%s8148_s23 + $0x60] ss:$8 sps:$4 sm:$0xff]   ;;  %v5897_v45 = vld [vmem:[%s8148_s23 + $0x564] ss:$8 sps:$4 sm:$0xff]  }
  0xaf   : > { %2358 = vmatprep.subr.bf16.mxu0 %v5798_v21  ;;  %v5877_v21 = vld [vmem:[%s8148_s23 + $0x500] ss:$8 sps:$4 sm:$0xff]  }
  0xb2   : > { %2359 = vmatpush1.bf16.msra.mxu0 %v5796_v22  ;;  %v4826_v22 = vcombine.high %v6970_v16, %v6979_v19 }
  0xb3   : > { %2360 = vmatprep.subr.bf16.mxu0 %v5801_v23  ;;  %v5976_v23 = vld [vmem:[%s8148_s23 + $0x14] ss:$8 sps:$4 sm:$0xff]  }
  0xb4   : > { %2221 = vmatprep.subr.bf16.mxu1 %v5976_v23  ;;  %v5922_v23 = vld [vmem:[%s8148_s23 + $0x5f0] ss:$8 sps:$4 sm:$0xff]  }
  0xb6   : > { %2361 = vmatpush1.bf16.msra.mxu0 %v5799_v24  ;;  %v5978_v24 = vld [vmem:[%s8148_s23 + $0x10] ss:$8 sps:$4 sm:$0xff]  }
  0xb7   : > { %2362 = vmatprep.subr.bf16.mxu0 %v5804_v25  ;;  %v5882_v25 = vld [vmem:[%s8148_s23 + $0x514] ss:$8 sps:$4 sm:$0xff]   ;;  %2222 = vmatpush1.bf16.msra.mxu1 %v5978_v24 }
  0xba   : > { %2363 = vmatpush1.bf16.msra.mxu0 %v5802_v26  ;;  %v5880_v26 = vld [vmem:[%s8148_s23 + $0x510] ss:$8 sps:$4 sm:$0xff]  }
  0xbb   : > { %2364 = vmatprep.subr.bf16.mxu0 %v5807_v27  ;;  %v5982_v27 = vld [vmem:[%s8148_s23 + $0x24] ss:$8 sps:$4 sm:$0xff]  }
  0xbc   : > { %2223 = vmatprep.subr.bf16.mxu1 %v5982_v27  ;;  %v7177_v27 = vld [vmem:[%s6583_s17 + $0x70] sm:$0xff] }
  0xbe   : > { %2365 = vmatpush1.bf16.msra.mxu0 %v5805_v28  ;;  %v5984_v28 = vld [vmem:[%s8148_s23 + $0x20] ss:$8 sps:$4 sm:$0xff]  }
  0xbf   : > { %2366 = vmatprep.subr.bf16.mxu0 %v5810_v29  ;;  %v5885_v29 = vld [vmem:[%s8148_s23 + $0x524] ss:$8 sps:$4 sm:$0xff]   ;;  %2224 = vmatpush1.bf16.msra.mxu1 %v5984_v28  ;;  %v4825_v28 = vcombine.low %v6970_v16, %v6979_v19  ;;  %v5928_v16 = vld [vmem:[%s8148_s23 + $0x610] ss:$8 sps:$4 sm:$0xff]  }
  0xc0   : > { %v5933_v19 = vld [vmem:[%s8148_s23 + $0x624] ss:$8 sps:$4 sm:$0xff]  }
  0xc2   : > { %2367 = vmatpush1.bf16.msra.mxu0 %v5808_v30  ;;  %v5883_v30 = vld [vmem:[%s8148_s23 + $0x520] ss:$8 sps:$4 sm:$0xff]  }
  0xc3   : > { %2368 = vmatprep.subr.bf16.mxu0 %v5813_v31  ;;  %v5988_v31 = vld [vmem:[%s8148_s23 + $0x34] ss:$8 sps:$4 sm:$0xff]  }
  0xc4   : > { %2225 = vmatprep.subr.bf16.mxu1 %v5988_v31  ;;  %v5930_v31 = vld [vmem:[%s8148_s23 + $0x614] ss:$8 sps:$4 sm:$0xff]  }
  0xc6   : > { %2369 = vmatpush1.bf16.msra.mxu0 %v5811_v32  ;;  %v5990_v32 = vld [vmem:[%s8148_s23 + $0x30] ss:$8 sps:$4 sm:$0xff]  }
  0xc7   : > { %2370 = vmatprep.subr.bf16.mxu0 %v5816_v33  ;;  %v5888_v33 = vld [vmem:[%s8148_s23 + $0x534] ss:$8 sps:$4 sm:$0xff]   ;;  %2226 = vmatpush1.bf16.msra.mxu1 %v5990_v32  ;;  %v6069_v32 = vld [vmem:[%s8113_s3 + $0xc0] sm:$0xff]  }
  0xca   : > { %2371 = vmatpush1.bf16.msra.mxu0 %v5814_v34  ;;  %v5886_v34 = vld [vmem:[%s8148_s23 + $0x530] ss:$8 sps:$4 sm:$0xff]  }
  0xcb   : > { %2372 = vmatprep.subr.bf16.mxu0 %v5819_v35  ;;  %v5994_v35 = vld [vmem:[%s8148_s23 + $0x44] ss:$8 sps:$4 sm:$0xff]  }
  0xcc   : > { %2227 = vmatprep.subr.bf16.mxu1 %v5994_v35  ;;  %v5934_v35 = vld [vmem:[%s8148_s23 + $0x630] ss:$8 sps:$4 sm:$0xff]  }
  0xce   : > { %2373 = vmatpush1.bf16.msra.mxu0 %v5817_v36  ;;  %v5996_v36 = vld [vmem:[%s8148_s23 + $0x40] ss:$8 sps:$4 sm:$0xff]  }
  0xcf   : > { %2374 = vmatprep.subr.bf16.mxu0 %v5822_v37  ;;  %v5891_v37 = vld [vmem:[%s8148_s23 + $0x544] ss:$8 sps:$4 sm:$0xff]   ;;  %2228 = vmatpush1.bf16.msra.mxu1 %v5996_v36 }
  0xd0   : > { %v5939_v36 = vld [vmem:[%s8148_s23 + $0x644] ss:$8 sps:$4 sm:$0xff]  }
  0xd2   : > { %2375 = vmatpush1.bf16.msra.mxu0 %v5820_v38  ;;  %v5889_v38 = vld [vmem:[%s8148_s23 + $0x540] ss:$8 sps:$4 sm:$0xff]  }
  0xd3   : > { %2376 = vmatprep.subr.bf16.mxu0 %v5825_v39  ;;  %v6000_v39 = vld [vmem:[%s8148_s23 + $0x54] ss:$8 sps:$4 sm:$0xff]  }
  0xd4   : > { %2229 = vmatprep.subr.bf16.mxu1 %v6000_v39  ;;  %v5940_v39 = vld [vmem:[%s8148_s23 + $0x650] ss:$8 sps:$4 sm:$0xff]  }
  0xd6   : > { %2377 = vmatpush1.bf16.msra.mxu0 %v5823_v40  ;;  %v6002_v40 = vld [vmem:[%s8148_s23 + $0x50] ss:$8 sps:$4 sm:$0xff]  }
  0xd7   : > { %2378 = vmatprep.subr.bf16.mxu0 %v5828_v41  ;;  %v5894_v41 = vld [vmem:[%s8148_s23 + $0x554] ss:$8 sps:$4 sm:$0xff]   ;;  %2230 = vmatpush1.bf16.msra.mxu1 %v6002_v40  ;;  %v5945_v40 = vld [vmem:[%s8148_s23 + $0x664] ss:$8 sps:$4 sm:$0xff]  }
  0xda   : > { %2379 = vmatpush1.bf16.msra.mxu0 %v5826_v42  ;;  %v5892_v42 = vld [vmem:[%s8148_s23 + $0x550] ss:$8 sps:$4 sm:$0xff]  }
  0xdb   : > { %2391 = vmatprep.subr.bf16.mxu0 %v5831_v43  ;;  %v6006_v43 = vld [vmem:[%s8148_s23 + $0x64] ss:$8 sps:$4 sm:$0xff]  }
  0xdc   : > { %2231 = vmatprep.subr.bf16.mxu1 %v6006_v43  ;;  %v5946_v43 = vld [vmem:[%s8148_s23 + $0x670] ss:$8 sps:$4 sm:$0xff]  }
  0xdd   : > { %2381 = vmatmul.mubr.bf16.vlgmr.msra.gmra.mrb[0].mxu0 %v4821_v46  ;;  %2232 = vmatpush1.bf16.msra.mxu1 %v6008_v44  ;;  %v5895_v46 = vld [vmem:[%s8148_s23 + $0x560] ss:$8 sps:$4 sm:$0xff]   ;;  %v5951_v44 = vld [vmem:[%s8148_s23 + $0x684] ss:$8 sps:$4 sm:$0xff]  }
  0xde   : > { %2392 = vmatpush1.bf16.msra.mxu0 %v5829_v47  ;;  %2423 = vmatprep.mubr.bf16.mxu0 %v4824_v48  ;;  %v6012_v47 = vld [vmem:[%s8148_s23 + $0x74] ss:$8 sps:$4 sm:$0xff]   ;;  %v6014_v48 = vld [vmem:[%s8148_s23 + $0x70] ss:$8 sps:$4 sm:$0xff]  }
  0xdf   : > { %2393 = vmatprep.subr.bf16.mxu0 %v5834_v49  ;;  %v5900_v49 = vld [vmem:[%s8148_s23 + $0x574] ss:$8 sps:$4 sm:$0xff]   ;;  %2233 = vmatprep.subr.bf16.mxu1 %v6012_v47  ;;  %v5952_v47 = vld [vmem:[%s8148_s23 + $0x690] ss:$8 sps:$4 sm:$0xff]  }
  0xe1   : > { %2234 = vmatpush1.bf16.msra.mxu1 %v6014_v48  ;;  %v5957_v48 = vld [vmem:[%s8148_s23 + $0x6a4] ss:$8 sps:$4 sm:$0xff]  }
  0xe2   : > { %2394 = vmatpush1.bf16.msra.mxu0 %v5832_v50  ;;  %v5898_v50 = vld [vmem:[%s8148_s23 + $0x570] ss:$8 sps:$4 sm:$0xff]  }
  0xe3   : > { %2395 = vmatprep.subr.bf16.mxu0 %v5837_v51  ;;  %v6018_v51 = vld [vmem:[%s8148_s23 + $0x84] ss:$8 sps:$4 sm:$0xff]  }
  0xe4   : > { %2235 = vmatprep.subr.bf16.mxu1 %v6018_v51  ;;  %v5958_v51 = vld [vmem:[%s8148_s23 + $0x6b0] ss:$8 sps:$4 sm:$0xff]  }
  0xe6   : > { %2396 = vmatpush1.bf16.msra.mxu0 %v5835_v52  ;;  %v6020_v52 = vld [vmem:[%s8148_s23 + $0x80] ss:$8 sps:$4 sm:$0xff]  }
  0xe7   : > { %2397 = vmatprep.subr.bf16.mxu0 %v5840_v53  ;;  %v5903_v53 = vld [vmem:[%s8148_s23 + $0x584] ss:$8 sps:$4 sm:$0xff]   ;;  %2236 = vmatpush1.bf16.msra.mxu1 %v6020_v52 }
  0xe8   : > { %v5963_v52 = vld [vmem:[%s8148_s23 + $0x6c4] ss:$8 sps:$4 sm:$0xff]  }
  0xea   : > { %2398 = vmatpush1.bf16.msra.mxu0 %v5838_v54  ;;  %v5901_v54 = vld [vmem:[%s8148_s23 + $0x580] ss:$8 sps:$4 sm:$0xff]  }
  0xeb   : > { %2399 = vmatprep.subr.bf16.mxu0 %v5843_v55  ;;  %v6024_v55 = vld [vmem:[%s8148_s23 + $0x94] ss:$8 sps:$4 sm:$0xff]  }
  0xec   : > { %2237 = vmatprep.subr.bf16.mxu1 %v6024_v55  ;;  %v5964_v55 = vld [vmem:[%s8148_s23 + $0x6d0] ss:$8 sps:$4 sm:$0xff]  }
  0xee   : > { %2400 = vmatpush1.bf16.msra.mxu0 %v5841_v56  ;;  %v6026_v56 = vld [vmem:[%s8148_s23 + $0x90] ss:$8 sps:$4 sm:$0xff]  }
  0xef   : > { %2401 = vmatprep.subr.bf16.mxu0 %v5846_v57  ;;  %v5906_v57 = vld [vmem:[%s8148_s23 + $0x594] ss:$8 sps:$4 sm:$0xff]   ;;  %2238 = vmatpush1.bf16.msra.mxu1 %v6026_v56  ;;  %v5969_v56 = vld [vmem:[%s8148_s23 + $0x6e4] ss:$8 sps:$4 sm:$0xff]  }
  0xf2   : > { %2402 = vmatpush1.bf16.msra.mxu0 %v5844_v58  ;;  %v5904_v58 = vld [vmem:[%s8148_s23 + $0x590] ss:$8 sps:$4 sm:$0xff]  }
  0xf3   : > { %2403 = vmatprep.subr.bf16.mxu0 %v5849_v59  ;;  %v6030_v59 = vld [vmem:[%s8148_s23 + $0xa4] ss:$8 sps:$4 sm:$0xff]  }
  0xf4   : > { %2239 = vmatprep.subr.bf16.mxu1 %v6030_v59  ;;  %v5973_v59 = vld [vmem:[%s8148_s23 + $0x6f0] ss:$8 sps:$4 sm:$0xff]  }
  0xf6   : > { %2404 = vmatpush1.bf16.msra.mxu0 %v5847_v60  ;;  %v6032_v60 = vld [vmem:[%s8148_s23 + $0xa0] ss:$8 sps:$4 sm:$0xff]  }
  0xf7   : > { %2405 = vmatprep.subr.bf16.mxu0 %v5852_v61  ;;  %v5909_v61 = vld [vmem:[%s8148_s23 + $0x5a4] ss:$8 sps:$4 sm:$0xff]   ;;  %2240 = vmatpush1.bf16.msra.mxu1 %v6032_v60 }
  0xf8   : > { %v5981_v60 = vld [vmem:[%s8148_s23 + $0x704] ss:$8 sps:$4 sm:$0xff]  }
  0xfa   : > { %2406 = vmatpush1.bf16.msra.mxu0 %v5850_v62  ;;  %v5907_v62 = vld [vmem:[%s8148_s23 + $0x5a0] ss:$8 sps:$4 sm:$0xff]  }
  0xfb   : > { %2407 = vmatprep.subr.bf16.mxu0 %v5855_v63  ;;  %v6036_v63 = vld [vmem:[%s8148_s23 + $0xb4] ss:$8 sps:$4 sm:$0xff]  }
  0xfc   : > { %2241 = vmatprep.subr.bf16.mxu1 %v6036_v63 }
  0xfe   : > { %2408 = vmatpush1.bf16.msra.mxu0 %v5853_v0  ;;  %v6038_v0 = vld [vmem:[%s8148_s23 + $0xb0] ss:$8 sps:$4 sm:$0xff]  }
  0xff   : > { %2409 = vmatprep.subr.bf16.mxu0 %v5858_v1  ;;  %v5912_v1 = vld [vmem:[%s8148_s23 + $0x5b4] ss:$8 sps:$4 sm:$0xff]   ;;  %2242 = vmatpush1.bf16.msra.mxu1 %v6038_v0  ;;  %v5979_v0 = vld [vmem:[%s8148_s23 + $0x700] ss:$8 sps:$4 sm:$0xff]  }
 0x102   : > { %2410 = vmatpush1.bf16.msra.mxu0 %v5856_v2  ;;  %v5910_v2 = vld [vmem:[%s8148_s23 + $0x5b0] ss:$8 sps:$4 sm:$0xff]  }
 0x103   : > { %2411 = vmatprep.subr.bf16.mxu0 %v5861_v3  ;;  %v6042_v3 = vld [vmem:[%s8148_s23 + $0xc4] ss:$8 sps:$4 sm:$0xff]  }
 0x104   : > { %2243 = vmatprep.subr.bf16.mxu1 %v6042_v3  ;;  %v5985_v3 = vld [vmem:[%s8148_s23 + $0x710] ss:$8 sps:$4 sm:$0xff]  }
 0x106   : > { %2412 = vmatpush1.bf16.msra.mxu0 %v5859_v4  ;;  %v6044_v4 = vld [vmem:[%s8148_s23 + $0xc0] ss:$8 sps:$4 sm:$0xff]  }
 0x107   : > { %2413 = vmatprep.subr.bf16.mxu0 %v5864_v5  ;;  %v5915_v5 = vld [vmem:[%s8148_s23 + $0x5c4] ss:$8 sps:$4 sm:$0xff]   ;;  %2244 = vmatpush1.bf16.msra.mxu1 %v6044_v4 }
 0x108   : > { %v5993_v4 = vld [vmem:[%s8148_s23 + $0x724] ss:$8 sps:$4 sm:$0xff]  }
 0x10a   : > { %2414 = vmatpush1.bf16.msra.mxu0 %v5862_v6  ;;  %v5913_v6 = vld [vmem:[%s8148_s23 + $0x5c0] ss:$8 sps:$4 sm:$0xff]  }
 0x10b   : > { %2415 = vmatprep.subr.bf16.mxu0 %v5867_v7  ;;  %v6048_v7 = vld [vmem:[%s8148_s23 + $0xd4] ss:$8 sps:$4 sm:$0xff]  }
 0x10c   : > { %2245 = vmatprep.subr.bf16.mxu1 %v6048_v7  ;;  %v5997_v7 = vld [vmem:[%s8148_s23 + $0x730] ss:$8 sps:$4 sm:$0xff]  }
 0x10e   : > { %2416 = vmatpush1.bf16.msra.mxu0 %v5865_v8  ;;  %v6050_v8 = vld [vmem:[%s8148_s23 + $0xd0] ss:$8 sps:$4 sm:$0xff]  }
 0x10f   : > { %2417 = vmatprep.subr.bf16.mxu0 %v5870_v9  ;;  %v5918_v9 = vld [vmem:[%s8148_s23 + $0x5d4] ss:$8 sps:$4 sm:$0xff]   ;;  %2246 = vmatpush1.bf16.msra.mxu1 %v6050_v8  ;;  %v6005_v8 = vld [vmem:[%s8148_s23 + $0x744] ss:$8 sps:$4 sm:$0xff]  }
 0x112   : > { %2418 = vmatpush1.bf16.msra.mxu0 %v5868_v10  ;;  %v5916_v10 = vld [vmem:[%s8148_s23 + $0x5d0] ss:$8 sps:$4 sm:$0xff]  }
 0x113   : > { %2419 = vmatprep.subr.bf16.mxu0 %v5873_v11  ;;  %v6054_v11 = vld [vmem:[%s8148_s23 + $0xe4] ss:$8 sps:$4 sm:$0xff]  }
 0x114   : > { %2247 = vmatprep.subr.bf16.mxu1 %v6054_v11  ;;  %v6070_v11 = vld [vmem:[%s8113_s3 + $0x80] sm:$0xff]  }
 0x116   : > { %2420 = vmatpush1.bf16.msra.mxu0 %v5871_v12  ;;  %v6056_v12 = vld [vmem:[%s8148_s23 + $0xe0] ss:$8 sps:$4 sm:$0xff]  }
 0x117   : > { %2421 = vmatprep.subr.bf16.mxu0 %v5876_v13  ;;  %v5921_v13 = vld [vmem:[%s8148_s23 + $0x5e4] ss:$8 sps:$4 sm:$0xff]   ;;  %2248 = vmatpush1.bf16.msra.mxu1 %v6056_v12  ;;  %v6009_v12 = vld [vmem:[%s8148_s23 + $0x750] ss:$8 sps:$4 sm:$0xff]  }
 0x11a   : > { %2422 = vmatpush1.bf16.msra.mxu0 %v5874_v14  ;;  %v5919_v14 = vld [vmem:[%s8148_s23 + $0x5e0] ss:$8 sps:$4 sm:$0xff]  }
 0x11b   : > { %2434 = vmatprep.subr.bf16.mxu0 %v5879_v15  ;;  %v6060_v15 = vld [vmem:[%s8148_s23 + $0xf4] ss:$8 sps:$4 sm:$0xff]  }
 0x11c   : > { %2249 = vmatprep.subr.bf16.mxu1 %v6060_v15  ;;  %v6072_v15 = vld [vmem:[%s8113_s3 + $0x88] sm:$0xff]  }
 0x11d   : > { %2424 = vmatmul.mubr.bf16.vlgmr.msra.gmra.mrb[0].mxu0 %v4823_v20  ;;  %v575_v20 = vld [vmem:[%s6583_s17] sm:$0xff]  ;;  %2250 = vmatpush1.bf16.msra.mxu1 %v6062_v17 }
 0x11e   : > { %2435 = vmatpush1.bf16.msra.mxu0 %v5877_v21  ;;  %2466 = vmatprep.mubr.bf16.mxu0 %v4826_v22  ;;  %v583_v21 = vld [vmem:[%s6583_s17 + $0x40] sm:$0xff] }
 0x11f   : > { %2436 = vmatprep.subr.bf16.mxu0 %v5882_v25  ;;  %v4816_v22 = vcombine.high %v575_v20, %v583_v21  ;;  %v4815_v24 = vcombine.low %v575_v20, %v583_v21  ;;  %v5927_v25 = vld [vmem:[%s8148_s23 + $0x604] ss:$8 sps:$4 sm:$0xff]   ;;  %5459 = vmatprep.subr.bf16.mxu1 %v6069_v32  ;;  %v6015_v17 = vld [vmem:[%s8148_s23 + $0x760] ss:$8 sps:$4 sm:$0xff]   ;;  %v6021_v20 = vld [vmem:[%s8148_s23 + $0x770] ss:$8 sps:$4 sm:$0xff]  }
 0x120   : > { %v6029_v21 = vld [vmem:[%s8148_s23 + $0x784] ss:$8 sps:$4 sm:$0xff]   ;;  %v6057_v32 = vld [vmem:[%s8148_s23 + $0x7d0] ss:$8 sps:$4 sm:$0xff]  }
 0x121   : > { %2251 = vmatprep.mubr.bf16.mxu1 %v4816_v22  ;;  %v6027_v22 = vld [vmem:[%s8148_s23 + $0x780] ss:$8 sps:$4 sm:$0xff]  }
 0x122   : > { %2437 = vmatpush1.bf16.msra.mxu0 %v5880_v26  ;;  %v7174_v26 = vld [vmem:[%s6583_s17 + $0x30] sm:$0xff]  ;;  %2252 = vmatmul.mubr.bf16.vlgmr.msra.gmra.mrb[0].mxu1 %v4815_v24 }
 0x123   : > { %2438 = vmatprep.subr.bf16.mxu0 %v5885_v29  ;;  %v5925_v29 = vld [vmem:[%s8148_s23 + $0x600] ss:$8 sps:$4 sm:$0xff]   ;;  %v4827_v63 = vcombine.low %v7174_v26, %v7177_v27  ;;  %5460 = vmatpush3.bf16.msra.mxu1 %v6070_v11  ;;  %v6033_v24 = vld [vmem:[%s8148_s23 + $0x790] ss:$8 sps:$4 sm:$0xff]  }
 0x126   : > { %2439 = vmatpush1.bf16.msra.mxu0 %v5883_v30  ;;  %v4828_v30 = vcombine.high %v7174_v26, %v7177_v27  ;;  %v6039_v26 = vld [vmem:[%s8148_s23 + $0x7a0] ss:$8 sps:$4 sm:$0xff]   ;;  %v6047_v27 = vld [vmem:[%s8148_s23 + $0x7b4] ss:$8 sps:$4 sm:$0xff]  }
 0x127   : > { %2440 = vmatprep.subr.bf16.mxu0 %v5888_v33  ;;  %v5931_v33 = vld [vmem:[%s8148_s23 + $0x620] ss:$8 sps:$4 sm:$0xff]  }
 0x12a   : > { %2441 = vmatpush1.bf16.msra.mxu0 %v5886_v34  ;;  %v5936_v34 = vld [vmem:[%s8148_s23 + $0x634] ss:$8 sps:$4 sm:$0xff]  }
 0x12b   : > { %2442 = vmatprep.subr.bf16.mxu0 %v5891_v37  ;;  %v5937_v37 = vld [vmem:[%s8148_s23 + $0x640] ss:$8 sps:$4 sm:$0xff]  }
 0x12e   : > { %2443 = vmatpush1.bf16.msra.mxu0 %v5889_v38  ;;  %v5942_v38 = vld [vmem:[%s8148_s23 + $0x654] ss:$8 sps:$4 sm:$0xff]  }
 0x12f   : > { %2444 = vmatprep.subr.bf16.mxu0 %v5894_v41  ;;  %v5943_v41 = vld [vmem:[%s8148_s23 + $0x660] ss:$8 sps:$4 sm:$0xff]  }
 0x132   : > { %2445 = vmatpush1.bf16.msra.mxu0 %v5892_v42  ;;  %v5948_v42 = vld [vmem:[%s8148_s23 + $0x674] ss:$8 sps:$4 sm:$0xff]  }
 0x133   : > { %2446 = vmatprep.subr.bf16.mxu0 %v5897_v45  ;;  %v5949_v45 = vld [vmem:[%s8148_s23 + $0x680] ss:$8 sps:$4 sm:$0xff]  }
 0x136   : > { %2447 = vmatpush1.bf16.msra.mxu0 %v5895_v46  ;;  %v5954_v46 = vld [vmem:[%s8148_s23 + $0x694] ss:$8 sps:$4 sm:$0xff]  }
 0x137   : > { %2448 = vmatprep.subr.bf16.mxu0 %v5900_v49  ;;  %v5955_v49 = vld [vmem:[%s8148_s23 + $0x6a0] ss:$8 sps:$4 sm:$0xff]  }
 0x13a   : > { %2449 = vmatpush1.bf16.msra.mxu0 %v5898_v50  ;;  %v5960_v50 = vld [vmem:[%s8148_s23 + $0x6b4] ss:$8 sps:$4 sm:$0xff]  }
 0x13b   : > { %2450 = vmatprep.subr.bf16.mxu0 %v5903_v53  ;;  %v5961_v53 = vld [vmem:[%s8148_s23 + $0x6c0] ss:$8 sps:$4 sm:$0xff]  }
 0x13e   : > { %2451 = vmatpush1.bf16.msra.mxu0 %v5901_v54  ;;  %v5966_v54 = vld [vmem:[%s8148_s23 + $0x6d4] ss:$8 sps:$4 sm:$0xff]  }
 0x13f   : > { %2452 = vmatprep.subr.bf16.mxu0 %v5906_v57  ;;  %v5967_v57 = vld [vmem:[%s8148_s23 + $0x6e0] ss:$8 sps:$4 sm:$0xff]  }
 0x142   : > { %2453 = vmatpush1.bf16.msra.mxu0 %v5904_v58  ;;  %v5975_v58 = vld [vmem:[%s8148_s23 + $0x6f4] ss:$8 sps:$4 sm:$0xff]  }
 0x143   : > { %2454 = vmatprep.subr.bf16.mxu0 %v5909_v61  ;;  %v7283_v61 = vld [vmem:[%s6583_s17 + $0x38] sm:$0xff] }
 0x146   : > { %2455 = vmatpush1.bf16.msra.mxu0 %v5907_v62  ;;  %v7286_v62 = vld [vmem:[%s6583_s17 + $0x78] sm:$0xff]  ;;  %s560_s17 = scalar_lea.vmem [#allocation3], %s559_s24 }
 0x147   : > { %2456 = vmatprep.subr.bf16.mxu0 %v5912_v1  ;;  %v4830_v1 = vcombine.high %v7283_v61, %v7286_v62 }
 0x14a   : > { %2457 = vmatpush1.bf16.msra.mxu0 %v5910_v2  ;;  %v5987_v2 = vld [vmem:[%s8148_s23 + $0x714] ss:$8 sps:$4 sm:$0xff]  }
 0x14b   : > { %2458 = vmatprep.subr.bf16.mxu0 %v5915_v5  ;;  %v5991_v5 = vld [vmem:[%s8148_s23 + $0x720] ss:$8 sps:$4 sm:$0xff]  }
 0x14e   : > { %2459 = vmatpush1.bf16.msra.mxu0 %v5913_v6  ;;  %v5999_v6 = vld [vmem:[%s8148_s23 + $0x734] ss:$8 sps:$4 sm:$0xff]  }
 0x14f   : > { %2460 = vmatprep.subr.bf16.mxu0 %v5918_v9  ;;  %v6003_v9 = vld [vmem:[%s8148_s23 + $0x740] ss:$8 sps:$4 sm:$0xff]  }
 0x152   : > { %2461 = vmatpush1.bf16.msra.mxu0 %v5916_v10  ;;  %v6011_v10 = vld [vmem:[%s8148_s23 + $0x754] ss:$8 sps:$4 sm:$0xff]  }
 0x153   : > { %2462 = vmatprep.subr.bf16.mxu0 %v5921_v13  ;;  %v6017_v13 = vld [vmem:[%s8148_s23 + $0x764] ss:$8 sps:$4 sm:$0xff]  }
 0x156   : > { %2463 = vmatpush1.bf16.msra.mxu0 %v5919_v14  ;;  %v6071_v14 = vld [vmem:[%s8113_s3 + $0xc8] sm:$0xff]  }
 0x157   : > { %2464 = vmatprep.subr.bf16.mxu0 %v5924_v18  ;;  %5461 = vmatprep.subr.bf16.mxu1 %v6071_v14  ;;  %v6023_v18 = vld [vmem:[%s8148_s23 + $0x774] ss:$8 sps:$4 sm:$0xff]  }
 0x158   : > { %5462 = vmatpush3.bf16.msra.mxu1 %v6072_v15 }
 0x15a   : > { %2465 = vmatpush1.bf16.msra.mxu0 %v5922_v23  ;;  %v6035_v23 = vld [vmem:[%s8148_s23 + $0x794] ss:$8 sps:$4 sm:$0xff]  }
 0x15b   : > { %2477 = vmatprep.subr.bf16.mxu0 %v5927_v25  ;;  %v6041_v25 = vld [vmem:[%s8148_s23 + $0x7a4] ss:$8 sps:$4 sm:$0xff]  }
 0x15d   : > { %2467 = vmatmul.mubr.bf16.vlgmr.msra.gmra.mrb[0].mxu0 %v4825_v28  ;;  %v6045_v28 = vld [vmem:[%s8148_s23 + $0x7b0] ss:$8 sps:$4 sm:$0xff]  }
 0x15e   : > { %2478 = vmatpush1.bf16.msra.mxu0 %v5925_v29  ;;  %2509 = vmatprep.mubr.bf16.mxu0 %v4828_v30  ;;  %v6053_v29 = vld [vmem:[%s8148_s23 + $0x7c4] ss:$8 sps:$4 sm:$0xff]   ;;  %v6051_v30 = vld [vmem:[%s8148_s23 + $0x7c0] ss:$8 sps:$4 sm:$0xff]  }
 0x15f   : > { %2479 = vmatprep.subr.bf16.mxu0 %v5930_v31  ;;  %v6059_v31 = vld [vmem:[%s8148_s23 + $0x7d4] ss:$8 sps:$4 sm:$0xff]  }
 0x162   : > { %2480 = vmatpush1.bf16.msra.mxu0 %v5928_v16  ;;  %v6065_v16 = vld [vmem:[%s8148_s23 + $0x7e4] ss:$8 sps:$4 sm:$0xff]  }
 0x163   : > { %2481 = vmatprep.subr.bf16.mxu0 %v5933_v19  ;;  %v6063_v19 = vld [vmem:[%s8148_s23 + $0x7e0] ss:$8 sps:$4 sm:$0xff]  }
 0x166   : > { %2482 = vmatpush1.bf16.msra.mxu0 %v5931_v33  ;;  %v6068_v33 = vld [vmem:[%s8148_s23 + $0x7f4] ss:$8 sps:$4 sm:$0xff]  }
 0x167   : > { %2483 = vmatprep.subr.bf16.mxu0 %v5936_v34  ;;  %v6066_v34 = vld [vmem:[%s8148_s23 + $0x7f0] ss:$8 sps:$4 sm:$0xff]  }
 0x16a   : > { %2484 = vmatpush1.bf16.msra.mxu0 %v5934_v35  ;;  %v4829_v35 = vcombine.low %v7283_v61, %v7286_v62 }
 0x16b   : > { %2485 = vmatprep.subr.bf16.mxu0 %v5939_v36 }
 0x16e   : > { %2486 = vmatpush1.bf16.msra.mxu0 %v5937_v37 }
 0x16f   : > { %2487 = vmatprep.subr.bf16.mxu0 %v5942_v38 }
 0x172   : > { %2488 = vmatpush1.bf16.msra.mxu0 %v5940_v39 }
 0x173   : > { %2489 = vmatprep.subr.bf16.mxu0 %v5945_v40  ;;  %v6073_v40 = vld [vmem:[%s8113_s3 + $0xd0] sm:$0xff]  }
 0x174   : > { %5463 = vmatprep.subr.bf16.mxu1 %v6073_v40  ;;  %v6105_v40 = vld [vmem:[%s8113_s3 + $0x38] sm:$0xff]  }
 0x176   : > { %2490 = vmatpush1.bf16.msra.mxu0 %v5943_v41  ;;  %v6074_v41 = vld [vmem:[%s8113_s3 + $0x90] sm:$0xff]  }
 0x177   : > { %2491 = vmatprep.subr.bf16.mxu0 %v5948_v42  ;;  %5464 = vmatpush3.bf16.msra.mxu1 %v6074_v41  ;;  %v6075_v42 = vld [vmem:[%s8113_s3 + $0xd8] sm:$0xff]   ;;  %v6106_v41 = vld [vmem:[%s8113_s3 + $0x140] sm:$0xff]  }
 0x178   : > { %5465 = vmatprep.subr.bf16.mxu1 %v6075_v42 }
 0x17a   : > { %2492 = vmatpush1.bf16.msra.mxu0 %v5946_v43  ;;  %v6076_v43 = vld [vmem:[%s8113_s3 + $0x98] sm:$0xff]  }
 0x17b   : > { %2493 = vmatprep.subr.bf16.mxu0 %v5951_v44  ;;  %5466 = vmatpush3.bf16.msra.mxu1 %v6076_v43  ;;  %v6077_v44 = vld [vmem:[%s8113_s3 + $0xe0] sm:$0xff]  }
 0x17c   : > { %5467 = vmatprep.subr.bf16.mxu1 %v6077_v44  ;;  %v6107_v43 = vld [vmem:[%s8113_s3 + $0x100] sm:$0xff]  }
 0x17e   : > { %2494 = vmatpush1.bf16.msra.mxu0 %v5949_v45  ;;  %v6078_v45 = vld [vmem:[%s8113_s3 + $0xa0] sm:$0xff]  }
 0x17f   : > { %2495 = vmatprep.subr.bf16.mxu0 %v5954_v46  ;;  %5468 = vmatpush3.bf16.msra.mxu1 %v6078_v45  ;;  %v6079_v46 = vld [vmem:[%s8113_s3 + $0xe8] sm:$0xff]  }
 0x180   : > { %5469 = vmatprep.subr.bf16.mxu1 %v6079_v46  ;;  %v6111_v45 = vld [vmem:[%s8113_s3 + $0x148] sm:$0xff]  }
 0x182   : > { %2496 = vmatpush1.bf16.msra.mxu0 %v5952_v47  ;;  %v6080_v47 = vld [vmem:[%s8113_s3 + $0xa8] sm:$0xff]  }
 0x183   : > { %2497 = vmatprep.subr.bf16.mxu0 %v5957_v48  ;;  %v6402_v48 = vmov 0   ;;  %5470 = vmatpush3.bf16.msra.mxu1 %v6080_v47  ;;  %v6112_v47 = vld [vmem:[%s8113_s3 + $0x108] sm:$0xff]  }
 0x184   : > { %2567 = vst [vmem:[#allocation2] sm:$0x11] %v6402_v48  ;;  %2568 = vst [vmem:[#allocation2 + $0x10] sm:$0x22] %v6402_v48 }
 0x186   : > { %2498 = vmatpush1.bf16.msra.mxu0 %v5955_v49  ;;  %v6081_v49 = vld [vmem:[%s8113_s3 + $0xf0] sm:$0xff]  }
 0x187   : > { %2499 = vmatprep.subr.bf16.mxu0 %v5960_v50  ;;  %v6082_v50 = vld [vmem:[%s8113_s3 + $0xb0] sm:$0xff]   ;;  %5471 = vmatprep.subr.bf16.mxu1 %v6081_v49 }
 0x188   : > { %5472 = vmatpush3.bf16.msra.mxu1 %v6082_v50  ;;  %v6113_v49 = vld [vmem:[%s8113_s3 + $0x150] sm:$0xff]  }
 0x189   : > { %v6114_v50 = vld [vmem:[%s8113_s3 + $0x110] sm:$0xff]  }
 0x18a   : > { %2500 = vmatpush1.bf16.msra.mxu0 %v5958_v51  ;;  %v6083_v51 = vld [vmem:[%s8113_s3 + $0xf8] sm:$0xff]  }
 0x18b   : > { %2501 = vmatprep.subr.bf16.mxu0 %v5963_v52  ;;  %v6084_v52 = vld [vmem:[%s8113_s3 + $0xb8] sm:$0xff]   ;;  %5473 = vmatprep.subr.bf16.mxu1 %v6083_v51 }
 0x18c   : > { %5474 = vmatpush3.bf16.msra.mxu1 %v6084_v52  ;;  %v6115_v51 = vld [vmem:[%s8113_s3 + $0x158] sm:$0xff]  }
 0x18d   : > { %v6116_v52 = vld [vmem:[%s8113_s3 + $0x118] sm:$0xff]  }
 0x18e   : > { %2502 = vmatpush1.bf16.msra.mxu0 %v5961_v53  ;;  %v6088_v53 = vld [vmem:[%s8113_s3 + $0x40] sm:$0xff]  }
 0x18f   : > { %2503 = vmatprep.subr.bf16.mxu0 %v5966_v54  ;;  %5481 = vmatprep.subr.bf16.mxu1 %v6088_v53  ;;  %v849_v54 = vlaneseq  ;;  %v6117_v53 = vld [vmem:[%s8113_s3 + $0x160] sm:$0xff]  }
 0x192   : > { %2504 = vmatpush1.bf16.msra.mxu0 %v5964_v55  ;;  %v850_v55 = vshrl.u32 %v849_v54, 7  ;;  %v6118_v54 = vld [vmem:[%s8113_s3 + $0x120] sm:$0xff]  }
 0x193   : > { %2505 = vmatprep.subr.bf16.mxu0 %v5969_v56 }
 0x194   : > { %v7437_v56 = vsub.s32 0, %v850_v55 }
 0x196   : > { %2506 = vmatpush1.bf16.msra.mxu0 %v5967_v57  ;;  %v847_v57 = vld [vmem:[%s8150_s2] sm:$0x3]  ;;  %s6344_s2 = scalar_lea.vmem %s6343_s18, 32 }
 0x197   : > { %2507 = vmatprep.subr.bf16.mxu0 %v5975_v58  ;;  %v7442_v58 = vsub.s32 1, %v850_v55  ;;  %v6119_v55 = vld [vmem:[%s8113_s3 + $0x168] sm:$0xff]  }
 0x19a   : > { %2508 = vmatpush1.bf16.msra.mxu0 %v5973_v59  ;;  %v852_v59 = vrot.slane %v847_v57, %v7437_v56 }
 0x19b   : > { %2520 = vmatprep.subr.bf16.mxu0 %v5981_v60  ;;  %v856_v60 = vrot.slane %v847_v57, %v7442_v58  ;;  %v6120_v57 = vld [vmem:[%s8113_s3 + $0x128] sm:$0xff]  }
 0x19d   : > { %2510 = vmatmul.mubr.bf16.vlgmr.msra.gmra.mrb[0].mxu0 %v4827_v63 }
 0x19e   : > { %2521 = vmatpush1.bf16.msra.mxu0 %v5979_v0  ;;  %2552 = vmatprep.mubr.bf16.mxu0 %v4830_v1 }
 0x19f   : > { %2522 = vmatprep.subr.bf16.mxu0 %v5987_v2 }
 0x1a2   : > { %2523 = vmatpush1.bf16.msra.mxu0 %v5985_v3 }
 0x1a3   : > { %2524 = vmatprep.subr.bf16.mxu0 %v5993_v4 }
 0x1a6   : > { %2525 = vmatpush1.bf16.msra.mxu0 %v5991_v5 }
 0x1a7   : > { %2526 = vmatprep.subr.bf16.mxu0 %v5999_v6 }
 0x1aa   : > { %2527 = vmatpush1.bf16.msra.mxu0 %v5997_v7 }
 0x1ab   : > { %2528 = vmatprep.subr.bf16.mxu0 %v6005_v8 }
 0x1ae   : > { %2529 = vmatpush1.bf16.msra.mxu0 %v6003_v9 }
 0x1af   : > { %2530 = vmatprep.subr.bf16.mxu0 %v6011_v10 }
 0x1b2   : > { %2531 = vmatpush1.bf16.msra.mxu0 %v6009_v12 }
 0x1b3   : > { %2532 = vmatprep.subr.bf16.mxu0 %v6017_v13 }
 0x1b6   : > { %2533 = vmatpush1.bf16.msra.mxu0 %v6015_v17 }
 0x1b7   : > { %2534 = vmatprep.subr.bf16.mxu0 %v6023_v18 }
 0x1ba   : > { %2535 = vmatpush1.bf16.msra.mxu0 %v6021_v20 }
 0x1bb   : > { %2536 = vmatprep.subr.bf16.mxu0 %v6029_v21 }
 0x1be   : > { %2537 = vmatpush1.bf16.msra.mxu0 %v6027_v22 }
 0x1bf   : > { %2538 = vmatprep.subr.bf16.mxu0 %v6035_v23 }
 0x1c2   : > { %2539 = vmatpush1.bf16.msra.mxu0 %v6033_v24 }
 0x1c3   : > { %2540 = vmatprep.subr.bf16.mxu0 %v6041_v25 }
 0x1c6   : > { %2541 = vmatpush1.bf16.msra.mxu0 %v6039_v26 }
 0x1c7   : > { %2542 = vmatprep.subr.bf16.mxu0 %v6047_v27  ;;  %v6089_v27 = vld [vmem:[%s8113_s3] sm:$0xff]  }
 0x1ca   : > { %2543 = vmatpush1.bf16.msra.mxu0 %v6045_v28  ;;  %v6092_v28 = vld [vmem:[%s8113_s3 + $0x48] sm:$0xff]  }
 0x1cb   : > { %2544 = vmatprep.subr.bf16.mxu0 %v6053_v29 }
 0x1ce   : > { %2545 = vmatpush1.bf16.msra.mxu0 %v6051_v30  ;;  %v6093_v30 = vld [vmem:[%s8113_s3 + $0x8] sm:$0xff]  }
 0x1cf   : > { %2546 = vmatprep.subr.bf16.mxu0 %v6059_v31  ;;  %v6094_v31 = vld [vmem:[%s8113_s3 + $0x50] sm:$0xff]  }
 0x1d2   : > { %2547 = vmatpush1.bf16.msra.mxu0 %v6057_v32  ;;  %v6095_v32 = vld [vmem:[%s8113_s3 + $0x10] sm:$0xff]  }
 0x1d3   : > { %2548 = vmatprep.subr.bf16.mxu0 %v6065_v16  ;;  %v6096_v16 = vld [vmem:[%s8113_s3 + $0x58] sm:$0xff]  }
 0x1d6   : > { %2549 = vmatpush1.bf16.msra.mxu0 %v6063_v19  ;;  %v6097_v19 = vld [vmem:[%s8113_s3 + $0x18] sm:$0xff]  }
 0x1d7   : > { %2550 = vmatprep.subr.bf16.mxu0 %v6068_v33  ;;  %v6098_v33 = vld [vmem:[%s8113_s3 + $0x60] sm:$0xff]  }
 0x1da   : > { %2551 = vmatpush1.bf16.msra.mxu0 %v6066_v34  ;;  %v6099_v34 = vld [vmem:[%s8113_s3 + $0x20] sm:$0xff]  }
 0x1dd   : > { %2553 = vmatmul.mubr.bf16.vlgmr.msra.gmra.mrb[0].mxu0 %v4829_v35  ;;  %v6100_v35 = vld [vmem:[%s8113_s3 + $0x68] sm:$0xff]  }
 0x1f5   : > { %v2253_v36 = vpop.f32.mrb[0].mxu1 }
 0x1f6   : > { %v2255_v37 = vpop.f32.mrb[1].mxu1  ;;  %v2254_v61 = vadd.f32 %v2253_v36, %v852_v59  ;;  %v6101_v36 = vld [vmem:[%s8113_s3 + $0x28] sm:$0xff]  }
 0x1f7   : > { %v2257_v38 = vpop.f32.mrb[2].mxu1  ;;  %v2256_v62 = vadd.f32 %v2255_v37, %v856_v60  ;;  %v6102_v37 = vld [vmem:[%s8113_s3 + $0x70] sm:$0xff]  }
 0x1f8   : > { %v2259_v39 = vpop.f32.mrb[3].mxu1  ;;  %v2258_v0 = vadd.f32 %v2257_v38, %v852_v59  ;;  %v6103_v38 = vld [vmem:[%s8113_s3 + $0x30] sm:$0xff]  }
 0x1f9   : > { %v2260_v3 = vadd.f32 %v2259_v39, %v856_v60  ;;  %v6104_v39 = vld [vmem:[%s8113_s3 + $0x78] sm:$0xff]   ;;  %v6121_v59 = vld [vmem:[%s8113_s3 + $0x170] sm:$0xff]  }
 0x1fa   : > { %v6122_v60 = vld [vmem:[%s8113_s3 + $0x130] sm:$0xff]  }
 0x2b0   : > { %v2554_v63 = vpop.f32.mrb[0].mxu0 }
 0x2b1   : > { %v5614_v1 = vadd.f32 %v2554_v63, %v2254_v61  ;;  %v2556_v2 = vpop.f32.mrb[1].mxu0  ;;  %v6123_v61 = vld [vmem:[%s8113_s3 + $0x178] sm:$0xff]  }
 0x2b2   : > { %v5616_v4 = vadd.f32 %v2556_v2, %v2256_v62  ;;  %v2558_v5 = vpop.f32.mrb[2].mxu0  ;;  %v6124_v62 = vld [vmem:[%s8113_s3 + $0x138] sm:$0xff]   ;;  %v6126_v2 = vld [vmem:[%s8113_s3 + $0x180] sm:$0xff]  }
 0x2b3   : > { %v2563_v6 = vmax.f32 %v5614_v1, 0.0  ;;  %v5618_v7 = vadd.f32 %v2558_v5, %v2258_v0  ;;  %v2560_v8 = vpop.f32.mrb[3].mxu0  ;;  %v6125_v0 = vld [vmem:[%s8113_s3 + $0x1c0] sm:$0xff]  }
 0x2b4   : > { %v2564_v9 = vmax.f32 %v5616_v4, 0.0  ;;  %v5620_v10 = vadd.f32 %v2560_v8, %v2260_v3  ;;  %v6130_v4 = vld [vmem:[%s8113_s3 + $0x1c8] sm:$0xff]   ;;  %v6133_v8 = vld [vmem:[%s8113_s3 + $0x190] sm:$0xff]  }
 0x2b5   : > { %v2565_v11 = vmax.f32 %v5618_v7, 0.0  ;;  %v6132_v7 = vld [vmem:[%s8113_s3 + $0x1d0] sm:$0xff]  }
 0x2b6   : > { %v5457_v12 = vpack.c.bf16 %v2564_v9, %v2563_v6  ;;  %v2566_v13 = vmax.f32 %v5620_v10, 0.0  ;;  %v6131_v6 = vld [vmem:[%s8113_s3 + $0x188] sm:$0xff]   ;;  %v6134_v9 = vld [vmem:[%s8113_s3 + $0x1d8] sm:$0xff]  }
 0x2b7   : > { %v6135_v10 = vld [vmem:[%s8113_s3 + $0x198] sm:$0xff]  }
 0x2b8   : > { %v2582_v14 = vrot.slane %v5457_v12, 7  ;;  %v5458_v15 = vpack.c.bf16 %v2566_v13, %v2565_v11  ;;  %v6136_v11 = vld [vmem:[%s8113_s3 + $0x1e0] sm:$0xff]   ;;  %v6138_v13 = vld [vmem:[%s8113_s3 + $0x1e8] sm:$0xff]  }
 0x2b9   : > { %v6137_v12 = vld [vmem:[%s8113_s3 + $0x1a0] sm:$0xff]  }
 0x2ba   : > { %v2583_v17 = vrot.slane %v2582_v14, 4  ;;  %2590 = vst [vmem:[#allocation2] sm:$0xee] %v2582_v14  ;;  %v2584_v18 = vrot.slane %v5458_v15, 7  ;;  %v6139_v14 = vld [vmem:[%s8113_s3 + $0x1a8] sm:$0xff]   ;;  %v6140_v15 = vld [vmem:[%s8113_s3 + $0x1f0] sm:$0xff]  }
 0x2bc   : > { %v2585_v20 = vsel %vm2581_vm2, %v2583_v17, %v2584_v18  ;;  %v2586_v21 = vrot.slane %v2584_v18, 4  ;;  %v6141_v17 = vld [vmem:[%s8113_s3 + $0x1b0] sm:$0xff]   ;;  %v6142_v18 = vld [vmem:[%s8113_s3 + $0x1f8] sm:$0xff]  }
 0x2bd   : > { %2591 = vst [vmem:[#allocation2 + $0x8] sm:$0xff] %v2585_v20  ;;  %v6143_v20 = vld [vmem:[%s8113_s3 + $0x1b8] sm:$0xff]  }
 0x2be   : > { %2592 = vst [vmem:[#allocation2 + $0x10] sm:$0x11] %v2586_v21 }
 0x2c1   : > { %v2593_v25 = vld [vmem:[#allocation2] sm:$0xff] }
 0x2c2   : > { %v5140_v29 = vcombine.high %v2593_v25, %v2593_v25  ;;  %v5139_v44 = vcombine.low %v2593_v25, %v2593_v25  ;;  %v6149_v25 = vld [vmem:[%s8115_s5 + $0x94] ss:$8 sps:$4 sm:$0xff]  }
 0x2c4   : > { %v6110_v42 = vld [vmem:[#allocation2 + $0x4] ss:$8 sps:$4 sm:$0x1e]   ;;  %v6108_v63 = vld [vmem:[#allocation2] ss:$8 sps:$4 sm:$0x1e]  }
 0x2c5   : > { %v6085_v22 = vld [vmem:[#allocation2 + $0x8] ss:$8 sps:$4 sm:$0x1e]   ;;  %v6087_v23 = vld [vmem:[#allocation2 + $0xc] ss:$8 sps:$4 sm:$0x1e]  }
 0x2c6   : > { %v2669_v24 = vrot.slane %v6085_v22, 1  ;;  %v2670_v26 = vrot.slane %v6087_v23, 1  ;;  %v2996_v46 = vrot.slane %v6110_v42, 1  ;;  %v6129_v1 = vld [vmem:[#allocation2 + $0xc] ss:$8 sps:$4 sm:$0x3c]  }
 0x2c7   : > { %v2995_v3 = vrot.slane %v6108_v63, 1  ;;  %v3180_v5 = vrot.slane %v6129_v1, 2  ;;  %v6127_v21 = vld [vmem:[#allocation2 + $0x8] ss:$8 sps:$4 sm:$0x3c]  }
 0x2c8   : > { %2801 = vmatprep.mubr.bf16.mxu1 %v2670_v26  ;;  %v3179_v22 = vrot.slane %v6127_v21, 2  ;;  %v6144_v23 = vld [vmem:[%s8115_s5 + $0x80] ss:$8 sps:$4 sm:$0xff]   ;;  %v6147_v26 = vld [vmem:[%s8115_s5 + $0x90] ss:$8 sps:$4 sm:$0xff]  }
 0x2c9   : > { %2802 = vmatmul.mubr.bf16.vlgmr.msra.gmra.mrb[4].mxu1 %v2669_v24  ;;  %v6146_v24 = vld [vmem:[%s8115_s5 + $0x84] ss:$8 sps:$4 sm:$0xff]   ;;  %v6189_v21 = vld [vmem:[%s8115_s5 + $0x70] ss:$8 sps:$4 sm:$0xff]  }
 0x2ca   : > { %5482 = vmatpush3.bf16.msra.mxu1 %v6089_v27  ;;  %2944 = vmatprep.mubr.bf16.mxu1 %v5140_v29  ;;  %v6152_v27 = vld [vmem:[%s8115_s5 + $0xa4] ss:$8 sps:$4 sm:$0xff]   ;;  %v6155_v29 = vld [vmem:[%s8115_s5 + $0xb4] ss:$8 sps:$4 sm:$0xff]  }
 0x2cb   : > { %5483 = vmatprep.subr.bf16.mxu1 %v6092_v28  ;;  %v6150_v28 = vld [vmem:[%s8115_s5 + $0xa0] ss:$8 sps:$4 sm:$0xff]  }
 0x2ce   : > { %5484 = vmatpush3.bf16.msra.mxu1 %v6093_v30  ;;  %v6153_v30 = vld [vmem:[%s8115_s5 + $0xb0] ss:$8 sps:$4 sm:$0xff]  }
 0x2cf   : > { %5485 = vmatprep.subr.bf16.mxu1 %v6094_v31  ;;  %v6158_v31 = vld [vmem:[%s8115_s5 + $0xc4] ss:$8 sps:$4 sm:$0xff]  }
 0x2d2   : > { %5486 = vmatpush3.bf16.msra.mxu1 %v6095_v32  ;;  %v6156_v32 = vld [vmem:[%s8115_s5 + $0xc0] ss:$8 sps:$4 sm:$0xff]  }
 0x2d3   : > { %5487 = vmatprep.subr.bf16.mxu1 %v6096_v16  ;;  %v6161_v16 = vld [vmem:[%s8115_s5 + $0xd4] ss:$8 sps:$4 sm:$0xff]  }
 0x2d6   : > { %5488 = vmatpush3.bf16.msra.mxu1 %v6097_v19  ;;  %v6159_v19 = vld [vmem:[%s8115_s5 + $0xd0] ss:$8 sps:$4 sm:$0xff]  }
 0x2d7   : > { %5489 = vmatprep.subr.bf16.mxu1 %v6098_v33  ;;  %v6164_v33 = vld [vmem:[%s8115_s5 + $0xe4] ss:$8 sps:$4 sm:$0xff]  }
 0x2da   : > { %5490 = vmatpush3.bf16.msra.mxu1 %v6099_v34  ;;  %v6162_v34 = vld [vmem:[%s8115_s5 + $0xe0] ss:$8 sps:$4 sm:$0xff]  }
 0x2db   : > { %5491 = vmatprep.subr.bf16.mxu1 %v6100_v35  ;;  %v6167_v35 = vld [vmem:[%s8115_s5 + $0xf4] ss:$8 sps:$4 sm:$0xff]  }
 0x2de   : > { %5492 = vmatpush3.bf16.msra.mxu1 %v6101_v36  ;;  %v6165_v36 = vld [vmem:[%s8115_s5 + $0xf0] ss:$8 sps:$4 sm:$0xff]  }
 0x2df   : > { %5493 = vmatprep.subr.bf16.mxu1 %v6102_v37  ;;  %v6170_v37 = vld [vmem:[%s8115_s5 + $0x4] ss:$8 sps:$4 sm:$0xff]  }
 0x2e2   : > { %5494 = vmatpush3.bf16.msra.mxu1 %v6103_v38 }
 0x2e3   : > { %5495 = vmatprep.subr.bf16.mxu1 %v6104_v39 }
 0x2e6   : > { %5496 = vmatpush3.bf16.msra.mxu1 %v6105_v40 }
 0x2e7   : > { %5503 = vmatprep.subr.bf16.mxu1 %v6106_v41 }
 0x2e9   : > { %2945 = vmatmul.mubr.bf16.vlgmr.msra.gmra.mrb[8].mxu1 %v5139_v44 }
 0x2ea   : > { %5504 = vmatpush3.bf16.msra.mxu1 %v6107_v43  ;;  %3127 = vmatprep.mubr.bf16.mxu1 %v2996_v46 }
 0x2eb   : > { %5505 = vmatprep.subr.bf16.mxu1 %v6111_v45 }
 0x2ee   : > { %5506 = vmatpush3.bf16.msra.mxu1 %v6112_v47 }
 0x2ef   : > { %5507 = vmatprep.subr.bf16.mxu1 %v6113_v49 }
 0x2f2   : > { %5508 = vmatpush3.bf16.msra.mxu1 %v6114_v50 }
 0x2f3   : > { %5509 = vmatprep.subr.bf16.mxu1 %v6115_v51 }
 0x2f6   : > { %5510 = vmatpush3.bf16.msra.mxu1 %v6116_v52 }
 0x2f7   : > { %5511 = vmatprep.subr.bf16.mxu1 %v6117_v53 }
 0x2fa   : > { %5512 = vmatpush3.bf16.msra.mxu1 %v6118_v54 }
 0x2fb   : > { %5513 = vmatprep.subr.bf16.mxu1 %v6119_v55 }
 0x2fe   : > { %5514 = vmatpush3.bf16.msra.mxu1 %v6120_v57 }
 0x2ff   : > { %5515 = vmatprep.subr.bf16.mxu1 %v6121_v59 }
 0x302   : > { %5516 = vmatpush3.bf16.msra.mxu1 %v6122_v60 }
 0x303   : > { %5517 = vmatprep.subr.bf16.mxu1 %v6123_v61 }
 0x306   : > { %5518 = vmatpush3.bf16.msra.mxu1 %v6124_v62  ;;  %v5257_v62 = vld [vmem:[%s8114_s4] ss:$0 sm:$0xff] }
 0x307   : > { %5525 = vmatprep.subr.bf16.mxu1 %v6125_v0 }
 0x309   : > { %3128 = vmatmul.mubr.bf16.vlgmr.msra.gmra.mrb[12].mxu1 %v2995_v3 }
 0x30a   : > { %5526 = vmatpush3.bf16.msra.mxu1 %v6126_v2  ;;  %3311 = vmatprep.mubr.bf16.mxu1 %v3180_v5 }
 0x30b   : > { %5527 = vmatprep.subr.bf16.mxu1 %v6130_v4  ;;  %v6168_v4 = vld [vmem:[%s8115_s5] ss:$8 sps:$4 sm:$0xff]  }
 0x30e   : > { %5528 = vmatpush3.bf16.msra.mxu1 %v6131_v6  ;;  %v6173_v6 = vld [vmem:[%s8115_s5 + $0x14] ss:$8 sps:$4 sm:$0xff]  }
 0x30f   : > { %5529 = vmatprep.subr.bf16.mxu1 %v6132_v7  ;;  %v6171_v7 = vld [vmem:[%s8115_s5 + $0x10] ss:$8 sps:$4 sm:$0xff]  }
 0x312   : > { %5530 = vmatpush3.bf16.msra.mxu1 %v6133_v8  ;;  %v6176_v8 = vld [vmem:[%s8115_s5 + $0x24] ss:$8 sps:$4 sm:$0xff]  }
 0x313   : > { %5531 = vmatprep.subr.bf16.mxu1 %v6134_v9  ;;  %v6174_v9 = vld [vmem:[%s8115_s5 + $0x20] ss:$8 sps:$4 sm:$0xff]  }
 0x316   : > { %5532 = vmatpush3.bf16.msra.mxu1 %v6135_v10  ;;  %v6179_v10 = vld [vmem:[%s8115_s5 + $0x34] ss:$8 sps:$4 sm:$0xff]  }
 0x317   : > { %5533 = vmatprep.subr.bf16.mxu1 %v6136_v11  ;;  %v6177_v11 = vld [vmem:[%s8115_s5 + $0x30] ss:$8 sps:$4 sm:$0xff]  }
 0x31a   : > { %5534 = vmatpush3.bf16.msra.mxu1 %v6137_v12  ;;  %v6182_v12 = vld [vmem:[%s8115_s5 + $0x44] ss:$8 sps:$4 sm:$0xff]  }
 0x31b   : > { %5535 = vmatprep.subr.bf16.mxu1 %v6138_v13  ;;  %v6180_v13 = vld [vmem:[%s8115_s5 + $0x40] ss:$8 sps:$4 sm:$0xff]  }
 0x31e   : > { %5536 = vmatpush3.bf16.msra.mxu1 %v6139_v14  ;;  %v6185_v14 = vld [vmem:[%s8115_s5 + $0x54] ss:$8 sps:$4 sm:$0xff]  }
 0x31f   : > { %5537 = vmatprep.subr.bf16.mxu1 %v6140_v15  ;;  %v6183_v15 = vld [vmem:[%s8115_s5 + $0x50] ss:$8 sps:$4 sm:$0xff]  }
 0x322   : > { %5538 = vmatpush3.bf16.msra.mxu1 %v6141_v17  ;;  %v6188_v17 = vld [vmem:[%s8115_s5 + $0x64] ss:$8 sps:$4 sm:$0xff]  }
 0x323   : > { %5539 = vmatprep.subr.bf16.mxu1 %v6142_v18  ;;  %v6186_v18 = vld [vmem:[%s8115_s5 + $0x60] ss:$8 sps:$4 sm:$0xff]  }
 0x326   : > { %5540 = vmatpush3.bf16.msra.mxu1 %v6143_v20  ;;  %v6191_v20 = vld [vmem:[%s8115_s5 + $0x74] ss:$8 sps:$4 sm:$0xff]  }
 0x327   : > { %3446 = vmatprep.subr.bf16.mxu1 %v6146_v24  ;;  %v6197_v24 = vld [vmem:[%s8115_s5 + $0x114] ss:$8 sps:$4 sm:$0xff]  }
 0x329   : > { %3312 = vmatmul.mubr.bf16.vlgmr.msra.gmra.mrb[16].mxu1 %v3179_v22  ;;  %v6194_v22 = vld [vmem:[%s8115_s5 + $0x104] ss:$8 sps:$4 sm:$0xff]  }
 0x32a   : > { %3478 = vmatprep.mubr.bf16.mxu1 %v6402_v48  ;;  %3447 = vmatpush1.bf16.msra.mxu1 %v6144_v23  ;;  %v6192_v23 = vld [vmem:[%s8115_s5 + $0x100] ss:$8 sps:$4 sm:$0xff]  }
 0x32b   : > { %3448 = vmatprep.subr.bf16.mxu1 %v6149_v25  ;;  %v6195_v25 = vld [vmem:[%s8115_s5 + $0x110] ss:$8 sps:$4 sm:$0xff]  }
 0x32e   : > { %3449 = vmatpush1.bf16.msra.mxu1 %v6147_v26  ;;  %v6200_v26 = vld [vmem:[%s8115_s5 + $0x124] ss:$8 sps:$4 sm:$0xff]  }
 0x32f   : > { %3450 = vmatprep.subr.bf16.mxu1 %v6152_v27  ;;  %v6198_v27 = vld [vmem:[%s8115_s5 + $0x120] ss:$8 sps:$4 sm:$0xff]  }
 0x332   : > { %3451 = vmatpush1.bf16.msra.mxu1 %v6150_v28  ;;  %v6203_v28 = vld [vmem:[%s8115_s5 + $0x134] ss:$8 sps:$4 sm:$0xff]  }
 0x333   : > { %3452 = vmatprep.subr.bf16.mxu1 %v6155_v29  ;;  %v6201_v29 = vld [vmem:[%s8115_s5 + $0x130] ss:$8 sps:$4 sm:$0xff]  }
 0x336   : > { %3453 = vmatpush1.bf16.msra.mxu1 %v6153_v30  ;;  %v6206_v30 = vld [vmem:[%s8115_s5 + $0x144] ss:$8 sps:$4 sm:$0xff]  }
 0x337   : > { %3454 = vmatprep.subr.bf16.mxu1 %v6158_v31  ;;  %v6204_v31 = vld [vmem:[%s8115_s5 + $0x140] ss:$8 sps:$4 sm:$0xff]  }
 0x33a   : > { %3455 = vmatpush1.bf16.msra.mxu1 %v6156_v32  ;;  %v6209_v32 = vld [vmem:[%s8115_s5 + $0x154] ss:$8 sps:$4 sm:$0xff]  }
 0x33b   : > { %3456 = vmatprep.subr.bf16.mxu1 %v6161_v16  ;;  %v6207_v16 = vld [vmem:[%s8115_s5 + $0x150] ss:$8 sps:$4 sm:$0xff]  }
 0x33e   : > { %3457 = vmatpush1.bf16.msra.mxu1 %v6159_v19  ;;  %v6212_v19 = vld [vmem:[%s8115_s5 + $0x164] ss:$8 sps:$4 sm:$0xff]  }
 0x33f   : > { %3458 = vmatprep.subr.bf16.mxu1 %v6164_v33  ;;  %v6210_v33 = vld [vmem:[%s8115_s5 + $0x160] ss:$8 sps:$4 sm:$0xff]  }
 0x342   : > { %3459 = vmatpush1.bf16.msra.mxu1 %v6162_v34  ;;  %v6215_v34 = vld [vmem:[%s8115_s5 + $0x174] ss:$8 sps:$4 sm:$0xff]  }
 0x343   : > { %3460 = vmatprep.subr.bf16.mxu1 %v6167_v35  ;;  %v6213_v35 = vld [vmem:[%s8115_s5 + $0x170] ss:$8 sps:$4 sm:$0xff]  }
 0x346   : > { %3461 = vmatpush1.bf16.msra.mxu1 %v6165_v36  ;;  %v6218_v36 = vld [vmem:[%s8115_s5 + $0x184] ss:$8 sps:$4 sm:$0xff]  }
 0x347   : > { %3567 = vmatprep.subr.bf16.mxu1 %v6170_v37  ;;  %v6216_v37 = vld [vmem:[%s8115_s5 + $0x180] ss:$8 sps:$4 sm:$0xff]  }
 0x39c   : > { %v5475_v38 = vpop.f32.mrb[4].mxu1 }
 0x39d   : > { %v5476_v39 = vpop.f32.mrb[5].mxu1 }
 0x39e   : > { %v5477_v40 = vadd.f32 %v5476_v39, %v5475_v38  ;;  %v5478_v41 = vpop.f32.mrb[6].mxu1  ;;  %v6221_v39 = vld [vmem:[%s8115_s5 + $0x194] ss:$8 sps:$4 sm:$0xff]  }
 0x39f   : > { %v5479_v42 = vpop.f32.mrb[7].mxu1  ;;  %v6224_v41 = vld [vmem:[%s8115_s5 + $0x1a4] ss:$8 sps:$4 sm:$0xff]  }
 0x3a0   : > { %v6222_v42 = vld [vmem:[%s8115_s5 + $0x1a0] ss:$8 sps:$4 sm:$0xff]  }
 0x3bc   : > { %v5497_v43 = vpop.f32.mrb[8].mxu1 }
 0x3bd   : > { %v5498_v44 = vpop.f32.mrb[9].mxu1 }
 0x3be   : > { %v5499_v45 = vadd.f32 %v5498_v44, %v5497_v43  ;;  %v5500_v46 = vpop.f32.mrb[10].mxu1  ;;  %v6227_v43 = vld [vmem:[%s8115_s5 + $0x1b4] ss:$8 sps:$4 sm:$0xff]   ;;  %v6230_v44 = vld [vmem:[%s8115_s5 + $0x1c4] ss:$8 sps:$4 sm:$0xff]  }
 0x3bf   : > { %v5501_v47 = vpop.f32.mrb[11].mxu1  ;;  %v6233_v46 = vld [vmem:[%s8115_s5 + $0x1d4] ss:$8 sps:$4 sm:$0xff]  }
 0x3c0   : > { %v2947_v49 = vadd.f32 %v5499_v45, %v5477_v40  ;;  %v6219_v40 = vld [vmem:[%s8115_s5 + $0x190] ss:$8 sps:$4 sm:$0xff]   ;;  %v6228_v45 = vld [vmem:[%s8115_s5 + $0x1c0] ss:$8 sps:$4 sm:$0xff]  }
 0x3c1   : > { %v6231_v47 = vld [vmem:[%s8115_s5 + $0x1d0] ss:$8 sps:$4 sm:$0xff]  }
 0x3dc   : > { %v5519_v50 = vpop.f32.mrb[12].mxu1 }
 0x3dd   : > { %v5520_v51 = vpop.f32.mrb[13].mxu1 }
 0x3de   : > { %v5521_v52 = vadd.f32 %v5520_v51, %v5519_v50  ;;  %v5522_v53 = vpop.f32.mrb[14].mxu1  ;;  %v6234_v50 = vld [vmem:[%s8115_s5 + $0x1e0] ss:$8 sps:$4 sm:$0xff]   ;;  %v6239_v51 = vld [vmem:[%s8115_s5 + $0x1f4] ss:$8 sps:$4 sm:$0xff]  }
 0x3df   : > { %v5523_v54 = vpop.f32.mrb[15].mxu1 }
 0x3e0   : > { %v3135_v55 = vadd.f32 %v5521_v52, %v2947_v49  ;;  %v6236_v49 = vld [vmem:[%s8115_s5 + $0x1e4] ss:$8 sps:$4 sm:$0xff]   ;;  %v6237_v52 = vld [vmem:[%s8115_s5 + $0x1f0] ss:$8 sps:$4 sm:$0xff]   ;;  %v6240_v54 = vld [vmem:[%s8117_s7] ss:$8 sps:$4 sm:$0xff]  }
 0x3fc   : > { %v5541_v57 = vpop.f32.mrb[16].mxu1 }
 0x3fd   : > { %v5542_v59 = vpop.f32.mrb[17].mxu1 }
 0x3fe   : > { %v5543_v60 = vadd.f32 %v5542_v59, %v5541_v57  ;;  %v5544_v61 = vpop.f32.mrb[18].mxu1  ;;  %v6245_v57 = vld [vmem:[%s8117_s7 + $0x14] ss:$8 sps:$4 sm:$0xff]   ;;  %v6243_v59 = vld [vmem:[%s8117_s7 + $0x10] ss:$8 sps:$4 sm:$0xff]  }
 0x3ff   : > { %v5545_v63 = vpop.f32.mrb[19].mxu1  ;;  %v6246_v61 = vld [vmem:[%s8117_s7 + $0x20] ss:$8 sps:$4 sm:$0xff]  }
 0x400   : > { %v3319_v0 = vadd.f32 %v5543_v60, %v3135_v55  ;;  %v6242_v55 = vld [vmem:[%s8117_s7 + $0x4] ss:$8 sps:$4 sm:$0xff]   ;;  %v6249_v63 = vld [vmem:[%s8117_s7 + $0x30] ss:$8 sps:$4 sm:$0xff]  }
 0x401   : > { %v6248_v60 = vld [vmem:[%s8117_s7 + $0x24] ss:$8 sps:$4 sm:$0xff]  }
 0x402   : > { %v3327_v1 = vadd.f32 %v5257_v62, %v3319_v0  ;;  %v6251_v62 = vld [vmem:[%s8117_s7 + $0x34] ss:$8 sps:$4 sm:$0xff]   ;;  %v6254_v0 = vld [vmem:[%s8117_s7 + $0x44] ss:$8 sps:$4 sm:$0xff]  }
 0x404   : > { %v3328_v2 = vmax.f32 %v3327_v1, 0.0  ;;  %v6252_v1 = vld [vmem:[%s8117_s7 + $0x40] ss:$8 sps:$4 sm:$0xff]  }
 0x406   : > { %v7642_v3 = vpack.c.bf16 %v3328_v2, %v3328_v2  ;;  %v6257_v2 = vld [vmem:[%s8117_s7 + $0x54] ss:$8 sps:$4 sm:$0xff]  }
 0x408   : > { %v3364_v5 = vrot.slane %v7642_v3, 1  ;;  %v3625_v38 = vrot.slane %v7642_v3, 2  ;;  %v3767_v53 = vrot.slane %v7642_v3, 3 }
 0x40a   : > { %3479 = vmatmul.mubr.bf16.vlgmr.msra.gmra.mrb[20].mxu1 %v3364_v5  ;;  %v6258_v5 = vld [vmem:[%s8117_s7 + $0x60] ss:$8 sps:$4 sm:$0xff]  }
 0x40b   : > { %3568 = vmatpush1.bf16.msra.mxu1 %v6168_v4  ;;  %3599 = vmatprep.mubr.bf16.mxu1 %v6402_v48  ;;  %v6260_v4 = vld [vmem:[%s8117_s7 + $0x64] ss:$8 sps:$4 sm:$0xff]  }
 0x40c   : > { %3569 = vmatprep.subr.bf16.mxu1 %v6173_v6  ;;  %v6263_v6 = vld [vmem:[%s8117_s7 + $0x74] ss:$8 sps:$4 sm:$0xff]  }
 0x40f   : > { %3570 = vmatpush1.bf16.msra.mxu1 %v6171_v7  ;;  %v6261_v7 = vld [vmem:[%s8117_s7 + $0x70] ss:$8 sps:$4 sm:$0xff]  }
 0x410   : > { %3571 = vmatprep.subr.bf16.mxu1 %v6176_v8  ;;  %v6266_v8 = vld [vmem:[%s8117_s7 + $0x84] ss:$8 sps:$4 sm:$0xff]  }
 0x413   : > { %3572 = vmatpush1.bf16.msra.mxu1 %v6174_v9  ;;  %v6264_v9 = vld [vmem:[%s8117_s7 + $0x80] ss:$8 sps:$4 sm:$0xff]  }
 0x414   : > { %3573 = vmatprep.subr.bf16.mxu1 %v6179_v10  ;;  %v6269_v10 = vld [vmem:[%s8117_s7 + $0x94] ss:$8 sps:$4 sm:$0xff]  }
 0x417   : > { %3574 = vmatpush1.bf16.msra.mxu1 %v6177_v11  ;;  %v6267_v11 = vld [vmem:[%s8117_s7 + $0x90] ss:$8 sps:$4 sm:$0xff]  }
 0x418   : > { %3575 = vmatprep.subr.bf16.mxu1 %v6182_v12  ;;  %v6272_v12 = vld [vmem:[%s8117_s7 + $0xa4] ss:$8 sps:$4 sm:$0xff]  }
 0x41b   : > { %3576 = vmatpush1.bf16.msra.mxu1 %v6180_v13  ;;  %v6270_v13 = vld [vmem:[%s8117_s7 + $0xa0] ss:$8 sps:$4 sm:$0xff]  }
 0x41c   : > { %3577 = vmatprep.subr.bf16.mxu1 %v6185_v14  ;;  %v6275_v14 = vld [vmem:[%s8117_s7 + $0xb4] ss:$8 sps:$4 sm:$0xff]  }
 0x41f   : > { %3578 = vmatpush1.bf16.msra.mxu1 %v6183_v15  ;;  %v6273_v15 = vld [vmem:[%s8117_s7 + $0xb0] ss:$8 sps:$4 sm:$0xff]  }
 0x420   : > { %3579 = vmatprep.subr.bf16.mxu1 %v6188_v17  ;;  %v6278_v17 = vld [vmem:[%s8117_s7 + $0xc4] ss:$8 sps:$4 sm:$0xff]  }
 0x423   : > { %3580 = vmatpush1.bf16.msra.mxu1 %v6186_v18  ;;  %v6276_v18 = vld [vmem:[%s8117_s7 + $0xc0] ss:$8 sps:$4 sm:$0xff]  }
 0x424   : > { %3581 = vmatprep.subr.bf16.mxu1 %v6191_v20  ;;  %v6281_v20 = vld [vmem:[%s8117_s7 + $0xd4] ss:$8 sps:$4 sm:$0xff]  }
 0x427   : > { %3582 = vmatpush1.bf16.msra.mxu1 %v6189_v21  ;;  %v6279_v21 = vld [vmem:[%s8117_s7 + $0xd0] ss:$8 sps:$4 sm:$0xff]  }
 0x428   : > { %3707 = vmatprep.subr.bf16.mxu1 %v6194_v22  ;;  %v6284_v22 = vld [vmem:[%s8117_s7 + $0xe4] ss:$8 sps:$4 sm:$0xff]  }
 0x42a   : > { %3600 = vmatmul.mubr.bf16.vlgmr.msra.gmra.mrb[24].mxu1 %v7642_v3  ;;  %v6255_v3 = vld [vmem:[%s8117_s7 + $0x50] ss:$8 sps:$4 sm:$0xff]  }
 0x42b   : > { %3708 = vmatpush1.bf16.msra.mxu1 %v6192_v23  ;;  %3739 = vmatprep.mubr.bf16.mxu1 %v6402_v48  ;;  %v6282_v23 = vld [vmem:[%s8117_s7 + $0xe0] ss:$8 sps:$4 sm:$0xff]  }
 0x42c   : > { %3709 = vmatprep.subr.bf16.mxu1 %v6197_v24  ;;  %v6287_v24 = vld [vmem:[%s8117_s7 + $0xf4] ss:$8 sps:$4 sm:$0xff]  }
 0x42f   : > { %3710 = vmatpush1.bf16.msra.mxu1 %v6195_v25  ;;  %v6285_v25 = vld [vmem:[%s8117_s7 + $0xf0] ss:$8 sps:$4 sm:$0xff]  }
 0x430   : > { %3711 = vmatprep.subr.bf16.mxu1 %v6200_v26  ;;  %v6288_v26 = vld [vmem:[%s8119_s9 + $0x40] sm:$0xff]  }
 0x433   : > { %3712 = vmatpush1.bf16.msra.mxu1 %v6198_v27 }
 0x434   : > { %3713 = vmatprep.subr.bf16.mxu1 %v6203_v28 }
 0x437   : > { %3714 = vmatpush1.bf16.msra.mxu1 %v6201_v29 }
 0x438   : > { %3715 = vmatprep.subr.bf16.mxu1 %v6206_v30 }
 0x43b   : > { %3716 = vmatpush1.bf16.msra.mxu1 %v6204_v31 }
 0x43c   : > { %3717 = vmatprep.subr.bf16.mxu1 %v6209_v32 }
 0x43f   : > { %3718 = vmatpush1.bf16.msra.mxu1 %v6207_v16 }
 0x440   : > { %3719 = vmatprep.subr.bf16.mxu1 %v6212_v19 }
 0x443   : > { %3720 = vmatpush1.bf16.msra.mxu1 %v6210_v33 }
 0x444   : > { %3721 = vmatprep.subr.bf16.mxu1 %v6215_v34 }
 0x447   : > { %3722 = vmatpush1.bf16.msra.mxu1 %v6213_v35 }
 0x448   : > { %3849 = vmatprep.subr.bf16.mxu1 %v6218_v36 }
 0x44a   : > { %3740 = vmatmul.mubr.bf16.vlgmr.msra.gmra.mrb[28].mxu1 %v3625_v38 }
 0x44b   : > { %3850 = vmatpush1.bf16.msra.mxu1 %v6216_v37  ;;  %3881 = vmatprep.mubr.bf16.mxu1 %v6402_v48  ;;  %v6225_v48 = vld [vmem:[%s8115_s5 + $0x1b0] ss:$8 sps:$4 sm:$0xff]  }
 0x44c   : > { %3851 = vmatprep.subr.bf16.mxu1 %v6221_v39 }
 0x44f   : > { %3852 = vmatpush1.bf16.msra.mxu1 %v6219_v40 }
 0x450   : > { %3853 = vmatprep.subr.bf16.mxu1 %v6224_v41  ;;  %v3892_v41 = vld [vmem:[%s8116_s6] sm:$0x3] }
 0x453   : > { %3854 = vmatpush1.bf16.msra.mxu1 %v6222_v42  ;;  %v3897_v42 = vrot.slane %v3892_v41, %v7437_v56 }
 0x454   : > { %3855 = vmatprep.subr.bf16.mxu1 %v6227_v43 }
 0x457   : > { %3856 = vmatpush1.bf16.msra.mxu1 %v6225_v48  ;;  %v3901_v48 = vrot.slane %v3892_v41, %v7442_v58  ;;  %v6325_v41 = vld [vmem:[%s8123_s13 + $0x10] sm:$0xff]  }
 0x458   : > { %3857 = vmatprep.subr.bf16.mxu1 %v6230_v44 }
 0x45b   : > { %3858 = vmatpush1.bf16.msra.mxu1 %v6228_v45 }
 0x45c   : > { %3859 = vmatprep.subr.bf16.mxu1 %v6233_v46 }
 0x45f   : > { %3860 = vmatpush1.bf16.msra.mxu1 %v6231_v47 }
 0x460   : > { %3861 = vmatprep.subr.bf16.mxu1 %v6236_v49 }
 0x463   : > { %3862 = vmatpush1.bf16.msra.mxu1 %v6234_v50 }
 0x464   : > { %3863 = vmatprep.subr.bf16.mxu1 %v6239_v51 }
 0x467   : > { %3864 = vmatpush1.bf16.msra.mxu1 %v6237_v52 }
 0x468   : > { %4114 = vmatprep.subr.bf16.mxu1 %v6242_v55  ;;  %v6289_v55 = vld [vmem:[%s8119_s9] sm:$0xff]  }
 0x46a   : > { %3882 = vmatmul.mubr.bf16.vlgmr.msra.gmra.mrb[32].mxu1 %v3767_v53 }
 0x46b   : > { %4115 = vmatpush1.bf16.msra.mxu1 %v6240_v54 }
 0x46c   : > { %4116 = vmatprep.subr.bf16.mxu1 %v6245_v57 }
 0x46f   : > { %4117 = vmatpush1.bf16.msra.mxu1 %v6243_v59  ;;  %v6290_v59 = vld [vmem:[%s8119_s9 + $0x48] sm:$0xff]  }
 0x470   : > { %4118 = vmatprep.subr.bf16.mxu1 %v6248_v60  ;;  %v6291_v60 = vld [vmem:[%s8119_s9 + $0x8] sm:$0xff]  }
 0x473   : > { %4119 = vmatpush1.bf16.msra.mxu1 %v6246_v61  ;;  %v6292_v61 = vld [vmem:[%s8119_s9 + $0x50] sm:$0xff]  }
 0x474   : > { %4120 = vmatprep.subr.bf16.mxu1 %v6251_v62  ;;  %v6293_v62 = vld [vmem:[%s8119_s9 + $0x10] sm:$0xff]  }
 0x477   : > { %4121 = vmatpush1.bf16.msra.mxu1 %v6249_v63  ;;  %v6294_v63 = vld [vmem:[%s8119_s9 + $0x58] sm:$0xff]  }
 0x478   : > { %4122 = vmatprep.subr.bf16.mxu1 %v6254_v0  ;;  %v6295_v0 = vld [vmem:[%s8119_s9 + $0x18] sm:$0xff]  }
 0x47b   : > { %4123 = vmatpush1.bf16.msra.mxu1 %v6252_v1  ;;  %v6296_v1 = vld [vmem:[%s8119_s9 + $0x60] sm:$0xff]  }
 0x47c   : > { %4124 = vmatprep.subr.bf16.mxu1 %v6257_v2  ;;  %v6297_v2 = vld [vmem:[%s8119_s9 + $0x20] sm:$0xff]  }
 0x47f   : > { %4125 = vmatpush1.bf16.msra.mxu1 %v6255_v3  ;;  %v6298_v3 = vld [vmem:[%s8119_s9 + $0x68] sm:$0xff]  }
 0x480   : > { %4126 = vmatprep.subr.bf16.mxu1 %v6260_v4  ;;  %v6299_v4 = vld [vmem:[%s8119_s9 + $0x28] sm:$0xff]  }
 0x483   : > { %4127 = vmatpush1.bf16.msra.mxu1 %v6258_v5  ;;  %v6300_v5 = vld [vmem:[%s8119_s9 + $0x70] sm:$0xff]  }
 0x484   : > { %4128 = vmatprep.subr.bf16.mxu1 %v6263_v6  ;;  %v6301_v6 = vld [vmem:[%s8119_s9 + $0x30] sm:$0xff]  }
 0x487   : > { %4129 = vmatpush1.bf16.msra.mxu1 %v6261_v7  ;;  %v6302_v7 = vld [vmem:[%s8119_s9 + $0x78] sm:$0xff]  }
 0x488   : > { %4130 = vmatprep.subr.bf16.mxu1 %v6266_v8  ;;  %v6303_v8 = vld [vmem:[%s8119_s9 + $0x38] sm:$0xff]  }
 0x48b   : > { %4131 = vmatpush1.bf16.msra.mxu1 %v6264_v9  ;;  %v6304_v9 = vld [vmem:[%s8121_s11 + $0x40] sm:$0xff]  }
 0x48c   : > { %4132 = vmatprep.subr.bf16.mxu1 %v6269_v10  ;;  %v3942_v10 = vld [vmem:[%s8118_s8] sm:$0x3] }
 0x48f   : > { %4133 = vmatpush1.bf16.msra.mxu1 %v6267_v11  ;;  %v3947_v11 = vrot.slane %v3942_v10, %v7437_v56  ;;  %v6306_v56 = vld [vmem:[%s8121_s11 + $0x48] sm:$0xff]  }
 0x490   : > { %4134 = vmatprep.subr.bf16.mxu1 %v6272_v12  ;;  %v3951_v12 = vrot.slane %v3942_v10, %v7442_v58  ;;  %v6307_v58 = vld [vmem:[%s8121_s11 + $0x8] sm:$0xff]  }
 0x493   : > { %4135 = vmatpush1.bf16.msra.mxu1 %v6270_v13 }
 0x494   : > { %4136 = vmatprep.subr.bf16.mxu1 %v6275_v14 }
 0x497   : > { %4137 = vmatpush1.bf16.msra.mxu1 %v6273_v15 }
 0x498   : > { %4138 = vmatprep.subr.bf16.mxu1 %v6278_v17 }
 0x49b   : > { %4139 = vmatpush1.bf16.msra.mxu1 %v6276_v18 }
 0x49c   : > { %4140 = vmatprep.subr.bf16.mxu1 %v6281_v20 }
 0x49f   : > { %4141 = vmatpush1.bf16.msra.mxu1 %v6279_v21 }
 0x4a0   : > { %4142 = vmatprep.subr.bf16.mxu1 %v6284_v22 }
 0x4a3   : > { %4143 = vmatpush1.bf16.msra.mxu1 %v6282_v23 }
 0x4a4   : > { %4144 = vmatprep.subr.bf16.mxu1 %v6287_v24  ;;  %v6305_v24 = vld [vmem:[%s8121_s11] sm:$0xff]  }
 0x4a7   : > { %4145 = vmatpush1.bf16.msra.mxu1 %v6285_v25 }
 0x4a8   : > { %5547 = vmatprep.subr.bf16.mxu1 %v6288_v26  ;;  %v6308_v26 = vld [vmem:[%s8121_s11 + $0x50] sm:$0xff]  }
 0x4dd   : > { %v3480_v27 = vpop.f32.mrb[20].mxu1 }
 0x4de   : > { %v3482_v28 = vpop.f32.mrb[21].mxu1 }
 0x4df   : > { %v3484_v29 = vpop.f32.mrb[22].mxu1 }
 0x4e0   : > { %v3485_v30 = vpop.f32.mrb[23].mxu1  ;;  %v6311_v29 = vld [vmem:[%s8121_s11 + $0x18] sm:$0xff]  }
 0x4e1   : > { %v6312_v30 = vld [vmem:[%s8121_s11 + $0x60] sm:$0xff]  }
 0x4fd   : > { %v3601_v31 = vpop.f32.mrb[24].mxu1 }
 0x4fe   : > { %v3602_v32 = vadd.f32 %v3601_v31, %v3480_v27  ;;  %v3603_v16 = vpop.f32.mrb[25].mxu1  ;;  %v6309_v27 = vld [vmem:[%s8121_s11 + $0x10] sm:$0xff]   ;;  %v6313_v31 = vld [vmem:[%s8121_s11 + $0x20] sm:$0xff]  }
 0x4ff   : > { %v3604_v19 = vadd.f32 %v3603_v16, %v3482_v28  ;;  %v3605_v33 = vpop.f32.mrb[26].mxu1  ;;  %v6310_v28 = vld [vmem:[%s8121_s11 + $0x58] sm:$0xff]   ;;  %v6315_v16 = vld [vmem:[%s8121_s11 + $0x28] sm:$0xff]  }
 0x500   : > { %v3606_v34 = vpop.f32.mrb[27].mxu1  ;;  %v6317_v33 = vld [vmem:[%s8121_s11 + $0x30] sm:$0xff]  }
 0x501   : > { %v6318_v34 = vld [vmem:[%s8121_s11 + $0x78] sm:$0xff]  }
 0x51d   : > { %v3741_v35 = vpop.f32.mrb[28].mxu1 }
 0x51e   : > { %v3748_v36 = vadd.f32 %v3741_v35, %v3602_v32  ;;  %v3743_v37 = vpop.f32.mrb[29].mxu1  ;;  %v6314_v32 = vld [vmem:[%s8121_s11 + $0x68] sm:$0xff]   ;;  %v6319_v35 = vld [vmem:[%s8121_s11 + $0x38] sm:$0xff]  }
 0x51f   : > { %v3749_v38 = vadd.f32 %v3743_v37, %v3604_v19  ;;  %v3745_v39 = vpop.f32.mrb[30].mxu1  ;;  %v6316_v19 = vld [vmem:[%s8121_s11 + $0x70] sm:$0xff]   ;;  %v6321_v37 = vld [vmem:[%s8123_s13] sm:$0xff]  }
 0x520   : > { %v3746_v40 = vpop.f32.mrb[31].mxu1  ;;  %v6323_v39 = vld [vmem:[%s8123_s13 + $0x8] sm:$0xff]  }
 0x521   : > { %v6324_v40 = vld [vmem:[%s8123_s13 + $0x50] sm:$0xff]  }
 0x53d   : > { %v3883_v43 = vpop.f32.mrb[32].mxu1 }
 0x53e   : > { %v3890_v44 = vadd.f32 %v3883_v43, %v3748_v36  ;;  %v3885_v45 = vpop.f32.mrb[33].mxu1  ;;  %v6320_v36 = vld [vmem:[%s8123_s13 + $0x40] sm:$0xff]   ;;  %v6327_v43 = vld [vmem:[%s8123_s13 + $0x18] sm:$0xff]  }
 0x53f   : > { %v3891_v46 = vadd.f32 %v3885_v45, %v3749_v38  ;;  %v3887_v47 = vpop.f32.mrb[34].mxu1  ;;  %v6322_v38 = vld [vmem:[%s8123_s13 + $0x48] sm:$0xff]  }
 0x540   : > { %v3904_v49 = vadd.f32 %v3897_v42, %v3890_v44  ;;  %v3888_v50 = vpop.f32.mrb[35].mxu1  ;;  %v6326_v42 = vld [vmem:[%s8123_s13 + $0x58] sm:$0xff]   ;;  %v6329_v44 = vld [vmem:[%s8123_s13 + $0x20] sm:$0xff]   ;;  %v6330_v45 = vld [vmem:[%s8123_s13 + $0x68] sm:$0xff]  }
 0x541   : > { %v3905_v51 = vadd.f32 %v3901_v48, %v3891_v46  ;;  %v6328_v48 = vld [vmem:[%s8123_s13 + $0x60] sm:$0xff]   ;;  %v6331_v46 = vld [vmem:[%s8123_s13 + $0x28] sm:$0xff]   ;;  %v6332_v47 = vld [vmem:[%s8123_s13 + $0x70] sm:$0xff]  }
 0x542   : > { %v3906_v52 = vmax.f32 %v3904_v49, 0.0  ;;  %v6333_v49 = vld [vmem:[%s8123_s13 + $0x30] sm:$0xff]   ;;  %v6334_v50 = vld [vmem:[%s8123_s13 + $0x78] sm:$0xff]  }
 0x543   : > { %v3907_v53 = vmax.f32 %v3905_v51, 0.0  ;;  %v6335_v51 = vld [vmem:[%s8123_s13 + $0x38] sm:$0xff]  }
 0x544   : > { %v3908_v57 = vpack.c.bf16 %v3906_v52, %v3906_v52 }
 0x545   : > { %v3909_v54 = vpack.c.bf16 %v3907_v53, %v3907_v53  ;;  %v5402_v53 = vld [vmem:[%s8120_s10] ss:$0 sm:$0xff] }
 0x547   : > { %4146 = vmatprep.mubr.bf16.mxu1 %v3909_v54 }
 0x548   : > { %4147 = vmatmul.mubr.bf16.vlgmr.msra.gmra.mrb[36].mxu1 %v3908_v57 }
 0x549   : > { %5548 = vmatpush3.bf16.msra.mxu1 %v6289_v55 }
 0x54a   : > { %5549 = vmatprep.subr.bf16.mxu1 %v6290_v59 }
 0x54d   : > { %5550 = vmatpush3.bf16.msra.mxu1 %v6291_v60 }
 0x54e   : > { %5551 = vmatprep.subr.bf16.mxu1 %v6292_v61 }
 0x551   : > { %5552 = vmatpush3.bf16.msra.mxu1 %v6293_v62 }
 0x552   : > { %5553 = vmatprep.subr.bf16.mxu1 %v6294_v63 }
 0x555   : > { %5554 = vmatpush3.bf16.msra.mxu1 %v6295_v0 }
 0x556   : > { %5555 = vmatprep.subr.bf16.mxu1 %v6296_v1 }
 0x559   : > { %5556 = vmatpush3.bf16.msra.mxu1 %v6297_v2 }
 0x55a   : > { %5557 = vmatprep.subr.bf16.mxu1 %v6298_v3  ;;  %v5436_v3 = vld [vmem:[%s8124_s14] ss:$0 sm:$0xff] }
 0x55d   : > { %5558 = vmatpush3.bf16.msra.mxu1 %v6299_v4 }
 0x55e   : > { %5559 = vmatprep.subr.bf16.mxu1 %v6300_v5 }
 0x561   : > { %5560 = vmatpush3.bf16.msra.mxu1 %v6301_v6 }
 0x562   : > { %5561 = vmatprep.subr.bf16.mxu1 %v6302_v7 }
 0x565   : > { %5562 = vmatpush3.bf16.msra.mxu1 %v6303_v8 }
 0x566   : > { %5569 = vmatprep.subr.bf16.mxu1 %v6304_v9 }
 0x61b   : > { %v4148_v13 = vpop.f32.mrb[36].mxu1 }
 0x61c   : > { %v4149_v14 = vadd.f32 %v4148_v13, %v3947_v11  ;;  %v4150_v15 = vpop.f32.mrb[37].mxu1  ;;  %v4684_v11 = vld [vmem:[%s569_s30] sm:$0x3]  ;;  %s4701_s30 = scalar_lea.sflag [#allocation4], %s559_s24 }
 0x61d   : > { %v4151_v17 = vadd.f32 %v4150_v15, %v3951_v12  ;;  %v4152_v18 = vpop.f32.mrb[38].mxu1  ;;  %v5419_v12 = vld [vmem:[%s8122_s12] ss:$0 sm:$0xff] }
 0x61e   : > { %v4155_v20 = vmax.f32 %v4149_v14, 0.0  ;;  %v4153_v21 = vpop.f32.mrb[39].mxu1 }
 0x61f   : > { %v4156_v22 = vmax.f32 %v4151_v17, 0.0 }
 0x620   : > { %v7952_v25 = vpack.c.bf16 %v4155_v20, %v4155_v20 }
 0x621   : > { %v4158_v23 = vpack.c.bf16 %v4156_v22, %v4156_v22 }
 0x623   : > { %4326 = vmatprep.mubr.bf16.mxu1 %v4158_v23 }
 0x624   : > { %4327 = vmatmul.mubr.bf16.vlgmr.msra.gmra.mrb[40].mxu1 %v7952_v25 }
 0x625   : > { %5570 = vmatpush3.bf16.msra.mxu1 %v6305_v24  ;;  %4501 = vmatprep.mubr.bf16.mxu1 %v4158_v23 }
 0x626   : > { %5571 = vmatprep.subr.bf16.mxu1 %v6306_v56 }
 0x629   : > { %5572 = vmatpush3.bf16.msra.mxu1 %v6307_v58 }
 0x62a   : > { %5573 = vmatprep.subr.bf16.mxu1 %v6308_v26 }
 0x62d   : > { %5574 = vmatpush3.bf16.msra.mxu1 %v6309_v27 }
 0x62e   : > { %5575 = vmatprep.subr.bf16.mxu1 %v6310_v28 }
 0x631   : > { %5576 = vmatpush3.bf16.msra.mxu1 %v6311_v29 }
 0x632   : > { %5577 = vmatprep.subr.bf16.mxu1 %v6312_v30 }
 0x635   : > { %5578 = vmatpush3.bf16.msra.mxu1 %v6313_v31 }
 0x636   : > { %5579 = vmatprep.subr.bf16.mxu1 %v6314_v32 }
 0x639   : > { %5580 = vmatpush3.bf16.msra.mxu1 %v6315_v16 }
 0x63a   : > { %5581 = vmatprep.subr.bf16.mxu1 %v6316_v19 }
 0x63d   : > { %5582 = vmatpush3.bf16.msra.mxu1 %v6317_v33 }
 0x63e   : > { %5583 = vmatprep.subr.bf16.mxu1 %v6318_v34 }
 0x641   : > { %5584 = vmatpush3.bf16.msra.mxu1 %v6319_v35 }
 0x642   : > { %5591 = vmatprep.subr.bf16.mxu1 %v6320_v36 }
 0x644   : > { %4502 = vmatmul.mubr.bf16.vlgmr.msra.gmra.mrb[44].mxu1 %v7952_v25 }
 0x645   : > { %5592 = vmatpush3.bf16.msra.mxu1 %v6321_v37  ;;  %4676 = vmatprep.mubr.bf16.mxu1 %v4158_v23 }
 0x646   : > { %5593 = vmatprep.subr.bf16.mxu1 %v6322_v38 }
 0x649   : > { %5594 = vmatpush3.bf16.msra.mxu1 %v6323_v39 }
 0x64a   : > { %5595 = vmatprep.subr.bf16.mxu1 %v6324_v40 }
 0x64d   : > { %5596 = vmatpush3.bf16.msra.mxu1 %v6325_v41 }
 0x64e   : > { %5597 = vmatprep.subr.bf16.mxu1 %v6326_v42 }
 0x651   : > { %5598 = vmatpush3.bf16.msra.mxu1 %v6327_v43 }
 0x652   : > { %5599 = vmatprep.subr.bf16.mxu1 %v6328_v48 }
 0x655   : > { %5600 = vmatpush3.bf16.msra.mxu1 %v6329_v44 }
 0x656   : > { %5601 = vmatprep.subr.bf16.mxu1 %v6330_v45 }
 0x659   : > { %5602 = vmatpush3.bf16.msra.mxu1 %v6331_v46 }
 0x65a   : > { %5603 = vmatprep.subr.bf16.mxu1 %v6332_v47 }
 0x65d   : > { %5604 = vmatpush3.bf16.msra.mxu1 %v6333_v49 }
 0x65e   : > { %5605 = vmatprep.subr.bf16.mxu1 %v6334_v50 }
 0x661   : > { %5606 = vmatpush3.bf16.msra.mxu1 %v6335_v51 }
 0x664   : > { %4677 = vmatmul.mubr.bf16.vlgmr.msra.gmra.mrb[48].mxu1 %v7952_v25 }
 0x6f7   : > { %v5563_v52 = vpop.f32.mrb[40].mxu1 }
 0x6f8   : > { %v5564_v54 = vpop.f32.mrb[41].mxu1 }
 0x6f9   : > { %v5565_v55 = vadd.f32 %v5564_v54, %v5563_v52  ;;  %v5566_v57 = vpop.f32.mrb[42].mxu1 }
 0x6fa   : > { %v5567_v59 = vpop.f32.mrb[43].mxu1 }
 0x6fb   : > { %v4329_v60 = vadd.f32 %v5565_v55, %v5402_v53 }
 0x6fd   : > { %4690 = vst [vmem:[%s573_s29] sm:$0x3] %v4329_v60  ;;  %s4716_s29 = sshll.u32 %s560_s17, 4  ;;  %s8070_s29 = int_to_ptr.vmem [resolvable:$true] %s4716_s29 }
 0x6fe   : > { %s6338_s26 = scalar_lea.vmem %s8070_s29, 16  ;;  %p6345_p0 = scmp.lt.s32.totalorder %s8070_s29, %s6343_s18 }
 0x6ff   : > { %p6339_p11 = scmp.ne.s32.totalorder %s8070_s29, %s6338_s26  ;;  %p6346_p1 = scmp.lt.s32.totalorder %s6344_s2, %s6338_s26 }
 0x701   : > { %p6340_p12 = pnand %p6339_p11, %p6532_p5  ;;  %p6347_p2 = por %p6346_p1, %p6345_p0 }
 0x703   : > { %p6341_p13 = pneg %p6340_p12 }
 0x705   : > { %p6348_p3 = pnand %p6347_p2, %p6341_p13 }
 0x717   : > { %v5585_v61 = vpop.f32.mrb[44].mxu1 }
 0x718   : > { %v5586_v62 = vpop.f32.mrb[45].mxu1 }
 0x719   : > { %v5587_v63 = vadd.f32 %v5586_v62, %v5585_v61  ;;  %v5588_v0 = vpop.f32.mrb[46].mxu1 }
 0x71a   : > { %v5589_v1 = vpop.f32.mrb[47].mxu1 }
 0x71b   : > { %v4504_v14 = vadd.f32 %v5587_v63, %v5419_v12 }
 0x737   : > { %v5607_v2 = vpop.f32.mrb[48].mxu1 }
 0x738   : > { %v5608_v4 = vpop.f32.mrb[49].mxu1 }
 0x739   : > { %v5609_v5 = vadd.f32 %v5608_v4, %v5607_v2  ;;  %v5610_v6 = vpop.f32.mrb[50].mxu1 }
 0x73a   : > { %v5611_v7 = vpop.f32.mrb[51].mxu1 }
 0x73b   : > { %v4679_v8 = vadd.f32 %v5609_v5, %v5436_v3 }
 0x73d   : > { %v4685_v9 = vmul.f32 0.5, %v4679_v8 }
 0x73f   : > { %v4686_v10 = vmul.f32 1.442695, %v4685_v9 }
 0x741   : > { %6336 = vpow2.f32 %v4686_v10 }
 0x74b   : > { %v6337_v13 = vpop.eup %6336 }
 0x74c   : > { %v4688_v15 = vmul.f32 %v6337_v13, %v4684_v11 }
 0x74e   : > { %v4689_v17 = vadd.f32 %v4688_v15, %v4504_v14 }
 0x750   : > { %v4692_v18 = vrot.slane %v4689_v17, 7 }
 0x752   : > { %v4694_v20 = vsub.f32 %v4689_v17, %v4692_v18 }
 0x754   : > { %4695 = vst [vmem:[%s560_s17 - $0x1] sm:$0x2] %v4694_v20 }
 0x755   : > { %6351 = shalt.err (!%p6348_p3)
}
 0x756   : > { %s6352_s24 = scalar_lea.hbm %s8068_s20, 16  ;;  %s6356_s0 = scalar_lea.hbm %s8152_s22, 32 }
 0x757   : > { %p6353_p4 = scmp.ne.s32.totalorder %s8068_s20, %s6352_s24  ;;  %p6357_p9 = scmp.lt.u32.totalorder %s8068_s20, %s8152_s22 }
 0x758   : > { %p6358_p10 = scmp.lt.u32.totalorder %s6356_s0, %s6352_s24  ;;  %p6360_p12 = scmp.lt.u32.totalorder %s6352_s24, %s8068_s20 }
 0x759   : > { %p6354_p7 = pnand %p6353_p4, %p6532_p5 }
 0x75a   : > { %p6359_p11 = por %p6358_p10, %p6357_p9 }
 0x75b   : > { %p6355_p8 = pneg %p6354_p7 }
 0x75c   : > { %p6361_p13 = por %p6360_p12, %p6359_p11 }
 0x75e   : > { %p6362_p0 = pnand %p6361_p13, %p6355_p8 }
 0x760   : > { %6365 = shalt.err (!%p6362_p0)
}
 0x761   : > { %5645 = dma.vmem_to_hbm [thread:$0]  (%p6532_p5), %s8070_s29, 16, %s8068_s20, %s4701_s30  }
 0x762 PF: > { %s8153_s2 = sld [smem:[#allocation8_spill]]  ;;  %s8154_s26 = sld [smem:[#allocation6_spill]] }
 0x768   : > { %p5651_p1 = scmp.ge.s32.totalorder %s8153_s2, 2  ;;  %s4735_s18 = sand.u32 1, %s8154_s26  }
 0x769   : > { %s4736_s21 = scalar_lea.sflag [#allocation4], %s4735_s18 }
 0x76a   : > { %p5648_p2 = pnand %p5651_p1, %p6536_p6 }
 0x76c   : > { %6383 = dma.done.wait (!%p5648_p2), %s4736_s21, 16  }
 0x76d   : > { %6385 = vsyncadd (!%p5648_p2), %s4736_s21, 4294967280  ;;  %s8156_s27 = sld [smem:[#allocation9_spill]]  ;;  %s8157_s17 = sld [smem:[#allocation7_spill]] }
 0x76e   : > { %s8158_s26 = sld [smem:[#allocation10_spill]]  ;;  %s8159_s24 = smov %s6392_s25 }
 0x773   : > { %p28_p3 = scmp.ge.s32.totalorder %s8156_s27, 4   ;;  %s8160_s25 = smov %s8157_s17 }
 0x775   :  { %30 = sbr.rel (!%p28_p3) target bundleno = 8 (0x8), region = 140 }
 0x77c   :  { %4740 = vsyncpa [#allocation4], 1 }
 0x77d   :  { %4742 = vsyncpa [#allocation4 + $0x1], 1 }

</bundles_post_ra>
